<compile_context>
chip_gen: v6e
topology: v6e:2x2x1
jax: 0.10.0
libtpu: 0.0.40
codegen_flags: <defaults>
</compile_context>

<pallas_src>
import numpy as np

import jax
import jax.numpy as jnp
from jax.experimental import pallas as pl
from jax.experimental.pallas import tpu as pltpu


# ----------------------------------------------------------------------------
# Host-side weight preparation
# ----------------------------------------------------------------------------
def _expand_conv_weight(w_oihw, win, ow_out, stride, pad):
    """Fold kernel-column taps, column padding and column stride into one
    matmul weight per kernel row.

    Returns E with shape (KH, win*Cin, ow_out*Cout) such that, for the row-slab
    slab_i[r, wi*Cin + ci] = x[row_taps(r, i), wi, ci],
        out[r, ow*Cout + co] = sum_i slab_i @ E[i].
    """
    w = np.asarray(w_oihw, dtype=np.float32)           # (Cout, Cin, KH, KW)
    cout, cin, kh, kw = w.shape
    e = np.zeros((kh, win * cin, ow_out * cout), np.float32)
    for i in range(kh):
        for o in range(ow_out):
            for j in range(kw):
                wi = stride * o + j - pad
                if 0 <= wi < win:
                    e[i, wi * cin:(wi + 1) * cin,
                      o * cout:(o + 1) * cout] = w[:, :, i, j].T
    return e


def prepare_params(p, s):
    """One-time host prep: expanded conv weights (bf16), tiled bias rows (f32),
    stacked BN params and channel selector matrices."""
    oh1 = (s - 9) // 2 + 1          # conv1 output spatial (valid, stride 2)
    oh4 = (oh1 - 5) // 2 + 1        # conv4 output spatial (valid, stride 2)
    f32 = jnp.float32

    def wdev(a):
        return jnp.asarray(a, jnp.bfloat16)

    def tile_bias(b, ow):
        return jnp.asarray(np.tile(np.asarray(b, np.float32), ow).reshape(1, -1), f32)

    return dict(
        w1=wdev(_expand_conv_weight(p["w1"], s, oh1, 2, 0)),
        w2=wdev(_expand_conv_weight(p["w2"], oh1, oh1, 1, 3)),
        w3=wdev(_expand_conv_weight(p["w3"], oh1, oh1, 1, 3)),
        w4=wdev(_expand_conv_weight(p["w4"], oh1, oh4, 2, 0)),
        w5=wdev(_expand_conv_weight(p["w5"], oh4, oh4, 1, 1)),
        w6=wdev(_expand_conv_weight(p["w6"], oh4, oh4, 1, 1)),
        b1=tile_bias(p["b1"], oh1), b2=tile_bias(p["b2"], oh1),
        b3=tile_bias(p["b3"], oh1), b4=tile_bias(p["b4"], oh4),
        b5=tile_bias(p["b5"], oh4), b6=tile_bias(p["b6"], oh4),
        bn1=jnp.stack([p["g1"], p["be1"]]).astype(f32),
        bn2=jnp.stack([p["g2"], p["be2"]]).astype(f32),
        bn3=jnp.stack([p["g3"], p["be3"]]).astype(f32),
        bn4=jnp.stack([p["g4"], p["be4"]]).astype(f32),
        # selectors: (OW*C, C) channel-sum / (C, OW*C) channel-broadcast
        sel8=jnp.asarray(np.tile(np.eye(8, dtype=np.float32), (oh1, 1)), f32),
        selT8=jnp.asarray(np.tile(np.eye(8, dtype=np.float32), (1, oh1)), f32),
        sel16=jnp.asarray(np.tile(np.eye(16, dtype=np.float32), (oh4, 1)), f32),
        selT16=jnp.asarray(np.tile(np.eye(16, dtype=np.float32), (1, oh4)), f32),
    )


# ----------------------------------------------------------------------------
# Fused encoder kernel
# ----------------------------------------------------------------------------
def make_cred_forward(s=32, n=2):
    assert s % 2 == 0 and s >= 22
    oh1 = (s - 9) // 2 + 1          # 12 for s=32
    oh4 = (oh1 - 5) // 2 + 1        # 4  for s=32
    assert oh1 % 2 == 0
    c1, c2 = 8, 16
    owc1 = oh1 * c1                 # row width of stage-1/2/3 activations (96)
    owc4 = oh4 * c2                 # row width of stage-4/5/6 activations (64)
    w_in = s * 3                    # input row width (w * Cin)
    half = s // 2
    h1 = oh1 // 2                   # half of stage-1 spatial (conv4 parity split)
    cnt12 = float(n * oh1 * oh1)    # BN element count, stages 1-2
    cnt34 = float(n * oh4 * oh4)    # BN element count, stages 3-4
    eps = 1e-5
    bf16 = jnp.bfloat16

    def kernel(x_ref, w1_ref, b1_ref, w2_ref, b2_ref, w3_ref, b3_ref,
               w4_ref, b4_ref, w5_ref, b5_ref, w6_ref, b6_ref,
               bn1_ref, bn2_ref, bn3_ref, bn4_ref,
               sel8_ref, selT8_ref, sel16_ref, selT16_ref,
               o_ref, bufA, bufB, bufC):

        def conv(slab_fn, w_ref, b_ref, kh):
            """Single f32 accumulator chain of bf16 matmuls (one per kernel row);
            batch is fused into the M axis of every slab."""
            acc = jnp.dot(slab_fn(0), w_ref[0],
                          preferred_element_type=jnp.float32)
            for i in range(1, kh):
                acc = acc + jnp.dot(slab_fn(i), w_ref[i],
                                    preferred_element_type=jnp.float32)
            return acc + b_ref[...]                       # (rows, owc) f32

        def bn_relu(x, bn_ref, sel_ref, selT_ref, count, residual=None):
            """Training-mode BN (batch stats, biased var) + ReLU (+ residual)."""
            colsum = x.sum(axis=0, keepdims=True)          # (1, owc)
            colsq = (x * x).sum(axis=0, keepdims=True)
            sel = sel_ref[...]
            csum = jnp.dot(colsum, sel, preferred_element_type=jnp.float32)
            csq = jnp.dot(colsq, sel, preferred_element_type=jnp.float32)
            mean = csum * (1.0 / count)
            var = csq * (1.0 / count) - mean * mean
            a = bn_ref[0:1, :] * jax.lax.rsqrt(var + eps)  # gamma * rstd
            sh = bn_ref[1:2, :] - mean * a                 # beta - mean*a
            selT = selT_ref[...]
            a_full = jnp.dot(a, selT, preferred_element_type=jnp.float32)
            sh_full = jnp.dot(sh, selT, preferred_element_type=jnp.float32)
            y = jnp.maximum(x * a_full + sh_full, 0.0)
            if residual is not None:
                y = y + residual
            return y

        # ---- conv1: 9x9, stride 2, valid.  Parity-split, batch-interleaved
        #      input -> every tap is one contiguous (n*oh1, w_in) slab.
        def slab1(i):
            r0 = ((i % 2) * half + i // 2) * n
            return x_ref[r0:r0 + oh1 * n, :]
        x1 = conv(slab1, w1_ref, b1_ref, 9)               # (n*oh1, owc1) f32, residual 1
        t = bn_relu(x1, bn1_ref, sel8_ref, selT8_ref, cnt12)

        # zero only the 'same'-padding border rows (interior overwritten below)
        zA = jnp.zeros((3 * n, owc1), bf16)
        bufA[0:3 * n, :] = zA
        bufA[(3 + oh1) * n:(6 + oh1) * n, :] = zA
        bufA[3 * n:(3 + oh1) * n, :] = t.astype(bf16)

        # ---- conv2: 7x7, stride 1, 'same' (column taps folded into weights)
        def slabA(i):
            return bufA[i * n:(i + oh1) * n, :]
        x2 = conv(slabA, w2_ref, b2_ref, 7)
        t = bn_relu(x2, bn2_ref, sel8_ref, selT8_ref, cnt12, residual=x1)
        bufA[3 * n:(3 + oh1) * n, :] = t.astype(bf16)      # borders stay zero

        # ---- conv3: 7x7, stride 1, 'same' (no BN)
        x3 = conv(slabA, w3_ref, b3_ref, 7)

        # one-time parity-split scatter of x3 (even rows | odd rows, batch
        # interleaved) so conv4's stride-2 row taps are contiguous slab reads
        x3b = x3.astype(bf16)
        for r in range(oh1):
            dst = ((r % 2) * h1 + r // 2) * n
            bufC[dst:dst + n, :] = x3b[r * n:(r + 1) * n, :]

        # ---- conv4: 5x5, stride 2, valid
        def slab4(i):
            r0 = ((i % 2) * h1 + i // 2) * n
            return bufC[r0:r0 + oh4 * n, :]
        x4 = conv(slab4, w4_ref, b4_ref, 5)                # (n*oh4, owc4) f32, residual 2
        t = bn_relu(x4, bn3_ref, sel16_ref, selT16_ref, cnt34)

        zB = jnp.zeros((n, owc4), bf16)
        bufB[0:n, :] = zB
        bufB[(1 + oh4) * n:(2 + oh4) * n, :] = zB
        bufB[n:(1 + oh4) * n, :] = t.astype(bf16)

        # ---- conv5: 3x3, stride 1, 'same'
        def slabB(i):
            return bufB[i * n:(i + oh4) * n, :]
        x5 = conv(slabB, w5_ref, b5_ref, 3)
        t = bn_relu(x5, bn4_ref, sel16_ref, selT16_ref, cnt34)
        bufB[n:(1 + oh4) * n, :] = t.astype(bf16)

        # ---- conv6: 3x3, stride 1, 'same'  + residual 2  -> one output store
        x6 = conv(slabB, w6_ref, b6_ref, 3)
        o_ref[...] = x6 + x4

    def full(shape):
        nd = len(shape)
        return pl.BlockSpec(shape, lambda i, _nd=nd: (0,) * _nd)

    in_shapes = [
        (n * s, w_in),                          # x (parity-split, batch-interleaved)
        (9, w_in, owc1), (1, owc1),             # w1, b1
        (7, owc1, owc1), (1, owc1),             # w2, b2
        (7, owc1, owc1), (1, owc1),             # w3, b3
        (5, owc1, owc4), (1, owc4),             # w4, b4
        (3, owc4, owc4), (1, owc4),             # w5, b5
        (3, owc4, owc4), (1, owc4),             # w6, b6
        (2, c1), (2, c1), (2, c2), (2, c2),     # bn1..bn4 (gamma;beta)
        (owc1, c1), (c1, owc1),                 # sel8, selT8
        (owc4, c2), (c2, owc4),                 # sel16, selT16
    ]

    call = pl.pallas_call(
        kernel,
        out_shape=jax.ShapeDtypeStruct((n * oh4, owc4), jnp.float32),
        grid=(1,),
        in_specs=[full(sh) for sh in in_shapes],
        out_specs=full((n * oh4, owc4)),
        scratch_shapes=[
            pltpu.VMEM(((oh1 + 6) * n, owc1), bf16),   # bufA: padded stage-1/2 acts
            pltpu.VMEM(((oh4 + 2) * n, owc4), bf16),   # bufB: padded stage-4/5 acts
            pltpu.VMEM((oh1 * n, owc1), bf16),         # bufC: parity-split conv3 out
        ],
        compiler_params=pltpu.CompilerParams(
            dimension_semantics=("arbitrary",)),
    )

    def forward(x_nchw, prep):
        assert x_nchw.shape == (n, 3, s, s), x_nchw.shape
        # NCHW -> NHWC, split H rows by parity (conv1 stride-2 row taps become
        # contiguous), interleave batch as the minor row factor, cast to bf16.
        xh = jnp.transpose(x_nchw, (0, 2, 3, 1))                  # (n, s, s, 3)
        xps = jnp.stack([xh[:, 0::2], xh[:, 1::2]], axis=0)        # (2, n, s/2, s, 3)
        xps = jnp.transpose(xps, (0, 2, 1, 3, 4))                  # (2, s/2, n, s, 3)
        x2d = xps.reshape(n * s, w_in).astype(jnp.bfloat16)
        out2d = call(
            x2d,
            prep["w1"], prep["b1"], prep["w2"], prep["b2"],
            prep["w3"], prep["b3"], prep["w4"], prep["b4"],
            prep["w5"], prep["b5"], prep["w6"], prep["b6"],
            prep["bn1"], prep["bn2"], prep["bn3"], prep["bn4"],
            prep["sel8"], prep["selT8"], prep["sel16"], prep["selT16"])
        # rows are (oh*n + b); columns are (ow*c2 + co)
        out = out2d.reshape(oh4, n, oh4, c2)
        out = jnp.transpose(out, (1, 0, 2, 3))                     # (n, oh4, oh4, c2)
        return jnp.transpose(out, (0, 3, 1, 2))                    # NCHW

    return forward


# ----------------------------------------------------------------------------
# Pure-JAX reference (training-mode BN, matches a fresh torch module)
# ----------------------------------------------------------------------------
def reference_forward(x, p):
    hp = jax.lax.Precision.HIGHEST

    def conv(x, w, b, stride, padding):
        y = jax.lax.conv_general_dilated(
            x, w, window_strides=(stride, stride), padding=padding,
            dimension_numbers=("NCHW", "OIHW", "NCHW"), precision=hp)
        return y + b.reshape(1, -1, 1, 1)

    def bn_relu(x, g, be):
        mean = jnp.mean(x, axis=(0, 2, 3), keepdims=True)
        var = jnp.mean((x - mean) ** 2, axis=(0, 2, 3), keepdims=True)
        y = (x - mean) * jax.lax.rsqrt(var + 1e-5)
        return jnp.maximum(y * g.reshape(1, -1, 1, 1) + be.reshape(1, -1, 1, 1), 0.0)

    x1 = conv(x, p["w1"], p["b1"], 2, "VALID")
    t = bn_relu(x1, p["g1"], p["be1"])
    t = conv(t, p["w2"], p["b2"], 1, "SAME")
    t = bn_relu(t, p["g2"], p["be2"]) + x1
    t = conv(t, p["w3"], p["b3"], 1, "SAME")
    x4 = conv(t, p["w4"], p["b4"], 2, "VALID")
    t = bn_relu(x4, p["g3"], p["be3"])
    t = conv(t, p["w5"], p["b5"], 1, "SAME")
    t = bn_relu(t, p["g4"], p["be4"])
    return conv(t, p["w6"], p["b6"], 1, "SAME") + x4


# ----------------------------------------------------------------------------
# Deterministic synthetic parameters (shapes from the torch __init__)
# ----------------------------------------------------------------------------
def init_params(key):
    ks = jax.random.split(key, 12)

    def w(k, shape):
        fan_in = shape[1] * shape[2] * shape[3]
        return (jax.random.normal(k, shape, jnp.float32) / jnp.sqrt(fan_in)).astype(jnp.float32)

    def b(k, m):
        return (0.05 * jax.random.normal(k, (m,), jnp.float32)).astype(jnp.float32)

    return dict(
        w1=w(ks[0], (8, 3, 9, 9)),    b1=b(ks[1], 8),
        w2=w(ks[2], (8, 8, 7, 7)),    b2=b(ks[3], 8),
        w3=w(ks[4], (8, 8, 7, 7)),    b3=b(ks[5], 8),
        w4=w(ks[6], (16, 8, 5, 5)),   b4=b(ks[7], 16),
        w5=w(ks[8], (16, 16, 3, 3)),  b5=b(ks[9], 16),
        w6=w(ks[10], (16, 16, 3, 3)), b6=b(ks[11], 16),
        g1=jnp.ones((8,), jnp.float32),  be1=jnp.zeros((8,), jnp.float32),
        g2=jnp.ones((8,), jnp.float32),  be2=jnp.zeros((8,), jnp.float32),
        g3=jnp.ones((16,), jnp.float32), be3=jnp.zeros((16,), jnp.float32),
        g4=jnp.ones((16,), jnp.float32), be4=jnp.zeros((16,), jnp.float32),
    )


if __name__ == "__main__":
    key = jax.random.PRNGKey(0)
    # batch=2, channels=3 (module requires 3), spatial 32 -> conv1 -> 12 -> conv4 -> 4
    x = jax.random.normal(key, (2, 3, 32, 32), jnp.float32)
    params = init_params(jax.random.PRNGKey(1))

    prep = prepare_params(params, s=32)
    # TODO(synk): BatchNorm running-stat buffers (eval-mode inference path) are
    # not tracked; the forward uses training-mode batch statistics like a
    # freshly constructed torch module.
    fwd = jax.jit(make_cred_forward(s=32, n=2))

    out = jax.block_until_ready(fwd(x, prep))
    assert out.shape == (2, 16, 4, 4), out.shape
    assert bool(jnp.isfinite(out).all())

    ref = reference_forward(x, params)
    max_ref = float(jnp.max(jnp.abs(ref)))
    err = float(jnp.max(jnp.abs(out - ref)))
    tol = 0.1 * max_ref + 0.05          # loose: conv matmuls run in bf16
    assert err < tol, (err, tol)
    print("KERNEL_OK")
</pallas_src>

<mosaic_0001>
module attributes {stable_mosaic.version = 11 : i64} {
  func.func @kernel(%arg0: i32, %arg1: memref<64x96xbf16, #tpu.memory_space<vmem>>, %arg2: memref<9x96x96xbf16, #tpu.memory_space<vmem>>, %arg3: memref<1x96xf32, #tpu.memory_space<vmem>>, %arg4: memref<7x96x96xbf16, #tpu.memory_space<vmem>>, %arg5: memref<1x96xf32, #tpu.memory_space<vmem>>, %arg6: memref<7x96x96xbf16, #tpu.memory_space<vmem>>, %arg7: memref<1x96xf32, #tpu.memory_space<vmem>>, %arg8: memref<5x96x64xbf16, #tpu.memory_space<vmem>>, %arg9: memref<1x64xf32, #tpu.memory_space<vmem>>, %arg10: memref<3x64x64xbf16, #tpu.memory_space<vmem>>, %arg11: memref<1x64xf32, #tpu.memory_space<vmem>>, %arg12: memref<3x64x64xbf16, #tpu.memory_space<vmem>>, %arg13: memref<1x64xf32, #tpu.memory_space<vmem>>, %arg14: memref<2x8xf32, #tpu.memory_space<vmem>>, %arg15: memref<2x8xf32, #tpu.memory_space<vmem>>, %arg16: memref<2x16xf32, #tpu.memory_space<vmem>>, %arg17: memref<2x16xf32, #tpu.memory_space<vmem>>, %arg18: memref<96x8xf32, #tpu.memory_space<vmem>>, %arg19: memref<8x96xf32, #tpu.memory_space<vmem>>, %arg20: memref<64x16xf32, #tpu.memory_space<vmem>>, %arg21: memref<16x64xf32, #tpu.memory_space<vmem>>, %arg22: memref<8x64xf32, #tpu.memory_space<vmem>>, %arg23: memref<36x96xbf16, #tpu.memory_space<vmem>>, %arg24: memref<12x64xbf16, #tpu.memory_space<vmem>>, %arg25: memref<24x96xbf16, #tpu.memory_space<vmem>>) attributes {dimension_semantics = [#tpu.dimension_semantics<arbitrary>], iteration_bounds = array<i64: 1>, scalar_prefetch = 0 : i64, scratch_operands = 3 : i64, tpu.core_type = #tpu.core_type<tc>, window_params = [{pipeline_mode = #tpu.pipeline_mode<synchronous>, transform_indices = @transform_0, window_bounds = array<i64: 64, 96>}, {pipeline_mode = #tpu.pipeline_mode<synchronous>, transform_indices = @transform_1, window_bounds = array<i64: 9, 96, 96>}, {pipeline_mode = #tpu.pipeline_mode<synchronous>, transform_indices = @transform_2, window_bounds = array<i64: 1, 96>}, {pipeline_mode = #tpu.pipeline_mode<synchronous>, transform_indices = @transform_3, window_bounds = array<i64: 7, 96, 96>}, {pipeline_mode = #tpu.pipeline_mode<synchronous>, transform_indices = @transform_4, window_bounds = array<i64: 1, 96>}, {pipeline_mode = #tpu.pipeline_mode<synchronous>, transform_indices = @transform_5, window_bounds = array<i64: 7, 96, 96>}, {pipeline_mode = #tpu.pipeline_mode<synchronous>, transform_indices = @transform_6, window_bounds = array<i64: 1, 96>}, {pipeline_mode = #tpu.pipeline_mode<synchronous>, transform_indices = @transform_7, window_bounds = array<i64: 5, 96, 64>}, {pipeline_mode = #tpu.pipeline_mode<synchronous>, transform_indices = @transform_8, window_bounds = array<i64: 1, 64>}, {pipeline_mode = #tpu.pipeline_mode<synchronous>, transform_indices = @transform_9, window_bounds = array<i64: 3, 64, 64>}, {pipeline_mode = #tpu.pipeline_mode<synchronous>, transform_indices = @transform_10, window_bounds = array<i64: 1, 64>}, {pipeline_mode = #tpu.pipeline_mode<synchronous>, transform_indices = @transform_11, window_bounds = array<i64: 3, 64, 64>}, {pipeline_mode = #tpu.pipeline_mode<synchronous>, transform_indices = @transform_12, window_bounds = array<i64: 1, 64>}, {pipeline_mode = #tpu.pipeline_mode<synchronous>, transform_indices = @transform_13, window_bounds = array<i64: 2, 8>}, {pipeline_mode = #tpu.pipeline_mode<synchronous>, transform_indices = @transform_14, window_bounds = array<i64: 2, 8>}, {pipeline_mode = #tpu.pipeline_mode<synchronous>, transform_indices = @transform_15, window_bounds = array<i64: 2, 16>}, {pipeline_mode = #tpu.pipeline_mode<synchronous>, transform_indices = @transform_16, window_bounds = array<i64: 2, 16>}, {pipeline_mode = #tpu.pipeline_mode<synchronous>, transform_indices = @transform_17, window_bounds = array<i64: 96, 8>}, {pipeline_mode = #tpu.pipeline_mode<synchronous>, transform_indices = @transform_18, window_bounds = array<i64: 8, 96>}, {pipeline_mode = #tpu.pipeline_mode<synchronous>, transform_indices = @transform_19, window_bounds = array<i64: 64, 16>}, {pipeline_mode = #tpu.pipeline_mode<synchronous>, transform_indices = @transform_20, window_bounds = array<i64: 16, 64>}, {pipeline_mode = #tpu.pipeline_mode<synchronous>, transform_indices = @transform_21, window_bounds = array<i64: 8, 64>}]} {
    %c0 = arith.constant 0 : index
    %c0_0 = arith.constant 0 : index
    %0 = vector.load %arg1[%c0, %c0_0] : memref<64x96xbf16, #tpu.memory_space<vmem>>, vector<24x96xbf16>
    %c0_1 = arith.constant 0 : index
    %c0_2 = arith.constant 0 : index
    %c0_3 = arith.constant 0 : index
    %1 = vector.load %arg2[%c0_1, %c0_2, %c0_3] : memref<9x96x96xbf16, #tpu.memory_space<vmem>>, vector<1x96x96xbf16>
    %2 = vector.shape_cast %1 : vector<1x96x96xbf16> to vector<96x96xbf16>
    %cst = arith.constant dense<0.000000e+00> : vector<24x96xf32>
    %3 = tpu.matmul %0, %2, %cst {dimension_numbers = #tpu.dot_dimension_numbers<[1], [0], [0], [1], [0, 0, 1, 1], [], []>} : vector<24x96xbf16>, vector<96x96xbf16>, vector<24x96xf32> -> vector<24x96xf32>
    %c32 = arith.constant 32 : index
    %c0_4 = arith.constant 0 : index
    %4 = vector.load %arg1[%c32, %c0_4] : memref<64x96xbf16, #tpu.memory_space<vmem>>, vector<24x96xbf16>
    %c1 = arith.constant 1 : index
    %c0_5 = arith.constant 0 : index
    %c0_6 = arith.constant 0 : index
    %5 = vector.load %arg2[%c1, %c0_5, %c0_6] : memref<9x96x96xbf16, #tpu.memory_space<vmem>>, vector<1x96x96xbf16>
    %6 = vector.shape_cast %5 : vector<1x96x96xbf16> to vector<96x96xbf16>
    %cst_7 = arith.constant dense<0.000000e+00> : vector<24x96xf32>
    %7 = tpu.matmul %4, %6, %cst_7 {dimension_numbers = #tpu.dot_dimension_numbers<[1], [0], [0], [1], [0, 0, 1, 1], [], []>} : vector<24x96xbf16>, vector<96x96xbf16>, vector<24x96xf32> -> vector<24x96xf32>
    %8 = arith.addf %3, %7 : vector<24x96xf32>
    %c2 = arith.constant 2 : index
    %c0_8 = arith.constant 0 : index
    %9 = vector.load %arg1[%c2, %c0_8] : memref<64x96xbf16, #tpu.memory_space<vmem>>, vector<24x96xbf16>
    %c2_9 = arith.constant 2 : index
    %c0_10 = arith.constant 0 : index
    %c0_11 = arith.constant 0 : index
    %10 = vector.load %arg2[%c2_9, %c0_10, %c0_11] : memref<9x96x96xbf16, #tpu.memory_space<vmem>>, vector<1x96x96xbf16>
    %11 = vector.shape_cast %10 : vector<1x96x96xbf16> to vector<96x96xbf16>
    %cst_12 = arith.constant dense<0.000000e+00> : vector<24x96xf32>
    %12 = tpu.matmul %9, %11, %cst_12 {dimension_numbers = #tpu.dot_dimension_numbers<[1], [0], [0], [1], [0, 0, 1, 1], [], []>} : vector<24x96xbf16>, vector<96x96xbf16>, vector<24x96xf32> -> vector<24x96xf32>
    %13 = arith.addf %8, %12 : vector<24x96xf32>
    %c34 = arith.constant 34 : index
    %c0_13 = arith.constant 0 : index
    %14 = vector.load %arg1[%c34, %c0_13] : memref<64x96xbf16, #tpu.memory_space<vmem>>, vector<24x96xbf16>
    %c3 = arith.constant 3 : index
    %c0_14 = arith.constant 0 : index
    %c0_15 = arith.constant 0 : index
    %15 = vector.load %arg2[%c3, %c0_14, %c0_15] : memref<9x96x96xbf16, #tpu.memory_space<vmem>>, vector<1x96x96xbf16>
    %16 = vector.shape_cast %15 : vector<1x96x96xbf16> to vector<96x96xbf16>
    %cst_16 = arith.constant dense<0.000000e+00> : vector<24x96xf32>
    %17 = tpu.matmul %14, %16, %cst_16 {dimension_numbers = #tpu.dot_dimension_numbers<[1], [0], [0], [1], [0, 0, 1, 1], [], []>} : vector<24x96xbf16>, vector<96x96xbf16>, vector<24x96xf32> -> vector<24x96xf32>
    %18 = arith.addf %13, %17 : vector<24x96xf32>
    %c4 = arith.constant 4 : index
    %c0_17 = arith.constant 0 : index
    %19 = vector.load %arg1[%c4, %c0_17] : memref<64x96xbf16, #tpu.memory_space<vmem>>, vector<24x96xbf16>
    %c4_18 = arith.constant 4 : index
    %c0_19 = arith.constant 0 : index
    %c0_20 = arith.constant 0 : index
    %20 = vector.load %arg2[%c4_18, %c0_19, %c0_20] : memref<9x96x96xbf16, #tpu.memory_space<vmem>>, vector<1x96x96xbf16>
    %21 = vector.shape_cast %20 : vector<1x96x96xbf16> to vector<96x96xbf16>
    %cst_21 = arith.constant dense<0.000000e+00> : vector<24x96xf32>
    %22 = tpu.matmul %19, %21, %cst_21 {dimension_numbers = #tpu.dot_dimension_numbers<[1], [0], [0], [1], [0, 0, 1, 1], [], []>} : vector<24x96xbf16>, vector<96x96xbf16>, vector<24x96xf32> -> vector<24x96xf32>
    %23 = arith.addf %18, %22 : vector<24x96xf32>
    %c36 = arith.constant 36 : index
    %c0_22 = arith.constant 0 : index
    %24 = vector.load %arg1[%c36, %c0_22] : memref<64x96xbf16, #tpu.memory_space<vmem>>, vector<24x96xbf16>
    %c5 = arith.constant 5 : index
    %c0_23 = arith.constant 0 : index
    %c0_24 = arith.constant 0 : index
    %25 = vector.load %arg2[%c5, %c0_23, %c0_24] : memref<9x96x96xbf16, #tpu.memory_space<vmem>>, vector<1x96x96xbf16>
    %26 = vector.shape_cast %25 : vector<1x96x96xbf16> to vector<96x96xbf16>
    %cst_25 = arith.constant dense<0.000000e+00> : vector<24x96xf32>
    %27 = tpu.matmul %24, %26, %cst_25 {dimension_numbers = #tpu.dot_dimension_numbers<[1], [0], [0], [1], [0, 0, 1, 1], [], []>} : vector<24x96xbf16>, vector<96x96xbf16>, vector<24x96xf32> -> vector<24x96xf32>
    %28 = arith.addf %23, %27 : vector<24x96xf32>
    %c6 = arith.constant 6 : index
    %c0_26 = arith.constant 0 : index
    %29 = vector.load %arg1[%c6, %c0_26] : memref<64x96xbf16, #tpu.memory_space<vmem>>, vector<24x96xbf16>
    %c6_27 = arith.constant 6 : index
    %c0_28 = arith.constant 0 : index
    %c0_29 = arith.constant 0 : index
    %30 = vector.load %arg2[%c6_27, %c0_28, %c0_29] : memref<9x96x96xbf16, #tpu.memory_space<vmem>>, vector<1x96x96xbf16>
    %31 = vector.shape_cast %30 : vector<1x96x96xbf16> to vector<96x96xbf16>
    %cst_30 = arith.constant dense<0.000000e+00> : vector<24x96xf32>
    %32 = tpu.matmul %29, %31, %cst_30 {dimension_numbers = #tpu.dot_dimension_numbers<[1], [0], [0], [1], [0, 0, 1, 1], [], []>} : vector<24x96xbf16>, vector<96x96xbf16>, vector<24x96xf32> -> vector<24x96xf32>
    %33 = arith.addf %28, %32 : vector<24x96xf32>
    %c38 = arith.constant 38 : index
    %c0_31 = arith.constant 0 : index
    %34 = vector.load %arg1[%c38, %c0_31] : memref<64x96xbf16, #tpu.memory_space<vmem>>, vector<24x96xbf16>
    %c7 = arith.constant 7 : index
    %c0_32 = arith.constant 0 : index
    %c0_33 = arith.constant 0 : index
    %35 = vector.load %arg2[%c7, %c0_32, %c0_33] : memref<9x96x96xbf16, #tpu.memory_space<vmem>>, vector<1x96x96xbf16>
    %36 = vector.shape_cast %35 : vector<1x96x96xbf16> to vector<96x96xbf16>
    %cst_34 = arith.constant dense<0.000000e+00> : vector<24x96xf32>
    %37 = tpu.matmul %34, %36, %cst_34 {dimension_numbers = #tpu.dot_dimension_numbers<[1], [0], [0], [1], [0, 0, 1, 1], [], []>} : vector<24x96xbf16>, vector<96x96xbf16>, vector<24x96xf32> -> vector<24x96xf32>
    %38 = arith.addf %33, %37 : vector<24x96xf32>
    %c8 = arith.constant 8 : index
    %c0_35 = arith.constant 0 : index
    %39 = vector.load %arg1[%c8, %c0_35] : memref<64x96xbf16, #tpu.memory_space<vmem>>, vector<24x96xbf16>
    %c8_36 = arith.constant 8 : index
    %c0_37 = arith.constant 0 : index
    %c0_38 = arith.constant 0 : index
    %40 = vector.load %arg2[%c8_36, %c0_37, %c0_38] : memref<9x96x96xbf16, #tpu.memory_space<vmem>>, vector<1x96x96xbf16>
    %41 = vector.shape_cast %40 : vector<1x96x96xbf16> to vector<96x96xbf16>
    %cst_39 = arith.constant dense<0.000000e+00> : vector<24x96xf32>
    %42 = tpu.matmul %39, %41, %cst_39 {dimension_numbers = #tpu.dot_dimension_numbers<[1], [0], [0], [1], [0, 0, 1, 1], [], []>} : vector<24x96xbf16>, vector<96x96xbf16>, vector<24x96xf32> -> vector<24x96xf32>
    %43 = arith.addf %38, %42 : vector<24x96xf32>
    %c0_40 = arith.constant 0 : index
    %c0_41 = arith.constant 0 : index
    %44 = vector.load %arg3[%c0_40, %c0_41] : memref<1x96xf32, #tpu.memory_space<vmem>>, vector<1x96xf32>
    %45 = vector.broadcast %44 : vector<1x96xf32> to vector<24x96xf32>
    %46 = arith.addf %43, %45 : vector<24x96xf32>
    %cst_42 = arith.constant dense<0.000000e+00> : vector<96xf32>
    %47 = vector.multi_reduction <add>, %46, %cst_42 [0] : vector<24x96xf32> to vector<96xf32>
    %48 = vector.shape_cast %47 : vector<96xf32> to vector<1x96xf32>
    %49 = arith.mulf %46, %46 : vector<24x96xf32>
    %cst_43 = arith.constant dense<0.000000e+00> : vector<96xf32>
    %50 = vector.multi_reduction <add>, %49, %cst_43 [0] : vector<24x96xf32> to vector<96xf32>
    %51 = vector.shape_cast %50 : vector<96xf32> to vector<1x96xf32>
    %c0_44 = arith.constant 0 : index
    %c0_45 = arith.constant 0 : index
    %52 = vector.load %arg18[%c0_44, %c0_45] : memref<96x8xf32, #tpu.memory_space<vmem>>, vector<96x8xf32>
    %cst_46 = arith.constant dense<0.000000e+00> : vector<1x8xf32>
    %53 = tpu.matmul %48, %52, %cst_46 {dimension_numbers = #tpu.dot_dimension_numbers<[1], [0], [0], [1], [0, 0, 1, 1], [], []>} : vector<1x96xf32>, vector<96x8xf32>, vector<1x8xf32> -> vector<1x8xf32>
    %cst_47 = arith.constant dense<0.000000e+00> : vector<1x8xf32>
    %54 = tpu.matmul %51, %52, %cst_47 {dimension_numbers = #tpu.dot_dimension_numbers<[1], [0], [0], [1], [0, 0, 1, 1], [], []>} : vector<1x96xf32>, vector<96x8xf32>, vector<1x8xf32> -> vector<1x8xf32>
    %cst_48 = arith.constant 0.00347222225 : f32
    %55 = vector.broadcast %cst_48 : f32 to vector<1x8xf32>
    %56 = arith.mulf %53, %55 : vector<1x8xf32>
    %cst_49 = arith.constant 0.00347222225 : f32
    %57 = vector.broadcast %cst_49 : f32 to vector<1x8xf32>
    %58 = arith.mulf %54, %57 : vector<1x8xf32>
    %59 = arith.mulf %56, %56 : vector<1x8xf32>
    %60 = arith.subf %58, %59 : vector<1x8xf32>
    %c0_50 = arith.constant 0 : index
    %c0_51 = arith.constant 0 : index
    %61 = vector.load %arg14[%c0_50, %c0_51] : memref<2x8xf32, #tpu.memory_space<vmem>>, vector<1x8xf32>
    %cst_52 = arith.constant 9.99999974E-6 : f32
    %62 = vector.broadcast %cst_52 : f32 to vector<1x8xf32>
    %63 = arith.addf %60, %62 : vector<1x8xf32>
    %64 = math.rsqrt %63 : vector<1x8xf32>
    %65 = arith.mulf %61, %64 : vector<1x8xf32>
    %c1_53 = arith.constant 1 : index
    %c0_54 = arith.constant 0 : index
    %66 = vector.load %arg14[%c1_53, %c0_54] : memref<2x8xf32, #tpu.memory_space<vmem>>, vector<1x8xf32>
    %67 = arith.mulf %56, %65 : vector<1x8xf32>
    %68 = arith.subf %66, %67 : vector<1x8xf32>
    %c0_55 = arith.constant 0 : index
    %c0_56 = arith.constant 0 : index
    %69 = vector.load %arg19[%c0_55, %c0_56] : memref<8x96xf32, #tpu.memory_space<vmem>>, vector<8x96xf32>
    %cst_57 = arith.constant dense<0.000000e+00> : vector<1x96xf32>
    %70 = tpu.matmul %65, %69, %cst_57 {dimension_numbers = #tpu.dot_dimension_numbers<[1], [0], [0], [1], [0, 0, 1, 1], [], []>} : vector<1x8xf32>, vector<8x96xf32>, vector<1x96xf32> -> vector<1x96xf32>
    %cst_58 = arith.constant dense<0.000000e+00> : vector<1x96xf32>
    %71 = tpu.matmul %68, %69, %cst_58 {dimension_numbers = #tpu.dot_dimension_numbers<[1], [0], [0], [1], [0, 0, 1, 1], [], []>} : vector<1x8xf32>, vector<8x96xf32>, vector<1x96xf32> -> vector<1x96xf32>
    %72 = vector.broadcast %70 : vector<1x96xf32> to vector<24x96xf32>
    %73 = arith.mulf %46, %72 : vector<24x96xf32>
    %74 = vector.broadcast %71 : vector<1x96xf32> to vector<24x96xf32>
    %75 = arith.addf %73, %74 : vector<24x96xf32>
    %cst_59 = arith.constant 0.000000e+00 : f32
    %76 = vector.broadcast %cst_59 : f32 to vector<24x96xf32>
    %77 = arith.maximumf %75, %76 : vector<24x96xf32>
    %cst_60 = arith.constant 0.000000e+00 : bf16
    %78 = vector.broadcast %cst_60 : bf16 to vector<6x96xbf16>
    %c0_61 = arith.constant 0 : index
    %c0_62 = arith.constant 0 : index
    %79 = vector.load %arg23[%c0_61, %c0_62] : memref<36x96xbf16, #tpu.memory_space<vmem>>, vector<6x96xbf16>
    tpu.vector_store %arg23[%c0_61, %c0_62], %78 {strides = array<i32>} : memref<36x96xbf16, #tpu.memory_space<vmem>>, vector<6x96xbf16>,
    %c30 = arith.constant 30 : index
    %c0_63 = arith.constant 0 : index
    %80 = vector.load %arg23[%c30, %c0_63] : memref<36x96xbf16, #tpu.memory_space<vmem>>, vector<6x96xbf16>
    tpu.vector_store %arg23[%c30, %c0_63], %78 {strides = array<i32>} : memref<36x96xbf16, #tpu.memory_space<vmem>>, vector<6x96xbf16>,
    %81 = arith.truncf %77 : vector<24x96xf32> to vector<24x96xbf16>
    %c6_64 = arith.constant 6 : index
    %c0_65 = arith.constant 0 : index
    %82 = vector.load %arg23[%c6_64, %c0_65] : memref<36x96xbf16, #tpu.memory_space<vmem>>, vector<24x96xbf16>
    tpu.vector_store %arg23[%c6_64, %c0_65], %81 {strides = array<i32>} : memref<36x96xbf16, #tpu.memory_space<vmem>>, vector<24x96xbf16>,
    %c0_66 = arith.constant 0 : index
    %c0_67 = arith.constant 0 : index
    %83 = vector.load %arg23[%c0_66, %c0_67] : memref<36x96xbf16, #tpu.memory_space<vmem>>, vector<24x96xbf16>
    %c0_68 = arith.constant 0 : index
    %c0_69 = arith.constant 0 : index
    %c0_70 = arith.constant 0 : index
    %84 = vector.load %arg4[%c0_68, %c0_69, %c0_70] : memref<7x96x96xbf16, #tpu.memory_space<vmem>>, vector<1x96x96xbf16>
    %85 = vector.shape_cast %84 : vector<1x96x96xbf16> to vector<96x96xbf16>
    %cst_71 = arith.constant dense<0.000000e+00> : vector<24x96xf32>
    %86 = tpu.matmul %83, %85, %cst_71 {dimension_numbers = #tpu.dot_dimension_numbers<[1], [0], [0], [1], [0, 0, 1, 1], [], []>} : vector<24x96xbf16>, vector<96x96xbf16>, vector<24x96xf32> -> vector<24x96xf32>
    %c2_72 = arith.constant 2 : index
    %c0_73 = arith.constant 0 : index
    %87 = vector.load %arg23[%c2_72, %c0_73] : memref<36x96xbf16, #tpu.memory_space<vmem>>, vector<24x96xbf16>
    %c1_74 = arith.constant 1 : index
    %c0_75 = arith.constant 0 : index
    %c0_76 = arith.constant 0 : index
    %88 = vector.load %arg4[%c1_74, %c0_75, %c0_76] : memref<7x96x96xbf16, #tpu.memory_space<vmem>>, vector<1x96x96xbf16>
    %89 = vector.shape_cast %88 : vector<1x96x96xbf16> to vector<96x96xbf16>
    %cst_77 = arith.constant dense<0.000000e+00> : vector<24x96xf32>
    %90 = tpu.matmul %87, %89, %cst_77 {dimension_numbers = #tpu.dot_dimension_numbers<[1], [0], [0], [1], [0, 0, 1, 1], [], []>} : vector<24x96xbf16>, vector<96x96xbf16>, vector<24x96xf32> -> vector<24x96xf32>
    %91 = arith.addf %86, %90 : vector<24x96xf32>
    %c4_78 = arith.constant 4 : index
    %c0_79 = arith.constant 0 : index
    %92 = vector.load %arg23[%c4_78, %c0_79] : memref<36x96xbf16, #tpu.memory_space<vmem>>, vector<24x96xbf16>
    %c2_80 = arith.constant 2 : index
    %c0_81 = arith.constant 0 : index
    %c0_82 = arith.constant 0 : index
    %93 = vector.load %arg4[%c2_80, %c0_81, %c0_82] : memref<7x96x96xbf16, #tpu.memory_space<vmem>>, vector<1x96x96xbf16>
    %94 = vector.shape_cast %93 : vector<1x96x96xbf16> to vector<96x96xbf16>
    %cst_83 = arith.constant dense<0.000000e+00> : vector<24x96xf32>
    %95 = tpu.matmul %92, %94, %cst_83 {dimension_numbers = #tpu.dot_dimension_numbers<[1], [0], [0], [1], [0, 0, 1, 1], [], []>} : vector<24x96xbf16>, vector<96x96xbf16>, vector<24x96xf32> -> vector<24x96xf32>
    %96 = arith.addf %91, %95 : vector<24x96xf32>
    %c6_84 = arith.constant 6 : index
    %c0_85 = arith.constant 0 : index
    %97 = vector.load %arg23[%c6_84, %c0_85] : memref<36x96xbf16, #tpu.memory_space<vmem>>, vector<24x96xbf16>
    %c3_86 = arith.constant 3 : index
    %c0_87 = arith.constant 0 : index
    %c0_88 = arith.constant 0 : index
    %98 = vector.load %arg4[%c3_86, %c0_87, %c0_88] : memref<7x96x96xbf16, #tpu.memory_space<vmem>>, vector<1x96x96xbf16>
    %99 = vector.shape_cast %98 : vector<1x96x96xbf16> to vector<96x96xbf16>
    %cst_89 = arith.constant dense<0.000000e+00> : vector<24x96xf32>
    %100 = tpu.matmul %97, %99, %cst_89 {dimension_numbers = #tpu.dot_dimension_numbers<[1], [0], [0], [1], [0, 0, 1, 1], [], []>} : vector<24x96xbf16>, vector<96x96xbf16>, vector<24x96xf32> -> vector<24x96xf32>
    %101 = arith.addf %96, %100 : vector<24x96xf32>
    %c8_90 = arith.constant 8 : index
    %c0_91 = arith.constant 0 : index
    %102 = vector.load %arg23[%c8_90, %c0_91] : memref<36x96xbf16, #tpu.memory_space<vmem>>, vector<24x96xbf16>
    %c4_92 = arith.constant 4 : index
    %c0_93 = arith.constant 0 : index
    %c0_94 = arith.constant 0 : index
    %103 = vector.load %arg4[%c4_92, %c0_93, %c0_94] : memref<7x96x96xbf16, #tpu.memory_space<vmem>>, vector<1x96x96xbf16>
    %104 = vector.shape_cast %103 : vector<1x96x96xbf16> to vector<96x96xbf16>
    %cst_95 = arith.constant dense<0.000000e+00> : vector<24x96xf32>
    %105 = tpu.matmul %102, %104, %cst_95 {dimension_numbers = #tpu.dot_dimension_numbers<[1], [0], [0], [1], [0, 0, 1, 1], [], []>} : vector<24x96xbf16>, vector<96x96xbf16>, vector<24x96xf32> -> vector<24x96xf32>
    %106 = arith.addf %101, %105 : vector<24x96xf32>
    %c10 = arith.constant 10 : index
    %c0_96 = arith.constant 0 : index
    %107 = vector.load %arg23[%c10, %c0_96] : memref<36x96xbf16, #tpu.memory_space<vmem>>, vector<24x96xbf16>
    %c5_97 = arith.constant 5 : index
    %c0_98 = arith.constant 0 : index
    %c0_99 = arith.constant 0 : index
    %108 = vector.load %arg4[%c5_97, %c0_98, %c0_99] : memref<7x96x96xbf16, #tpu.memory_space<vmem>>, vector<1x96x96xbf16>
    %109 = vector.shape_cast %108 : vector<1x96x96xbf16> to vector<96x96xbf16>
    %cst_100 = arith.constant dense<0.000000e+00> : vector<24x96xf32>
    %110 = tpu.matmul %107, %109, %cst_100 {dimension_numbers = #tpu.dot_dimension_numbers<[1], [0], [0], [1], [0, 0, 1, 1], [], []>} : vector<24x96xbf16>, vector<96x96xbf16>, vector<24x96xf32> -> vector<24x96xf32>
    %111 = arith.addf %106, %110 : vector<24x96xf32>
    %c12 = arith.constant 12 : index
    %c0_101 = arith.constant 0 : index
    %112 = vector.load %arg23[%c12, %c0_101] : memref<36x96xbf16, #tpu.memory_space<vmem>>, vector<24x96xbf16>
    %c6_102 = arith.constant 6 : index
    %c0_103 = arith.constant 0 : index
    %c0_104 = arith.constant 0 : index
    %113 = vector.load %arg4[%c6_102, %c0_103, %c0_104] : memref<7x96x96xbf16, #tpu.memory_space<vmem>>, vector<1x96x96xbf16>
    %114 = vector.shape_cast %113 : vector<1x96x96xbf16> to vector<96x96xbf16>
    %cst_105 = arith.constant dense<0.000000e+00> : vector<24x96xf32>
    %115 = tpu.matmul %112, %114, %cst_105 {dimension_numbers = #tpu.dot_dimension_numbers<[1], [0], [0], [1], [0, 0, 1, 1], [], []>} : vector<24x96xbf16>, vector<96x96xbf16>, vector<24x96xf32> -> vector<24x96xf32>
    %116 = arith.addf %111, %115 : vector<24x96xf32>
    %c0_106 = arith.constant 0 : index
    %c0_107 = arith.constant 0 : index
    %117 = vector.load %arg5[%c0_106, %c0_107] : memref<1x96xf32, #tpu.memory_space<vmem>>, vector<1x96xf32>
    %118 = vector.broadcast %117 : vector<1x96xf32> to vector<24x96xf32>
    %119 = arith.addf %116, %118 : vector<24x96xf32>
    %cst_108 = arith.constant dense<0.000000e+00> : vector<96xf32>
    %120 = vector.multi_reduction <add>, %119, %cst_108 [0] : vector<24x96xf32> to vector<96xf32>
    %121 = vector.shape_cast %120 : vector<96xf32> to vector<1x96xf32>
    %122 = arith.mulf %119, %119 : vector<24x96xf32>
    %cst_109 = arith.constant dense<0.000000e+00> : vector<96xf32>
    %123 = vector.multi_reduction <add>, %122, %cst_109 [0] : vector<24x96xf32> to vector<96xf32>
    %124 = vector.shape_cast %123 : vector<96xf32> to vector<1x96xf32>
    %c0_110 = arith.constant 0 : index
    %c0_111 = arith.constant 0 : index
    %125 = vector.load %arg18[%c0_110, %c0_111] : memref<96x8xf32, #tpu.memory_space<vmem>>, vector<96x8xf32>
    %cst_112 = arith.constant dense<0.000000e+00> : vector<1x8xf32>
    %126 = tpu.matmul %121, %125, %cst_112 {dimension_numbers = #tpu.dot_dimension_numbers<[1], [0], [0], [1], [0, 0, 1, 1], [], []>} : vector<1x96xf32>, vector<96x8xf32>, vector<1x8xf32> -> vector<1x8xf32>
    %cst_113 = arith.constant dense<0.000000e+00> : vector<1x8xf32>
    %127 = tpu.matmul %124, %125, %cst_113 {dimension_numbers = #tpu.dot_dimension_numbers<[1], [0], [0], [1], [0, 0, 1, 1], [], []>} : vector<1x96xf32>, vector<96x8xf32>, vector<1x8xf32> -> vector<1x8xf32>
    %cst_114 = arith.constant 0.00347222225 : f32
    %128 = vector.broadcast %cst_114 : f32 to vector<1x8xf32>
    %129 = arith.mulf %126, %128 : vector<1x8xf32>
    %cst_115 = arith.constant 0.00347222225 : f32
    %130 = vector.broadcast %cst_115 : f32 to vector<1x8xf32>
    %131 = arith.mulf %127, %130 : vector<1x8xf32>
    %132 = arith.mulf %129, %129 : vector<1x8xf32>
    %133 = arith.subf %131, %132 : vector<1x8xf32>
    %c0_116 = arith.constant 0 : index
    %c0_117 = arith.constant 0 : index
    %134 = vector.load %arg15[%c0_116, %c0_117] : memref<2x8xf32, #tpu.memory_space<vmem>>, vector<1x8xf32>
    %cst_118 = arith.constant 9.99999974E-6 : f32
    %135 = vector.broadcast %cst_118 : f32 to vector<1x8xf32>
    %136 = arith.addf %133, %135 : vector<1x8xf32>
    %137 = math.rsqrt %136 : vector<1x8xf32>
    %138 = arith.mulf %134, %137 : vector<1x8xf32>
    %c1_119 = arith.constant 1 : index
    %c0_120 = arith.constant 0 : index
    %139 = vector.load %arg15[%c1_119, %c0_120] : memref<2x8xf32, #tpu.memory_space<vmem>>, vector<1x8xf32>
    %140 = arith.mulf %129, %138 : vector<1x8xf32>
    %141 = arith.subf %139, %140 : vector<1x8xf32>
    %c0_121 = arith.constant 0 : index
    %c0_122 = arith.constant 0 : index
    %142 = vector.load %arg19[%c0_121, %c0_122] : memref<8x96xf32, #tpu.memory_space<vmem>>, vector<8x96xf32>
    %cst_123 = arith.constant dense<0.000000e+00> : vector<1x96xf32>
    %143 = tpu.matmul %138, %142, %cst_123 {dimension_numbers = #tpu.dot_dimension_numbers<[1], [0], [0], [1], [0, 0, 1, 1], [], []>} : vector<1x8xf32>, vector<8x96xf32>, vector<1x96xf32> -> vector<1x96xf32>
    %cst_124 = arith.constant dense<0.000000e+00> : vector<1x96xf32>
    %144 = tpu.matmul %141, %142, %cst_124 {dimension_numbers = #tpu.dot_dimension_numbers<[1], [0], [0], [1], [0, 0, 1, 1], [], []>} : vector<1x8xf32>, vector<8x96xf32>, vector<1x96xf32> -> vector<1x96xf32>
    %145 = vector.broadcast %143 : vector<1x96xf32> to vector<24x96xf32>
    %146 = arith.mulf %119, %145 : vector<24x96xf32>
    %147 = vector.broadcast %144 : vector<1x96xf32> to vector<24x96xf32>
    %148 = arith.addf %146, %147 : vector<24x96xf32>
    %cst_125 = arith.constant 0.000000e+00 : f32
    %149 = vector.broadcast %cst_125 : f32 to vector<24x96xf32>
    %150 = arith.maximumf %148, %149 : vector<24x96xf32>
    %151 = arith.addf %150, %46 : vector<24x96xf32>
    %152 = arith.truncf %151 : vector<24x96xf32> to vector<24x96xbf16>
    %c6_126 = arith.constant 6 : index
    %c0_127 = arith.constant 0 : index
    %153 = vector.load %arg23[%c6_126, %c0_127] : memref<36x96xbf16, #tpu.memory_space<vmem>>, vector<24x96xbf16>
    tpu.vector_store %arg23[%c6_126, %c0_127], %152 {strides = array<i32>} : memref<36x96xbf16, #tpu.memory_space<vmem>>, vector<24x96xbf16>,
    %c0_128 = arith.constant 0 : index
    %c0_129 = arith.constant 0 : index
    %154 = vector.load %arg23[%c0_128, %c0_129] : memref<36x96xbf16, #tpu.memory_space<vmem>>, vector<24x96xbf16>
    %c0_130 = arith.constant 0 : index
    %c0_131 = arith.constant 0 : index
    %c0_132 = arith.constant 0 : index
    %155 = vector.load %arg6[%c0_130, %c0_131, %c0_132] : memref<7x96x96xbf16, #tpu.memory_space<vmem>>, vector<1x96x96xbf16>
    %156 = vector.shape_cast %155 : vector<1x96x96xbf16> to vector<96x96xbf16>
    %cst_133 = arith.constant dense<0.000000e+00> : vector<24x96xf32>
    %157 = tpu.matmul %154, %156, %cst_133 {dimension_numbers = #tpu.dot_dimension_numbers<[1], [0], [0], [1], [0, 0, 1, 1], [], []>} : vector<24x96xbf16>, vector<96x96xbf16>, vector<24x96xf32> -> vector<24x96xf32>
    %c2_134 = arith.constant 2 : index
    %c0_135 = arith.constant 0 : index
    %158 = vector.load %arg23[%c2_134, %c0_135] : memref<36x96xbf16, #tpu.memory_space<vmem>>, vector<24x96xbf16>
    %c1_136 = arith.constant 1 : index
    %c0_137 = arith.constant 0 : index
    %c0_138 = arith.constant 0 : index
    %159 = vector.load %arg6[%c1_136, %c0_137, %c0_138] : memref<7x96x96xbf16, #tpu.memory_space<vmem>>, vector<1x96x96xbf16>
    %160 = vector.shape_cast %159 : vector<1x96x96xbf16> to vector<96x96xbf16>
    %cst_139 = arith.constant dense<0.000000e+00> : vector<24x96xf32>
    %161 = tpu.matmul %158, %160, %cst_139 {dimension_numbers = #tpu.dot_dimension_numbers<[1], [0], [0], [1], [0, 0, 1, 1], [], []>} : vector<24x96xbf16>, vector<96x96xbf16>, vector<24x96xf32> -> vector<24x96xf32>
    %162 = arith.addf %157, %161 : vector<24x96xf32>
    %c4_140 = arith.constant 4 : index
    %c0_141 = arith.constant 0 : index
    %163 = vector.load %arg23[%c4_140, %c0_141] : memref<36x96xbf16, #tpu.memory_space<vmem>>, vector<24x96xbf16>
    %c2_142 = arith.constant 2 : index
    %c0_143 = arith.constant 0 : index
    %c0_144 = arith.constant 0 : index
    %164 = vector.load %arg6[%c2_142, %c0_143, %c0_144] : memref<7x96x96xbf16, #tpu.memory_space<vmem>>, vector<1x96x96xbf16>
    %165 = vector.shape_cast %164 : vector<1x96x96xbf16> to vector<96x96xbf16>
    %cst_145 = arith.constant dense<0.000000e+00> : vector<24x96xf32>
    %166 = tpu.matmul %163, %165, %cst_145 {dimension_numbers = #tpu.dot_dimension_numbers<[1], [0], [0], [1], [0, 0, 1, 1], [], []>} : vector<24x96xbf16>, vector<96x96xbf16>, vector<24x96xf32> -> vector<24x96xf32>
    %167 = arith.addf %162, %166 : vector<24x96xf32>
    %c6_146 = arith.constant 6 : index
    %c0_147 = arith.constant 0 : index
    %168 = vector.load %arg23[%c6_146, %c0_147] : memref<36x96xbf16, #tpu.memory_space<vmem>>, vector<24x96xbf16>
    %c3_148 = arith.constant 3 : index
    %c0_149 = arith.constant 0 : index
    %c0_150 = arith.constant 0 : index
    %169 = vector.load %arg6[%c3_148, %c0_149, %c0_150] : memref<7x96x96xbf16, #tpu.memory_space<vmem>>, vector<1x96x96xbf16>
    %170 = vector.shape_cast %169 : vector<1x96x96xbf16> to vector<96x96xbf16>
    %cst_151 = arith.constant dense<0.000000e+00> : vector<24x96xf32>
    %171 = tpu.matmul %168, %170, %cst_151 {dimension_numbers = #tpu.dot_dimension_numbers<[1], [0], [0], [1], [0, 0, 1, 1], [], []>} : vector<24x96xbf16>, vector<96x96xbf16>, vector<24x96xf32> -> vector<24x96xf32>
    %172 = arith.addf %167, %171 : vector<24x96xf32>
    %c8_152 = arith.constant 8 : index
    %c0_153 = arith.constant 0 : index
    %173 = vector.load %arg23[%c8_152, %c0_153] : memref<36x96xbf16, #tpu.memory_space<vmem>>, vector<24x96xbf16>
    %c4_154 = arith.constant 4 : index
    %c0_155 = arith.constant 0 : index
    %c0_156 = arith.constant 0 : index
    %174 = vector.load %arg6[%c4_154, %c0_155, %c0_156] : memref<7x96x96xbf16, #tpu.memory_space<vmem>>, vector<1x96x96xbf16>
    %175 = vector.shape_cast %174 : vector<1x96x96xbf16> to vector<96x96xbf16>
    %cst_157 = arith.constant dense<0.000000e+00> : vector<24x96xf32>
    %176 = tpu.matmul %173, %175, %cst_157 {dimension_numbers = #tpu.dot_dimension_numbers<[1], [0], [0], [1], [0, 0, 1, 1], [], []>} : vector<24x96xbf16>, vector<96x96xbf16>, vector<24x96xf32> -> vector<24x96xf32>
    %177 = arith.addf %172, %176 : vector<24x96xf32>
    %c10_158 = arith.constant 10 : index
    %c0_159 = arith.constant 0 : index
    %178 = vector.load %arg23[%c10_158, %c0_159] : memref<36x96xbf16, #tpu.memory_space<vmem>>, vector<24x96xbf16>
    %c5_160 = arith.constant 5 : index
    %c0_161 = arith.constant 0 : index
    %c0_162 = arith.constant 0 : index
    %179 = vector.load %arg6[%c5_160, %c0_161, %c0_162] : memref<7x96x96xbf16, #tpu.memory_space<vmem>>, vector<1x96x96xbf16>
    %180 = vector.shape_cast %179 : vector<1x96x96xbf16> to vector<96x96xbf16>
    %cst_163 = arith.constant dense<0.000000e+00> : vector<24x96xf32>
    %181 = tpu.matmul %178, %180, %cst_163 {dimension_numbers = #tpu.dot_dimension_numbers<[1], [0], [0], [1], [0, 0, 1, 1], [], []>} : vector<24x96xbf16>, vector<96x96xbf16>, vector<24x96xf32> -> vector<24x96xf32>
    %182 = arith.addf %177, %181 : vector<24x96xf32>
    %c12_164 = arith.constant 12 : index
    %c0_165 = arith.constant 0 : index
    %183 = vector.load %arg23[%c12_164, %c0_165] : memref<36x96xbf16, #tpu.memory_space<vmem>>, vector<24x96xbf16>
    %c6_166 = arith.constant 6 : index
    %c0_167 = arith.constant 0 : index
    %c0_168 = arith.constant 0 : index
    %184 = vector.load %arg6[%c6_166, %c0_167, %c0_168] : memref<7x96x96xbf16, #tpu.memory_space<vmem>>, vector<1x96x96xbf16>
    %185 = vector.shape_cast %184 : vector<1x96x96xbf16> to vector<96x96xbf16>
    %cst_169 = arith.constant dense<0.000000e+00> : vector<24x96xf32>
    %186 = tpu.matmul %183, %185, %cst_169 {dimension_numbers = #tpu.dot_dimension_numbers<[1], [0], [0], [1], [0, 0, 1, 1], [], []>} : vector<24x96xbf16>, vector<96x96xbf16>, vector<24x96xf32> -> vector<24x96xf32>
    %187 = arith.addf %182, %186 : vector<24x96xf32>
    %c0_170 = arith.constant 0 : index
    %c0_171 = arith.constant 0 : index
    %188 = vector.load %arg7[%c0_170, %c0_171] : memref<1x96xf32, #tpu.memory_space<vmem>>, vector<1x96xf32>
    %189 = vector.broadcast %188 : vector<1x96xf32> to vector<24x96xf32>
    %190 = arith.addf %187, %189 : vector<24x96xf32>
    %191 = arith.truncf %190 : vector<24x96xf32> to vector<24x96xbf16>
    %192 = vector.extract_strided_slice %191 {offsets = [0, 0], sizes = [2, 96], strides = [1, 1]} : vector<24x96xbf16> to vector<2x96xbf16>
    %c0_172 = arith.constant 0 : index
    %c0_173 = arith.constant 0 : index
    %193 = vector.load %arg25[%c0_172, %c0_173] : memref<24x96xbf16, #tpu.memory_space<vmem>>, vector<2x96xbf16>
    tpu.vector_store %arg25[%c0_172, %c0_173], %192 {strides = array<i32>} : memref<24x96xbf16, #tpu.memory_space<vmem>>, vector<2x96xbf16>,
    %194 = vector.extract_strided_slice %191 {offsets = [2, 0], sizes = [2, 96], strides = [1, 1]} : vector<24x96xbf16> to vector<2x96xbf16>
    %c12_174 = arith.constant 12 : index
    %c0_175 = arith.constant 0 : index
    %195 = vector.load %arg25[%c12_174, %c0_175] : memref<24x96xbf16, #tpu.memory_space<vmem>>, vector<2x96xbf16>
    tpu.vector_store %arg25[%c12_174, %c0_175], %194 {strides = array<i32>} : memref<24x96xbf16, #tpu.memory_space<vmem>>, vector<2x96xbf16>,
    %196 = vector.extract_strided_slice %191 {offsets = [4, 0], sizes = [2, 96], strides = [1, 1]} : vector<24x96xbf16> to vector<2x96xbf16>
    %c2_176 = arith.constant 2 : index
    %c0_177 = arith.constant 0 : index
    %197 = vector.load %arg25[%c2_176, %c0_177] : memref<24x96xbf16, #tpu.memory_space<vmem>>, vector<2x96xbf16>
    tpu.vector_store %arg25[%c2_176, %c0_177], %196 {strides = array<i32>} : memref<24x96xbf16, #tpu.memory_space<vmem>>, vector<2x96xbf16>,
    %198 = vector.extract_strided_slice %191 {offsets = [6, 0], sizes = [2, 96], strides = [1, 1]} : vector<24x96xbf16> to vector<2x96xbf16>
    %c14 = arith.constant 14 : index
    %c0_178 = arith.constant 0 : index
    %199 = vector.load %arg25[%c14, %c0_178] : memref<24x96xbf16, #tpu.memory_space<vmem>>, vector<2x96xbf16>
    tpu.vector_store %arg25[%c14, %c0_178], %198 {strides = array<i32>} : memref<24x96xbf16, #tpu.memory_space<vmem>>, vector<2x96xbf16>,
    %200 = vector.extract_strided_slice %191 {offsets = [8, 0], sizes = [2, 96], strides = [1, 1]} : vector<24x96xbf16> to vector<2x96xbf16>
    %c4_179 = arith.constant 4 : index
    %c0_180 = arith.constant 0 : index
    %201 = vector.load %arg25[%c4_179, %c0_180] : memref<24x96xbf16, #tpu.memory_space<vmem>>, vector<2x96xbf16>
    tpu.vector_store %arg25[%c4_179, %c0_180], %200 {strides = array<i32>} : memref<24x96xbf16, #tpu.memory_space<vmem>>, vector<2x96xbf16>,
    %202 = vector.extract_strided_slice %191 {offsets = [10, 0], sizes = [2, 96], strides = [1, 1]} : vector<24x96xbf16> to vector<2x96xbf16>
    %c16 = arith.constant 16 : index
    %c0_181 = arith.constant 0 : index
    %203 = vector.load %arg25[%c16, %c0_181] : memref<24x96xbf16, #tpu.memory_space<vmem>>, vector<2x96xbf16>
    tpu.vector_store %arg25[%c16, %c0_181], %202 {strides = array<i32>} : memref<24x96xbf16, #tpu.memory_space<vmem>>, vector<2x96xbf16>,
    %204 = vector.extract_strided_slice %191 {offsets = [12, 0], sizes = [2, 96], strides = [1, 1]} : vector<24x96xbf16> to vector<2x96xbf16>
    %c6_182 = arith.constant 6 : index
    %c0_183 = arith.constant 0 : index
    %205 = vector.load %arg25[%c6_182, %c0_183] : memref<24x96xbf16, #tpu.memory_space<vmem>>, vector<2x96xbf16>
    tpu.vector_store %arg25[%c6_182, %c0_183], %204 {strides = array<i32>} : memref<24x96xbf16, #tpu.memory_space<vmem>>, vector<2x96xbf16>,
    %206 = vector.extract_strided_slice %191 {offsets = [14, 0], sizes = [2, 96], strides = [1, 1]} : vector<24x96xbf16> to vector<2x96xbf16>
    %c18 = arith.constant 18 : index
    %c0_184 = arith.constant 0 : index
    %207 = vector.load %arg25[%c18, %c0_184] : memref<24x96xbf16, #tpu.memory_space<vmem>>, vector<2x96xbf16>
    tpu.vector_store %arg25[%c18, %c0_184], %206 {strides = array<i32>} : memref<24x96xbf16, #tpu.memory_space<vmem>>, vector<2x96xbf16>,
    %208 = vector.extract_strided_slice %191 {offsets = [16, 0], sizes = [2, 96], strides = [1, 1]} : vector<24x96xbf16> to vector<2x96xbf16>
    %c8_185 = arith.constant 8 : index
    %c0_186 = arith.constant 0 : index
    %209 = vector.load %arg25[%c8_185, %c0_186] : memref<24x96xbf16, #tpu.memory_space<vmem>>, vector<2x96xbf16>
    tpu.vector_store %arg25[%c8_185, %c0_186], %208 {strides = array<i32>} : memref<24x96xbf16, #tpu.memory_space<vmem>>, vector<2x96xbf16>,
    %210 = vector.extract_strided_slice %191 {offsets = [18, 0], sizes = [2, 96], strides = [1, 1]} : vector<24x96xbf16> to vector<2x96xbf16>
    %c20 = arith.constant 20 : index
    %c0_187 = arith.constant 0 : index
    %211 = vector.load %arg25[%c20, %c0_187] : memref<24x96xbf16, #tpu.memory_space<vmem>>, vector<2x96xbf16>
    tpu.vector_store %arg25[%c20, %c0_187], %210 {strides = array<i32>} : memref<24x96xbf16, #tpu.memory_space<vmem>>, vector<2x96xbf16>,
    %212 = vector.extract_strided_slice %191 {offsets = [20, 0], sizes = [2, 96], strides = [1, 1]} : vector<24x96xbf16> to vector<2x96xbf16>
    %c10_188 = arith.constant 10 : index
    %c0_189 = arith.constant 0 : index
    %213 = vector.load %arg25[%c10_188, %c0_189] : memref<24x96xbf16, #tpu.memory_space<vmem>>, vector<2x96xbf16>
    tpu.vector_store %arg25[%c10_188, %c0_189], %212 {strides = array<i32>} : memref<24x96xbf16, #tpu.memory_space<vmem>>, vector<2x96xbf16>,
    %214 = vector.extract_strided_slice %191 {offsets = [22, 0], sizes = [2, 96], strides = [1, 1]} : vector<24x96xbf16> to vector<2x96xbf16>
    %c22 = arith.constant 22 : index
    %c0_190 = arith.constant 0 : index
    %215 = vector.load %arg25[%c22, %c0_190] : memref<24x96xbf16, #tpu.memory_space<vmem>>, vector<2x96xbf16>
    tpu.vector_store %arg25[%c22, %c0_190], %214 {strides = array<i32>} : memref<24x96xbf16, #tpu.memory_space<vmem>>, vector<2x96xbf16>,
    %c0_191 = arith.constant 0 : index
    %c0_192 = arith.constant 0 : index
    %216 = vector.load %arg25[%c0_191, %c0_192] : memref<24x96xbf16, #tpu.memory_space<vmem>>, vector<8x96xbf16>
    %c0_193 = arith.constant 0 : index
    %c0_194 = arith.constant 0 : index
    %c0_195 = arith.constant 0 : index
    %217 = vector.load %arg8[%c0_193, %c0_194, %c0_195] : memref<5x96x64xbf16, #tpu.memory_space<vmem>>, vector<1x96x64xbf16>
    %218 = vector.shape_cast %217 : vector<1x96x64xbf16> to vector<96x64xbf16>
    %cst_196 = arith.constant dense<0.000000e+00> : vector<8x64xf32>
    %219 = tpu.matmul %216, %218, %cst_196 {dimension_numbers = #tpu.dot_dimension_numbers<[1], [0], [0], [1], [0, 0, 1, 1], [], []>} : vector<8x96xbf16>, vector<96x64xbf16>, vector<8x64xf32> -> vector<8x64xf32>
    %c12_197 = arith.constant 12 : index
    %c0_198 = arith.constant 0 : index
    %220 = vector.load %arg25[%c12_197, %c0_198] : memref<24x96xbf16, #tpu.memory_space<vmem>>, vector<8x96xbf16>
    %c1_199 = arith.constant 1 : index
    %c0_200 = arith.constant 0 : index
    %c0_201 = arith.constant 0 : index
    %221 = vector.load %arg8[%c1_199, %c0_200, %c0_201] : memref<5x96x64xbf16, #tpu.memory_space<vmem>>, vector<1x96x64xbf16>
    %222 = vector.shape_cast %221 : vector<1x96x64xbf16> to vector<96x64xbf16>
    %cst_202 = arith.constant dense<0.000000e+00> : vector<8x64xf32>
    %223 = tpu.matmul %220, %222, %cst_202 {dimension_numbers = #tpu.dot_dimension_numbers<[1], [0], [0], [1], [0, 0, 1, 1], [], []>} : vector<8x96xbf16>, vector<96x64xbf16>, vector<8x64xf32> -> vector<8x64xf32>
    %224 = arith.addf %219, %223 : vector<8x64xf32>
    %c2_203 = arith.constant 2 : index
    %c0_204 = arith.constant 0 : index
    %225 = vector.load %arg25[%c2_203, %c0_204] : memref<24x96xbf16, #tpu.memory_space<vmem>>, vector<8x96xbf16>
    %c2_205 = arith.constant 2 : index
    %c0_206 = arith.constant 0 : index
    %c0_207 = arith.constant 0 : index
    %226 = vector.load %arg8[%c2_205, %c0_206, %c0_207] : memref<5x96x64xbf16, #tpu.memory_space<vmem>>, vector<1x96x64xbf16>
    %227 = vector.shape_cast %226 : vector<1x96x64xbf16> to vector<96x64xbf16>
    %cst_208 = arith.constant dense<0.000000e+00> : vector<8x64xf32>
    %228 = tpu.matmul %225, %227, %cst_208 {dimension_numbers = #tpu.dot_dimension_numbers<[1], [0], [0], [1], [0, 0, 1, 1], [], []>} : vector<8x96xbf16>, vector<96x64xbf16>, vector<8x64xf32> -> vector<8x64xf32>
    %229 = arith.addf %224, %228 : vector<8x64xf32>
    %c14_209 = arith.constant 14 : index
    %c0_210 = arith.constant 0 : index
    %230 = vector.load %arg25[%c14_209, %c0_210] : memref<24x96xbf16, #tpu.memory_space<vmem>>, vector<8x96xbf16>
    %c3_211 = arith.constant 3 : index
    %c0_212 = arith.constant 0 : index
    %c0_213 = arith.constant 0 : index
    %231 = vector.load %arg8[%c3_211, %c0_212, %c0_213] : memref<5x96x64xbf16, #tpu.memory_space<vmem>>, vector<1x96x64xbf16>
    %232 = vector.shape_cast %231 : vector<1x96x64xbf16> to vector<96x64xbf16>
    %cst_214 = arith.constant dense<0.000000e+00> : vector<8x64xf32>
    %233 = tpu.matmul %230, %232, %cst_214 {dimension_numbers = #tpu.dot_dimension_numbers<[1], [0], [0], [1], [0, 0, 1, 1], [], []>} : vector<8x96xbf16>, vector<96x64xbf16>, vector<8x64xf32> -> vector<8x64xf32>
    %234 = arith.addf %229, %233 : vector<8x64xf32>
    %c4_215 = arith.constant 4 : index
    %c0_216 = arith.constant 0 : index
    %235 = vector.load %arg25[%c4_215, %c0_216] : memref<24x96xbf16, #tpu.memory_space<vmem>>, vector<8x96xbf16>
    %c4_217 = arith.constant 4 : index
    %c0_218 = arith.constant 0 : index
    %c0_219 = arith.constant 0 : index
    %236 = vector.load %arg8[%c4_217, %c0_218, %c0_219] : memref<5x96x64xbf16, #tpu.memory_space<vmem>>, vector<1x96x64xbf16>
    %237 = vector.shape_cast %236 : vector<1x96x64xbf16> to vector<96x64xbf16>
    %cst_220 = arith.constant dense<0.000000e+00> : vector<8x64xf32>
    %238 = tpu.matmul %235, %237, %cst_220 {dimension_numbers = #tpu.dot_dimension_numbers<[1], [0], [0], [1], [0, 0, 1, 1], [], []>} : vector<8x96xbf16>, vector<96x64xbf16>, vector<8x64xf32> -> vector<8x64xf32>
    %239 = arith.addf %234, %238 : vector<8x64xf32>
    %c0_221 = arith.constant 0 : index
    %c0_222 = arith.constant 0 : index
    %240 = vector.load %arg9[%c0_221, %c0_222] : memref<1x64xf32, #tpu.memory_space<vmem>>, vector<1x64xf32>
    %241 = vector.broadcast %240 : vector<1x64xf32> to vector<8x64xf32>
    %242 = arith.addf %239, %241 : vector<8x64xf32>
    %cst_223 = arith.constant dense<0.000000e+00> : vector<64xf32>
    %243 = vector.multi_reduction <add>, %242, %cst_223 [0] : vector<8x64xf32> to vector<64xf32>
    %244 = vector.shape_cast %243 : vector<64xf32> to vector<1x64xf32>
    %245 = arith.mulf %242, %242 : vector<8x64xf32>
    %cst_224 = arith.constant dense<0.000000e+00> : vector<64xf32>
    %246 = vector.multi_reduction <add>, %245, %cst_224 [0] : vector<8x64xf32> to vector<64xf32>
    %247 = vector.shape_cast %246 : vector<64xf32> to vector<1x64xf32>
    %c0_225 = arith.constant 0 : index
    %c0_226 = arith.constant 0 : index
    %248 = vector.load %arg20[%c0_225, %c0_226] : memref<64x16xf32, #tpu.memory_space<vmem>>, vector<64x16xf32>
    %cst_227 = arith.constant dense<0.000000e+00> : vector<1x16xf32>
    %249 = tpu.matmul %244, %248, %cst_227 {dimension_numbers = #tpu.dot_dimension_numbers<[1], [0], [0], [1], [0, 0, 1, 1], [], []>} : vector<1x64xf32>, vector<64x16xf32>, vector<1x16xf32> -> vector<1x16xf32>
    %cst_228 = arith.constant dense<0.000000e+00> : vector<1x16xf32>
    %250 = tpu.matmul %247, %248, %cst_228 {dimension_numbers = #tpu.dot_dimension_numbers<[1], [0], [0], [1], [0, 0, 1, 1], [], []>} : vector<1x64xf32>, vector<64x16xf32>, vector<1x16xf32> -> vector<1x16xf32>
    %cst_229 = arith.constant 3.125000e-02 : f32
    %251 = vector.broadcast %cst_229 : f32 to vector<1x16xf32>
    %252 = arith.mulf %249, %251 : vector<1x16xf32>
    %cst_230 = arith.constant 3.125000e-02 : f32
    %253 = vector.broadcast %cst_230 : f32 to vector<1x16xf32>
    %254 = arith.mulf %250, %253 : vector<1x16xf32>
    %255 = arith.mulf %252, %252 : vector<1x16xf32>
    %256 = arith.subf %254, %255 : vector<1x16xf32>
    %c0_231 = arith.constant 0 : index
    %c0_232 = arith.constant 0 : index
    %257 = vector.load %arg16[%c0_231, %c0_232] : memref<2x16xf32, #tpu.memory_space<vmem>>, vector<1x16xf32>
    %cst_233 = arith.constant 9.99999974E-6 : f32
    %258 = vector.broadcast %cst_233 : f32 to vector<1x16xf32>
    %259 = arith.addf %256, %258 : vector<1x16xf32>
    %260 = math.rsqrt %259 : vector<1x16xf32>
    %261 = arith.mulf %257, %260 : vector<1x16xf32>
    %c1_234 = arith.constant 1 : index
    %c0_235 = arith.constant 0 : index
    %262 = vector.load %arg16[%c1_234, %c0_235] : memref<2x16xf32, #tpu.memory_space<vmem>>, vector<1x16xf32>
    %263 = arith.mulf %252, %261 : vector<1x16xf32>
    %264 = arith.subf %262, %263 : vector<1x16xf32>
    %c0_236 = arith.constant 0 : index
    %c0_237 = arith.constant 0 : index
    %265 = vector.load %arg21[%c0_236, %c0_237] : memref<16x64xf32, #tpu.memory_space<vmem>>, vector<16x64xf32>
    %cst_238 = arith.constant dense<0.000000e+00> : vector<1x64xf32>
    %266 = tpu.matmul %261, %265, %cst_238 {dimension_numbers = #tpu.dot_dimension_numbers<[1], [0], [0], [1], [0, 0, 1, 1], [], []>} : vector<1x16xf32>, vector<16x64xf32>, vector<1x64xf32> -> vector<1x64xf32>
    %cst_239 = arith.constant dense<0.000000e+00> : vector<1x64xf32>
    %267 = tpu.matmul %264, %265, %cst_239 {dimension_numbers = #tpu.dot_dimension_numbers<[1], [0], [0], [1], [0, 0, 1, 1], [], []>} : vector<1x16xf32>, vector<16x64xf32>, vector<1x64xf32> -> vector<1x64xf32>
    %268 = vector.broadcast %266 : vector<1x64xf32> to vector<8x64xf32>
    %269 = arith.mulf %242, %268 : vector<8x64xf32>
    %270 = vector.broadcast %267 : vector<1x64xf32> to vector<8x64xf32>
    %271 = arith.addf %269, %270 : vector<8x64xf32>
    %cst_240 = arith.constant 0.000000e+00 : f32
    %272 = vector.broadcast %cst_240 : f32 to vector<8x64xf32>
    %273 = arith.maximumf %271, %272 : vector<8x64xf32>
    %cst_241 = arith.constant 0.000000e+00 : bf16
    %274 = vector.broadcast %cst_241 : bf16 to vector<2x64xbf16>
    %c0_242 = arith.constant 0 : index
    %c0_243 = arith.constant 0 : index
    %275 = vector.load %arg24[%c0_242, %c0_243] : memref<12x64xbf16, #tpu.memory_space<vmem>>, vector<2x64xbf16>
    tpu.vector_store %arg24[%c0_242, %c0_243], %274 {strides = array<i32>} : memref<12x64xbf16, #tpu.memory_space<vmem>>, vector<2x64xbf16>,
    %c10_244 = arith.constant 10 : index
    %c0_245 = arith.constant 0 : index
    %276 = vector.load %arg24[%c10_244, %c0_245] : memref<12x64xbf16, #tpu.memory_space<vmem>>, vector<2x64xbf16>
    tpu.vector_store %arg24[%c10_244, %c0_245], %274 {strides = array<i32>} : memref<12x64xbf16, #tpu.memory_space<vmem>>, vector<2x64xbf16>,
    %277 = arith.truncf %273 : vector<8x64xf32> to vector<8x64xbf16>
    %c2_246 = arith.constant 2 : index
    %c0_247 = arith.constant 0 : index
    %278 = vector.load %arg24[%c2_246, %c0_247] : memref<12x64xbf16, #tpu.memory_space<vmem>>, vector<8x64xbf16>
    tpu.vector_store %arg24[%c2_246, %c0_247], %277 {strides = array<i32>} : memref<12x64xbf16, #tpu.memory_space<vmem>>, vector<8x64xbf16>,
    %c0_248 = arith.constant 0 : index
    %c0_249 = arith.constant 0 : index
    %279 = vector.load %arg24[%c0_248, %c0_249] : memref<12x64xbf16, #tpu.memory_space<vmem>>, vector<8x64xbf16>
    %c0_250 = arith.constant 0 : index
    %c0_251 = arith.constant 0 : index
    %c0_252 = arith.constant 0 : index
    %280 = vector.load %arg10[%c0_250, %c0_251, %c0_252] : memref<3x64x64xbf16, #tpu.memory_space<vmem>>, vector<1x64x64xbf16>
    %281 = vector.shape_cast %280 : vector<1x64x64xbf16> to vector<64x64xbf16>
    %cst_253 = arith.constant dense<0.000000e+00> : vector<8x64xf32>
    %282 = tpu.matmul %279, %281, %cst_253 {dimension_numbers = #tpu.dot_dimension_numbers<[1], [0], [0], [1], [0, 0, 1, 1], [], []>} : vector<8x64xbf16>, vector<64x64xbf16>, vector<8x64xf32> -> vector<8x64xf32>
    %c2_254 = arith.constant 2 : index
    %c0_255 = arith.constant 0 : index
    %283 = vector.load %arg24[%c2_254, %c0_255] : memref<12x64xbf16, #tpu.memory_space<vmem>>, vector<8x64xbf16>
    %c1_256 = arith.constant 1 : index
    %c0_257 = arith.constant 0 : index
    %c0_258 = arith.constant 0 : index
    %284 = vector.load %arg10[%c1_256, %c0_257, %c0_258] : memref<3x64x64xbf16, #tpu.memory_space<vmem>>, vector<1x64x64xbf16>
    %285 = vector.shape_cast %284 : vector<1x64x64xbf16> to vector<64x64xbf16>
    %cst_259 = arith.constant dense<0.000000e+00> : vector<8x64xf32>
    %286 = tpu.matmul %283, %285, %cst_259 {dimension_numbers = #tpu.dot_dimension_numbers<[1], [0], [0], [1], [0, 0, 1, 1], [], []>} : vector<8x64xbf16>, vector<64x64xbf16>, vector<8x64xf32> -> vector<8x64xf32>
    %287 = arith.addf %282, %286 : vector<8x64xf32>
    %c4_260 = arith.constant 4 : index
    %c0_261 = arith.constant 0 : index
    %288 = vector.load %arg24[%c4_260, %c0_261] : memref<12x64xbf16, #tpu.memory_space<vmem>>, vector<8x64xbf16>
    %c2_262 = arith.constant 2 : index
    %c0_263 = arith.constant 0 : index
    %c0_264 = arith.constant 0 : index
    %289 = vector.load %arg10[%c2_262, %c0_263, %c0_264] : memref<3x64x64xbf16, #tpu.memory_space<vmem>>, vector<1x64x64xbf16>
    %290 = vector.shape_cast %289 : vector<1x64x64xbf16> to vector<64x64xbf16>
    %cst_265 = arith.constant dense<0.000000e+00> : vector<8x64xf32>
    %291 = tpu.matmul %288, %290, %cst_265 {dimension_numbers = #tpu.dot_dimension_numbers<[1], [0], [0], [1], [0, 0, 1, 1], [], []>} : vector<8x64xbf16>, vector<64x64xbf16>, vector<8x64xf32> -> vector<8x64xf32>
    %292 = arith.addf %287, %291 : vector<8x64xf32>
    %c0_266 = arith.constant 0 : index
    %c0_267 = arith.constant 0 : index
    %293 = vector.load %arg11[%c0_266, %c0_267] : memref<1x64xf32, #tpu.memory_space<vmem>>, vector<1x64xf32>
    %294 = vector.broadcast %293 : vector<1x64xf32> to vector<8x64xf32>
    %295 = arith.addf %292, %294 : vector<8x64xf32>
    %cst_268 = arith.constant dense<0.000000e+00> : vector<64xf32>
    %296 = vector.multi_reduction <add>, %295, %cst_268 [0] : vector<8x64xf32> to vector<64xf32>
    %297 = vector.shape_cast %296 : vector<64xf32> to vector<1x64xf32>
    %298 = arith.mulf %295, %295 : vector<8x64xf32>
    %cst_269 = arith.constant dense<0.000000e+00> : vector<64xf32>
    %299 = vector.multi_reduction <add>, %298, %cst_269 [0] : vector<8x64xf32> to vector<64xf32>
    %300 = vector.shape_cast %299 : vector<64xf32> to vector<1x64xf32>
    %c0_270 = arith.constant 0 : index
    %c0_271 = arith.constant 0 : index
    %301 = vector.load %arg20[%c0_270, %c0_271] : memref<64x16xf32, #tpu.memory_space<vmem>>, vector<64x16xf32>
    %cst_272 = arith.constant dense<0.000000e+00> : vector<1x16xf32>
    %302 = tpu.matmul %297, %301, %cst_272 {dimension_numbers = #tpu.dot_dimension_numbers<[1], [0], [0], [1], [0, 0, 1, 1], [], []>} : vector<1x64xf32>, vector<64x16xf32>, vector<1x16xf32> -> vector<1x16xf32>
    %cst_273 = arith.constant dense<0.000000e+00> : vector<1x16xf32>
    %303 = tpu.matmul %300, %301, %cst_273 {dimension_numbers = #tpu.dot_dimension_numbers<[1], [0], [0], [1], [0, 0, 1, 1], [], []>} : vector<1x64xf32>, vector<64x16xf32>, vector<1x16xf32> -> vector<1x16xf32>
    %cst_274 = arith.constant 3.125000e-02 : f32
    %304 = vector.broadcast %cst_274 : f32 to vector<1x16xf32>
    %305 = arith.mulf %302, %304 : vector<1x16xf32>
    %cst_275 = arith.constant 3.125000e-02 : f32
    %306 = vector.broadcast %cst_275 : f32 to vector<1x16xf32>
    %307 = arith.mulf %303, %306 : vector<1x16xf32>
    %308 = arith.mulf %305, %305 : vector<1x16xf32>
    %309 = arith.subf %307, %308 : vector<1x16xf32>
    %c0_276 = arith.constant 0 : index
    %c0_277 = arith.constant 0 : index
    %310 = vector.load %arg17[%c0_276, %c0_277] : memref<2x16xf32, #tpu.memory_space<vmem>>, vector<1x16xf32>
    %cst_278 = arith.constant 9.99999974E-6 : f32
    %311 = vector.broadcast %cst_278 : f32 to vector<1x16xf32>
    %312 = arith.addf %309, %311 : vector<1x16xf32>
    %313 = math.rsqrt %312 : vector<1x16xf32>
    %314 = arith.mulf %310, %313 : vector<1x16xf32>
    %c1_279 = arith.constant 1 : index
    %c0_280 = arith.constant 0 : index
    %315 = vector.load %arg17[%c1_279, %c0_280] : memref<2x16xf32, #tpu.memory_space<vmem>>, vector<1x16xf32>
    %316 = arith.mulf %305, %314 : vector<1x16xf32>
    %317 = arith.subf %315, %316 : vector<1x16xf32>
    %c0_281 = arith.constant 0 : index
    %c0_282 = arith.constant 0 : index
    %318 = vector.load %arg21[%c0_281, %c0_282] : memref<16x64xf32, #tpu.memory_space<vmem>>, vector<16x64xf32>
    %cst_283 = arith.constant dense<0.000000e+00> : vector<1x64xf32>
    %319 = tpu.matmul %314, %318, %cst_283 {dimension_numbers = #tpu.dot_dimension_numbers<[1], [0], [0], [1], [0, 0, 1, 1], [], []>} : vector<1x16xf32>, vector<16x64xf32>, vector<1x64xf32> -> vector<1x64xf32>
    %cst_284 = arith.constant dense<0.000000e+00> : vector<1x64xf32>
    %320 = tpu.matmul %317, %318, %cst_284 {dimension_numbers = #tpu.dot_dimension_numbers<[1], [0], [0], [1], [0, 0, 1, 1], [], []>} : vector<1x16xf32>, vector<16x64xf32>, vector<1x64xf32> -> vector<1x64xf32>
    %321 = vector.broadcast %319 : vector<1x64xf32> to vector<8x64xf32>
    %322 = arith.mulf %295, %321 : vector<8x64xf32>
    %323 = vector.broadcast %320 : vector<1x64xf32> to vector<8x64xf32>
    %324 = arith.addf %322, %323 : vector<8x64xf32>
    %cst_285 = arith.constant 0.000000e+00 : f32
    %325 = vector.broadcast %cst_285 : f32 to vector<8x64xf32>
    %326 = arith.maximumf %324, %325 : vector<8x64xf32>
    %327 = arith.truncf %326 : vector<8x64xf32> to vector<8x64xbf16>
    %c2_286 = arith.constant 2 : index
    %c0_287 = arith.constant 0 : index
    %328 = vector.load %arg24[%c2_286, %c0_287] : memref<12x64xbf16, #tpu.memory_space<vmem>>, vector<8x64xbf16>
    tpu.vector_store %arg24[%c2_286, %c0_287], %327 {strides = array<i32>} : memref<12x64xbf16, #tpu.memory_space<vmem>>, vector<8x64xbf16>,
    %c0_288 = arith.constant 0 : index
    %c0_289 = arith.constant 0 : index
    %329 = vector.load %arg24[%c0_288, %c0_289] : memref<12x64xbf16, #tpu.memory_space<vmem>>, vector<8x64xbf16>
    %c0_290 = arith.constant 0 : index
    %c0_291 = arith.constant 0 : index
    %c0_292 = arith.constant 0 : index
    %330 = vector.load %arg12[%c0_290, %c0_291, %c0_292] : memref<3x64x64xbf16, #tpu.memory_space<vmem>>, vector<1x64x64xbf16>
    %331 = vector.shape_cast %330 : vector<1x64x64xbf16> to vector<64x64xbf16>
    %cst_293 = arith.constant dense<0.000000e+00> : vector<8x64xf32>
    %332 = tpu.matmul %329, %331, %cst_293 {dimension_numbers = #tpu.dot_dimension_numbers<[1], [0], [0], [1], [0, 0, 1, 1], [], []>} : vector<8x64xbf16>, vector<64x64xbf16>, vector<8x64xf32> -> vector<8x64xf32>
    %c2_294 = arith.constant 2 : index
    %c0_295 = arith.constant 0 : index
    %333 = vector.load %arg24[%c2_294, %c0_295] : memref<12x64xbf16, #tpu.memory_space<vmem>>, vector<8x64xbf16>
    %c1_296 = arith.constant 1 : index
    %c0_297 = arith.constant 0 : index
    %c0_298 = arith.constant 0 : index
    %334 = vector.load %arg12[%c1_296, %c0_297, %c0_298] : memref<3x64x64xbf16, #tpu.memory_space<vmem>>, vector<1x64x64xbf16>
    %335 = vector.shape_cast %334 : vector<1x64x64xbf16> to vector<64x64xbf16>
    %cst_299 = arith.constant dense<0.000000e+00> : vector<8x64xf32>
    %336 = tpu.matmul %333, %335, %cst_299 {dimension_numbers = #tpu.dot_dimension_numbers<[1], [0], [0], [1], [0, 0, 1, 1], [], []>} : vector<8x64xbf16>, vector<64x64xbf16>, vector<8x64xf32> -> vector<8x64xf32>
    %337 = arith.addf %332, %336 : vector<8x64xf32>
    %c4_300 = arith.constant 4 : index
    %c0_301 = arith.constant 0 : index
    %338 = vector.load %arg24[%c4_300, %c0_301] : memref<12x64xbf16, #tpu.memory_space<vmem>>, vector<8x64xbf16>
    %c2_302 = arith.constant 2 : index
    %c0_303 = arith.constant 0 : index
    %c0_304 = arith.constant 0 : index
    %339 = vector.load %arg12[%c2_302, %c0_303, %c0_304] : memref<3x64x64xbf16, #tpu.memory_space<vmem>>, vector<1x64x64xbf16>
    %340 = vector.shape_cast %339 : vector<1x64x64xbf16> to vector<64x64xbf16>
    %cst_305 = arith.constant dense<0.000000e+00> : vector<8x64xf32>
    %341 = tpu.matmul %338, %340, %cst_305 {dimension_numbers = #tpu.dot_dimension_numbers<[1], [0], [0], [1], [0, 0, 1, 1], [], []>} : vector<8x64xbf16>, vector<64x64xbf16>, vector<8x64xf32> -> vector<8x64xf32>
    %342 = arith.addf %337, %341 : vector<8x64xf32>
    %c0_306 = arith.constant 0 : index
    %c0_307 = arith.constant 0 : index
    %343 = vector.load %arg13[%c0_306, %c0_307] : memref<1x64xf32, #tpu.memory_space<vmem>>, vector<1x64xf32>
    %344 = vector.broadcast %343 : vector<1x64xf32> to vector<8x64xf32>
    %345 = arith.addf %342, %344 : vector<8x64xf32>
    %346 = arith.addf %345, %242 : vector<8x64xf32>
    %c0_308 = arith.constant 0 : index
    %c0_309 = arith.constant 0 : index
    %347 = vector.load %arg22[%c0_308, %c0_309] : memref<8x64xf32, #tpu.memory_space<vmem>>, vector<8x64xf32>
    tpu.vector_store %arg22[%c0_308, %c0_309], %346 {strides = array<i32>} : memref<8x64xf32, #tpu.memory_space<vmem>>, vector<8x64xf32>,
    return
  }
  func.func @transform_0(%arg0: i32) -> (i32, i32) {
    %c0_i32 = arith.constant 0 : i32
    %c0_i32_0 = arith.constant 0 : i32
    %c0_i32_1 = arith.constant 0 : i32
    return %c0_i32, %c0_i32_0 : i32, i32
  }
  func.func @transform_1(%arg0: i32) -> (i32, i32, i32) {
    %c0_i32 = arith.constant 0 : i32
    %c0_i32_0 = arith.constant 0 : i32
    %c0_i32_1 = arith.constant 0 : i32
    %c0_i32_2 = arith.constant 0 : i32
    return %c0_i32, %c0_i32_0, %c0_i32_1 : i32, i32, i32
  }
  func.func @transform_2(%arg0: i32) -> (i32, i32) {
    %c0_i32 = arith.constant 0 : i32
    %c0_i32_0 = arith.constant 0 : i32
    %c0_i32_1 = arith.constant 0 : i32
    return %c0_i32, %c0_i32_0 : i32, i32
  }
  func.func @transform_3(%arg0: i32) -> (i32, i32, i32) {
    %c0_i32 = arith.constant 0 : i32
    %c0_i32_0 = arith.constant 0 : i32
    %c0_i32_1 = arith.constant 0 : i32
    %c0_i32_2 = arith.constant 0 : i32
    return %c0_i32, %c0_i32_0, %c0_i32_1 : i32, i32, i32
  }
  func.func @transform_4(%arg0: i32) -> (i32, i32) {
    %c0_i32 = arith.constant 0 : i32
    %c0_i32_0 = arith.constant 0 : i32
    %c0_i32_1 = arith.constant 0 : i32
    return %c0_i32, %c0_i32_0 : i32, i32
  }
  func.func @transform_5(%arg0: i32) -> (i32, i32, i32) {
    %c0_i32 = arith.constant 0 : i32
    %c0_i32_0 = arith.constant 0 : i32
    %c0_i32_1 = arith.constant 0 : i32
    %c0_i32_2 = arith.constant 0 : i32
    return %c0_i32, %c0_i32_0, %c0_i32_1 : i32, i32, i32
  }
  func.func @transform_6(%arg0: i32) -> (i32, i32) {
    %c0_i32 = arith.constant 0 : i32
    %c0_i32_0 = arith.constant 0 : i32
    %c0_i32_1 = arith.constant 0 : i32
    return %c0_i32, %c0_i32_0 : i32, i32
  }
  func.func @transform_7(%arg0: i32) -> (i32, i32, i32) {
    %c0_i32 = arith.constant 0 : i32
    %c0_i32_0 = arith.constant 0 : i32
    %c0_i32_1 = arith.constant 0 : i32
    %c0_i32_2 = arith.constant 0 : i32
    return %c0_i32, %c0_i32_0, %c0_i32_1 : i32, i32, i32
  }
  func.func @transform_8(%arg0: i32) -> (i32, i32) {
    %c0_i32 = arith.constant 0 : i32
    %c0_i32_0 = arith.constant 0 : i32
    %c0_i32_1 = arith.constant 0 : i32
    return %c0_i32, %c0_i32_0 : i32, i32
  }
  func.func @transform_9(%arg0: i32) -> (i32, i32, i32) {
    %c0_i32 = arith.constant 0 : i32
    %c0_i32_0 = arith.constant 0 : i32
    %c0_i32_1 = arith.constant 0 : i32
    %c0_i32_2 = arith.constant 0 : i32
    return %c0_i32, %c0_i32_0, %c0_i32_1 : i32, i32, i32
  }
  func.func @transform_10(%arg0: i32) -> (i32, i32) {
    %c0_i32 = arith.constant 0 : i32
    %c0_i32_0 = arith.constant 0 : i32
    %c0_i32_1 = arith.constant 0 : i32
    return %c0_i32, %c0_i32_0 : i32, i32
  }
  func.func @transform_11(%arg0: i32) -> (i32, i32, i32) {
    %c0_i32 = arith.constant 0 : i32
    %c0_i32_0 = arith.constant 0 : i32
    %c0_i32_1 = arith.constant 0 : i32
    %c0_i32_2 = arith.constant 0 : i32
    return %c0_i32, %c0_i32_0, %c0_i32_1 : i32, i32, i32
  }
  func.func @transform_12(%arg0: i32) -> (i32, i32) {
    %c0_i32 = arith.constant 0 : i32
    %c0_i32_0 = arith.constant 0 : i32
    %c0_i32_1 = arith.constant 0 : i32
    return %c0_i32, %c0_i32_0 : i32, i32
  }
  func.func @transform_13(%arg0: i32) -> (i32, i32) {
    %c0_i32 = arith.constant 0 : i32
    %c0_i32_0 = arith.constant 0 : i32
    %c0_i32_1 = arith.constant 0 : i32
    return %c0_i32, %c0_i32_0 : i32, i32
  }
  func.func @transform_14(%arg0: i32) -> (i32, i32) {
    %c0_i32 = arith.constant 0 : i32
    %c0_i32_0 = arith.constant 0 : i32
    %c0_i32_1 = arith.constant 0 : i32
    return %c0_i32, %c0_i32_0 : i32, i32
  }
  func.func @transform_15(%arg0: i32) -> (i32, i32) {
    %c0_i32 = arith.constant 0 : i32
    %c0_i32_0 = arith.constant 0 : i32
    %c0_i32_1 = arith.constant 0 : i32
    return %c0_i32, %c0_i32_0 : i32, i32
  }
  func.func @transform_16(%arg0: i32) -> (i32, i32) {
    %c0_i32 = arith.constant 0 : i32
    %c0_i32_0 = arith.constant 0 : i32
    %c0_i32_1 = arith.constant 0 : i32
    return %c0_i32, %c0_i32_0 : i32, i32
  }
  func.func @transform_17(%arg0: i32) -> (i32, i32) {
    %c0_i32 = arith.constant 0 : i32
    %c0_i32_0 = arith.constant 0 : i32
    %c0_i32_1 = arith.constant 0 : i32
    return %c0_i32, %c0_i32_0 : i32, i32
  }
  func.func @transform_18(%arg0: i32) -> (i32, i32) {
    %c0_i32 = arith.constant 0 : i32
    %c0_i32_0 = arith.constant 0 : i32
    %c0_i32_1 = arith.constant 0 : i32
    return %c0_i32, %c0_i32_0 : i32, i32
  }
  func.func @transform_19(%arg0: i32) -> (i32, i32) {
    %c0_i32 = arith.constant 0 : i32
    %c0_i32_0 = arith.constant 0 : i32
    %c0_i32_1 = arith.constant 0 : i32
    return %c0_i32, %c0_i32_0 : i32, i32
  }
  func.func @transform_20(%arg0: i32) -> (i32, i32) {
    %c0_i32 = arith.constant 0 : i32
    %c0_i32_0 = arith.constant 0 : i32
    %c0_i32_1 = arith.constant 0 : i32
    return %c0_i32, %c0_i32_0 : i32, i32
  }
  func.func @transform_21(%arg0: i32) -> (i32, i32) {
    %c0_i32 = arith.constant 0 : i32
    %c0_i32_0 = arith.constant 0 : i32
    %c0_i32_1 = arith.constant 0 : i32
    return %c0_i32, %c0_i32_0 : i32, i32
  }
}

</mosaic_0001>

<bundles_post_ra>
// kernel: forward.1
= control target key start
LH: loop header
LB: loop body
LE: loop exit
PB: predicated region body
PF: predicated region fallthrough
CT: control target
= control target key end

     0   :  { %vm144_vm0 = vcmask 785408   ;;  %vm324_vm1 = vcmask 1046528   ;;  %vm565_vm2 = vcmask 1045504   ;;  %vm800_vm3 = vcmask 1044480   ;;  %s8886_s1 = inlined_call_operand.vmem [shape: bf16[9,96,96], index: 1, kind: input, shape index: {}]   ;;  %s8887_s0 = inlined_call_operand.vmem [shape: bf16[64,96], index: 0, kind: input, shape index: {}]   ;;  %s8888_s17 = inlined_call_operand.vmem [shape: f32[96,8], index: 17, kind: input, shape index: {}]   ;;  %s8889_s2 = inlined_call_operand.vmem [shape: f32[1,96], index: 2, kind: input, shape index: {}]   ;;  %s8890_s18 = inlined_call_operand.vmem [shape: f32[8,96], index: 18, kind: input, shape index: {}]   ;;  %s8891_s13 = inlined_call_operand.vmem [shape: f32[2,8], index: 13, kind: input, shape index: {}]   ;;  %s8892_s3 = inlined_call_operand.vmem [shape: bf16[7,96,96], index: 3, kind: input, shape index: {}]   ;;  %s8893_s4 = inlined_call_operand.vmem [shape: f32[1,96], index: 4, kind: input, shape index: {}]   ;;  %s8894_s14 = inlined_call_operand.vmem [shape: f32[2,8], index: 14, kind: input, shape index: {}]   ;;  %s8895_s5 = inlined_call_operand.vmem [shape: bf16[7,96,96], index: 5, kind: input, shape index: {}]   ;;  %s8896_s7 = inlined_call_operand.vmem [shape: bf16[5,96,64], index: 7, kind: input, shape index: {}]   ;;  %s8897_s6 = inlined_call_operand.vmem [shape: f32[1,96], index: 6, kind: input, shape index: {}]   ;;  %s8898_s19 = inlined_call_operand.vmem [shape: f32[64,16], index: 19, kind: input, shape index: {}]   ;;  %s8899_s8 = inlined_call_operand.vmem [shape: f32[1,64], index: 8, kind: input, shape index: {}]   ;;  %s8900_s20 = inlined_call_operand.vmem [shape: f32[16,64], index: 20, kind: input, shape index: {}]   ;;  %s8901_s15 = inlined_call_operand.vmem [shape: f32[2,16], index: 15, kind: input, shape index: {}]   ;;  %s8902_s9 = inlined_call_operand.vmem [shape: bf16[3,64,64], index: 9, kind: input, shape index: {}]   ;;  %s8903_s10 = inlined_call_operand.vmem [shape: f32[1,64], index: 10, kind: input, shape index: {}]   ;;  %s8904_s16 = inlined_call_operand.vmem [shape: f32[2,16], index: 16, kind: input, shape index: {}]   ;;  %s8905_s11 = inlined_call_operand.vmem [shape: bf16[3,64,64], index: 11, kind: input, shape index: {}]   ;;  %s8906_s12 = inlined_call_operand.vmem [shape: f32[1,64], index: 12, kind: input, shape index: {}]   ;;  %s8907_s21 = inlined_call_operand.vmem [shape: f32[8,64], index: 21, kind: output, shape index: {}]  }
   0x1   :  { %8912 = sst [smem:[#allocation5_spill]] %s8886_s1  ;;  %vm7367_vm4 = vmmov 0   ;;  %vm1330_vm5 = vcmask 64512   ;;  %vm1494_vm6 = vcmask 780288   ;;  %vm1496_vm7 = vcmask 781315  }
   0x2   :  { %8913 = sst [smem:[#allocation6_spill]] %s8887_s0  ;;  %vm1498_vm8 = vcmask 779264   ;;  %vm4451_vm9 = vcmask 517121   ;;  %vm1510_vm10 = vcmask 1042432   ;;  %vm1511_vm11 = vcmask 1046532  }
   0x3   :  { %8914 = sst [smem:[#allocation7_spill]] %s8888_s17  ;;  %vm7981_vm12 = vmor %vm1510_vm10, %vm1511_vm11  ;;  %vm1526_vm13 = vcmask 781312   ;;  %vm3563_vm14 = vcmask 778240   ;;  %vm3570_vm15 = vcmask 780290  }
   0x4   :  { %8915 = sst [smem:[#allocation8_spill]] %s8889_s2 }
   0x5   :  { %8916 = sst [smem:[#allocation9_spill]] %s8890_s18 }
   0x6   :  { %8917 = sst [smem:[#allocation10_spill]] %s8891_s13 }
   0x7   :  { %s8918_s26 = sld [smem:[#allocation5_spill]] }
   0x8   :  { %s8919_s30 = sld [smem:[#allocation6_spill]] }
   0x9   :  { %s8920_s13 = sld [smem:[#allocation7_spill]] }
   0xa   :  { %s8921_s28 = sld [smem:[#allocation8_spill]] }
   0xb   :  { %s8922_s18 = sld [smem:[#allocation9_spill]] }
   0xc   :  { %s8923_s22 = sld [smem:[#allocation10_spill]] }
   0xd   :  { %v7107_v0 = vld [vmem:[%s8918_s26 + $0x58] sm:$0xff]   ;;  %v7108_v1 = vld [vmem:[%s8918_s26 + $0x28] sm:$0xff]   ;;  %v7109_v2 = vld [vmem:[%s8918_s26 + $0x50] sm:$0xff]  }
   0xe   :  { %6352 = vmatprep.subr.bf16.mxu0 %v7107_v0  ;;  %6368 = vmatprep.subr.bf16.mxu1 %v7108_v1  ;;  %v7110_v3 = vld [vmem:[%s8918_s26 + $0x20] sm:$0xff]   ;;  %v7111_v4 = vld [vmem:[%s8918_s26 + $0x48] sm:$0xff]   ;;  %v7112_v5 = vld [vmem:[%s8918_s26 + $0x18] sm:$0xff]  }
   0xf   :  { %6353 = vmatpush3.bf16.msra.mxu0 %v7107_v0  ;;  %6369 = vmatpush3.bf16.msra.mxu1 %v7108_v1  ;;  %v7113_v6 = vld [vmem:[%s8918_s26 + $0x40] sm:$0xff]   ;;  %v7114_v7 = vld [vmem:[%s8918_s26 + $0x10] sm:$0xff]   ;;  %v7115_v8 = vld [vmem:[%s8918_s26 + $0x38] sm:$0xff]  }
  0x10   :  { %6354 = vmatprep.subr.bf16.mxu0 %v7109_v2  ;;  %6370 = vmatprep.subr.bf16.mxu1 %v7110_v3  ;;  %v7116_v9 = vld [vmem:[%s8918_s26 + $0x8] sm:$0xff]   ;;  %v7119_v10 = vld [vmem:[%s8919_s30 + $0x10] sm:$0xff]   ;;  %v7120_v11 = vld [vmem:[%s8919_s30] sm:$0xff]  }
  0x11   :  { %6364 = vmatprep.mubr.msk.bf16.mxu0 %vm144_vm0, %v7119_v10  ;;  %6380 = vmatprep.mubr.msk.bf16.mxu1 %vm144_vm0, %v7120_v11  ;;  %v7117_v12 = vld [vmem:[%s8918_s26 + $0x30] sm:$0xff]   ;;  %v7118_v13 = vld [vmem:[%s8918_s26] sm:$0xff]   ;;  %v7123_v14 = vld [vmem:[%s8918_s26 + $0x88] sm:$0xff]  }
  0x12   :  { %v7124_v15 = vld [vmem:[%s8918_s26 + $0xb8] sm:$0xff]   ;;  %v7122_v17 = vld [vmem:[%s8919_s30 + $0x8] ss:$0 sps:$4 sm:$0xff]   ;;  %v7125_v18 = vld [vmem:[%s8918_s26 + $0x80] sm:$0xff]  }
  0x13   :  { %6355 = vmatpush3.bf16.msra.mxu0 %v7109_v2  ;;  %6371 = vmatpush3.bf16.msra.mxu1 %v7110_v3  ;;  %v7121_v16 = vld [vmem:[%s8919_s30 + $0x18] ss:$0 sps:$4 sm:$0xff]   ;;  %v7126_v19 = vld [vmem:[%s8918_s26 + $0xb0] sm:$0xff]   ;;  %v297_v21 = vld [vmem:[%s8919_s30] sm:$0xe] }
  0x14   :  { %6356 = vmatprep.subr.bf16.mxu0 %v7111_v4  ;;  %6372 = vmatprep.subr.bf16.mxu1 %v7112_v5  ;;  %v7127_v20 = vld [vmem:[%s8918_s26 + $0x78] sm:$0xff]   ;;  %v7552_v22 = vld [vmem:[%s8919_s30 + $0x4] sm:$0xf]  ;;  %v7557_v23 = vld [vmem:[%s8919_s30 + $0x8] sm:$0xf] }
  0x15   :  { %v300_v24 = vld [vmem:[%s8919_s30 + $0xc] sm:$0x1]  ;;  %v5369_v25 = vcombine.low %v297_v21, %v7552_v22  ;;  %v421_v28 = vld [vmem:[%s8919_s30 + $0x10] sm:$0xe]  ;;  %v5501_v29 = vcombine.low %v7552_v22, %v7557_v23  ;;  %v7575_v31 = vld [vmem:[%s8919_s30 + $0x14] sm:$0xf] }
  0x16   :  { %v7128_v26 = vld [vmem:[%s8918_s26 + $0xa8] sm:$0xff]   ;;  %v5370_v27 = vcombine.low %v7557_v23, %v300_v24  ;;  %v7580_v32 = vld [vmem:[%s8919_s30 + $0x18] sm:$0xf]  ;;  %v7129_v33 = vld [vmem:[%s8918_s26 + $0x70] sm:$0xff]   ;;  %v5391_v36 = vcombine.low %v421_v28, %v7575_v31 }
  0x17   :  { %6357 = vmatpush3.bf16.msra.mxu0 %v7111_v4  ;;  %6373 = vmatpush3.bf16.msra.mxu1 %v7112_v5  ;;  %v325_v30 = vrot.slane %v5369_v25, 1  ;;  %v424_v35 = vld [vmem:[%s8919_s30 + $0x1c] sm:$0x1]  ;;  %v7130_v38 = vld [vmem:[%s8918_s26 + $0xa0] sm:$0xff]   ;;  %v7131_v42 = vld [vmem:[%s8918_s26 + $0x68] sm:$0xff]  }
  0x18   :  { %6358 = vmatprep.subr.bf16.mxu0 %v7113_v6  ;;  %6374 = vmatprep.subr.bf16.mxu1 %v7114_v7  ;;  %v326_v34 = vrot.slane %v5370_v27, 1  ;;  %v5392_v37 = vcombine.low %v7580_v32, %v424_v35  ;;  %v448_v40 = vrot.slane %v5391_v36, 1  ;;  %v7132_v44 = vld [vmem:[%s8918_s26 + $0x98] sm:$0xff]   ;;  %v7133_v45 = vld [vmem:[%s8918_s26 + $0x60] sm:$0xff]   ;;  %v7134_v46 = vld [vmem:[%s8918_s26 + $0x90] sm:$0xff]  }
  0x19   :  { %v544_v47 = vld [vmem:[%s8919_s30] sm:$0xc]  ;;  %v545_v48 = vld [vmem:[%s8919_s30 + $0xc] sm:$0x3]  ;;  %v662_v52 = vld [vmem:[%s8919_s30 + $0x10] sm:$0xc] }
  0x1a   :  { %v327_v39 = vsel %vm324_vm1, %v325_v30, %v326_v34  ;;  %v449_v41 = vrot.slane %v5392_v37, 1  ;;  %v7137_v49 = vld [vmem:[%s8918_s26 + $0xe8] sm:$0xff]   ;;  %v5413_v50 = vcombine.low %v544_v47, %v7552_v22  ;;  %v5414_v51 = vcombine.low %v7557_v23, %v545_v48  ;;  %v663_v53 = vld [vmem:[%s8919_s30 + $0x1c] sm:$0x3]  ;;  %v7141_v57 = vld [vmem:[%s8918_s26 + $0xe0] sm:$0xff]  }
  0x1b   :  { %6359 = vmatpush3.bf16.msra.mxu0 %v7113_v6  ;;  %6375 = vmatpush3.bf16.msra.mxu1 %v7114_v7  ;;  %v5435_v54 = vcombine.low %v662_v52, %v7575_v31  ;;  %v7140_v55 = vld [vmem:[%s8918_s26 + $0x118] sm:$0xff]   ;;  %v5436_v56 = vcombine.low %v7580_v32, %v663_v53  ;;  %v7142_v62 = vld [vmem:[%s8918_s26 + $0x110] sm:$0xff]   ;;  %v7144_v2 = vld [vmem:[%s8918_s26 + $0x108] sm:$0xff]  }
  0x1c   :  { %6360 = vmatprep.subr.bf16.mxu0 %v7115_v8  ;;  %6376 = vmatprep.subr.bf16.mxu1 %v7116_v9  ;;  %v450_v43 = vsel %vm324_vm1, %v448_v40, %v449_v41  ;;  %v566_v58 = vrot.slane %v5413_v50, 2  ;;  %v7634_v59 = vrot.slane %v5414_v51, 2  ;;  %v7143_v1 = vld [vmem:[%s8918_s26 + $0xd8] sm:$0xff]   ;;  %v7145_v3 = vld [vmem:[%s8918_s26 + $0xd0] sm:$0xff]   ;;  %v7146_v4 = vld [vmem:[%s8918_s26 + $0x100] sm:$0xff]  }
  0x1d   :  { %v683_v60 = vrot.slane %v5435_v54, 2  ;;  %v7636_v61 = vrot.slane %v5436_v56, 2  ;;  %v7147_v5 = vld [vmem:[%s8918_s26 + $0xc8] sm:$0xff]   ;;  %v7148_v6 = vld [vmem:[%s8918_s26 + $0xf8] sm:$0xff]   ;;  %v779_v7 = vld [vmem:[%s8919_s30] sm:$0x8] }
  0x1e   :  { %v568_v63 = vsel %vm565_vm2, %v566_v58, %v7634_v59  ;;  %v897_v10 = vld [vmem:[%s8919_s30 + $0x10] sm:$0x8]  ;;  %v898_v11 = vld [vmem:[%s8919_s30 + $0x1c] sm:$0x7]  ;;  %v7157_v25 = vld [vmem:[%s8918_s26 + $0x140] sm:$0xff]  }
  0x1f   :  { %6361 = vmatpush3.bf16.msra.mxu0 %v7115_v8  ;;  %6377 = vmatpush3.bf16.msra.mxu1 %v7116_v9  ;;  %v685_v0 = vsel %vm565_vm2, %v683_v60, %v7636_v61  ;;  %v780_v8 = vld [vmem:[%s8919_s30 + $0xc] sm:$0x7]  ;;  %v7149_v9 = vld [vmem:[%s8918_s26 + $0xc0] sm:$0xff]   ;;  %v7159_v30 = vld [vmem:[%s8918_s26 + $0x138] sm:$0xff]  }
  0x20   :  { %6362 = vmatprep.subr.bf16.mxu0 %v7117_v12  ;;  %6378 = vmatprep.subr.bf16.mxu1 %v7118_v13  ;;  %v7164_v35 = vld [vmem:[%s8918_s26 + $0x158] sm:$0xff]   ;;  %v7165_v36 = vld [vmem:[%s8918_s26 + $0x120] sm:$0xff]   ;;  %v7166_v37 = vld [vmem:[%s8918_s26 + $0x150] sm:$0xff]  }
  0x21   :  { %v7173_v40 = vld [vmem:[%s8918_s26 + $0x198] sm:$0xff]   ;;  %v7810_v48 = vld [vmem:[%s8920_s13 + $0x30] sm:$0xff]  ;;  %v7826_v50 = vld [vmem:[%s8920_s13 + $0x20] sm:$0xff] }
  0x22   :  { %v7801_v47 = vld [vmem:[%s8920_s13 + $0x38] sm:$0xff]  ;;  %v7843_v52 = vld [vmem:[%s8920_s13 + $0x10] sm:$0xff]  ;;  %v7852_v53 = vld [vmem:[%s8920_s13 + $0x8] sm:$0xff] }
  0x23   :  { %6363 = vmatpush3.bf16.msra.mxu0 %v7117_v12  ;;  %6379 = vmatpush3.bf16.msra.mxu1 %v7118_v13  ;;  %v7150_v12 = vld [vmem:[%s8918_s26 + $0xf0] sm:$0xff]   ;;  %v5457_v13 = vcombine.low %v779_v7, %v7552_v22  ;;  %v7176_v22 = vld [vmem:[%s8918_s26 + $0x180] sm:$0xff]   ;;  %v7834_v51 = vld [vmem:[%s8920_s13 + $0x18] sm:$0xff] }
  0x24   :  { %6384 = vmatprep.subr.bf16.mxu0 %v7123_v14  ;;  %6400 = vmatprep.subr.bf16.mxu1 %v7124_v15  ;;  %v7861_v54 = vld [vmem:[%s8920_s13] sm:$0xff] }
  0x26   :  { %6365 = vmatmul.mubr.msk.bf16.vlgmr.msra.gmra.mxu0 %vm144_vm0, %v7121_v16  ;;  %6381 = vmatmul.mubr.msk.bf16.vlgmr.msra.gmra.mxu1 %vm144_vm0, %v7122_v17  ;;  %v5480_v16 = vcombine.low %v7580_v32, %v898_v11  ;;  %v7153_v17 = vld [vmem:[%s8918_s26 + $0x148] sm:$0xff]   ;;  %v7161_v32 = vld [vmem:[%s8918_s26 + $0x130] sm:$0xff]  }
  0x27   :  { %6385 = vmatpush3.bf16.msra.mxu0 %v7123_v14  ;;  %6401 = vmatpush3.bf16.msra.mxu1 %v7124_v15  ;;  %v5458_v14 = vcombine.low %v7557_v23, %v780_v8  ;;  %v5479_v15 = vcombine.low %v897_v10, %v7575_v31  ;;  %v7160_v31 = vld [vmem:[%s8918_s26 + $0x168] sm:$0xff]  }
  0x28   :  { %6386 = vmatprep.subr.bf16.mxu0 %v7125_v18  ;;  %6402 = vmatprep.subr.bf16.mxu1 %v7126_v19  ;;  %v919_v24 = vrot.slane %v5480_v16, 3  ;;  %v7178_v23 = vld [vmem:[%s8919_s30 + $0xc] ss:$0 sps:$4 sm:$0xff]  }
  0x29   :  { %6396 = vmatprep.mubr.msk.bf16.mxu0 %vm144_vm0, %v327_v39  ;;  %6412 = vmatprep.mubr.msk.bf16.mxu1 %vm144_vm0, %v450_v43  ;;  %v918_v21 = vrot.slane %v5479_v15, 3  ;;  %v7172_v39 = vld [vmem:[%s8918_s26 + $0x1a0] sm:$0xff]   ;;  %v7765_v43 = vld [vmem:[%s8920_s13 + $0x58] sm:$0xff] }
  0x2b   :  { %6387 = vmatpush3.bf16.msra.mxu0 %v7125_v18  ;;  %6403 = vmatpush3.bf16.msra.mxu1 %v7126_v19  ;;  %v7156_v18 = vld [vmem:[%s8918_s26 + $0x178] sm:$0xff]   ;;  %v801_v19 = vrot.slane %v5457_v13, 3  ;;  %v920_v28 = vsel %vm800_vm3, %v918_v21, %v919_v24 }
  0x2c   :  { %6388 = vmatprep.subr.bf16.mxu0 %v7127_v20  ;;  %6404 = vmatprep.subr.bf16.mxu1 %v7128_v26 }
  0x2f   :  { %6389 = vmatpush3.bf16.msra.mxu0 %v7127_v20  ;;  %6405 = vmatpush3.bf16.msra.mxu1 %v7128_v26  ;;  %v802_v20 = vrot.slane %v5458_v14, 3  ;;  %v7158_v26 = vld [vmem:[%s8918_s26 + $0x170] sm:$0xff]  }
  0x30   :  { %6390 = vmatprep.subr.bf16.mxu0 %v7129_v33  ;;  %6406 = vmatprep.subr.bf16.mxu1 %v7130_v38 }
  0x31   :  { %v803_v27 = vsel %vm800_vm3, %v801_v19, %v802_v20 }
  0x33   :  { %6391 = vmatpush3.bf16.msra.mxu0 %v7129_v33  ;;  %6407 = vmatpush3.bf16.msra.mxu1 %v7130_v38  ;;  %v7162_v33 = vld [vmem:[%s8918_s26 + $0x160] sm:$0xff]   ;;  %v7169_v38 = vld [vmem:[%s8918_s26 + $0x1a8] sm:$0xff]  }
  0x34   :  { %6392 = vmatprep.subr.bf16.mxu0 %v7131_v42  ;;  %6408 = vmatprep.subr.bf16.mxu1 %v7132_v44 }
  0x37   :  { %6393 = vmatpush3.bf16.msra.mxu0 %v7131_v42  ;;  %6409 = vmatpush3.bf16.msra.mxu1 %v7132_v44  ;;  %v7175_v42 = vld [vmem:[%s8918_s26 + $0x188] sm:$0xff]   ;;  %v7774_v44 = vld [vmem:[%s8920_s13 + $0x50] sm:$0xff] }
  0x38   :  { %6394 = vmatprep.subr.bf16.mxu0 %v7133_v45  ;;  %6410 = vmatprep.subr.bf16.mxu1 %v7134_v46 }
  0x3b   :  { %6395 = vmatpush3.bf16.msra.mxu0 %v7133_v45  ;;  %6411 = vmatpush3.bf16.msra.mxu1 %v7134_v46  ;;  %v7783_v45 = vld [vmem:[%s8920_s13 + $0x48] sm:$0xff]  ;;  %v7792_v46 = vld [vmem:[%s8920_s13 + $0x40] sm:$0xff] }
  0x3c   :  { %6416 = vmatprep.subr.bf16.mxu0 %v7137_v49  ;;  %6432 = vmatprep.subr.bf16.mxu1 %v7140_v55 }
  0x3e   :  { %6397 = vmatmul.mubr.msk.bf16.vlgmr.msra.gmra.mxu0 %vm144_vm0, %v326_v34  ;;  %6413 = vmatmul.mubr.msk.bf16.vlgmr.msra.gmra.mxu1 %vm144_vm0, %v449_v41  ;;  %v7163_v34 = vld [vmem:[%s8918_s26 + $0x128] sm:$0xff]   ;;  %v7174_v41 = vld [vmem:[%s8918_s26 + $0x190] sm:$0xff]  }
  0x3f   :  { %6417 = vmatpush3.bf16.msra.mxu0 %v7137_v49  ;;  %6433 = vmatpush3.bf16.msra.mxu1 %v7140_v55  ;;  %v7819_v49 = vld [vmem:[%s8920_s13 + $0x28] sm:$0xff] }
  0x40   :  { %6418 = vmatprep.subr.bf16.mxu0 %v7141_v57  ;;  %6434 = vmatprep.subr.bf16.mxu1 %v7142_v62 }
  0x41   :  { %6428 = vmatprep.mubr.msk.bf16.mxu0 %vm144_vm0, %v568_v63  ;;  %6444 = vmatprep.mubr.msk.bf16.mxu1 %vm144_vm0, %v685_v0 }
  0x43   :  { %6419 = vmatpush3.bf16.msra.mxu0 %v7141_v57  ;;  %6435 = vmatpush3.bf16.msra.mxu1 %v7142_v62 }
  0x44   :  { %6420 = vmatprep.subr.bf16.mxu0 %v7143_v1  ;;  %6436 = vmatprep.subr.bf16.mxu1 %v7144_v2 }
  0x47   :  { %6421 = vmatpush3.bf16.msra.mxu0 %v7143_v1  ;;  %6437 = vmatpush3.bf16.msra.mxu1 %v7144_v2 }
  0x48   :  { %6422 = vmatprep.subr.bf16.mxu0 %v7145_v3  ;;  %6438 = vmatprep.subr.bf16.mxu1 %v7146_v4 }
  0x4b   :  { %6423 = vmatpush3.bf16.msra.mxu0 %v7145_v3  ;;  %6439 = vmatpush3.bf16.msra.mxu1 %v7146_v4 }
  0x4c   :  { %6424 = vmatprep.subr.bf16.mxu0 %v7147_v5  ;;  %6440 = vmatprep.subr.bf16.mxu1 %v7148_v6 }
  0x4f   :  { %6425 = vmatpush3.bf16.msra.mxu0 %v7147_v5  ;;  %6441 = vmatpush3.bf16.msra.mxu1 %v7148_v6 }
  0x50   :  { %6426 = vmatprep.subr.bf16.mxu0 %v7149_v9  ;;  %6442 = vmatprep.subr.bf16.mxu1 %v7150_v12 }
  0x53   :  { %6427 = vmatpush3.bf16.msra.mxu0 %v7149_v9  ;;  %6443 = vmatpush3.bf16.msra.mxu1 %v7150_v12 }
  0x54   :  { %6448 = vmatprep.subr.bf16.mxu0 %v7153_v17  ;;  %6464 = vmatprep.subr.bf16.mxu1 %v7156_v18 }
  0x56   :  { %6429 = vmatmul.mubr.msk.bf16.vlgmr.msra.gmra.mxu0 %vm144_vm0, %v7634_v59  ;;  %6445 = vmatmul.mubr.msk.bf16.vlgmr.msra.gmra.mxu1 %vm144_vm0, %v7636_v61 }
  0x57   :  { %6449 = vmatpush3.bf16.msra.mxu0 %v7153_v17  ;;  %6465 = vmatpush3.bf16.msra.mxu1 %v7156_v18 }
  0x58   :  { %6450 = vmatprep.subr.bf16.mxu0 %v7157_v25  ;;  %6466 = vmatprep.subr.bf16.mxu1 %v7158_v26 }
  0x59   :  { %6460 = vmatprep.mubr.msk.bf16.mxu0 %vm144_vm0, %v803_v27  ;;  %6476 = vmatprep.mubr.msk.bf16.mxu1 %vm144_vm0, %v920_v28 }
  0x5b   :  { %6451 = vmatpush3.bf16.msra.mxu0 %v7157_v25  ;;  %6467 = vmatpush3.bf16.msra.mxu1 %v7158_v26 }
  0x5c   :  { %6452 = vmatprep.subr.bf16.mxu0 %v7159_v30  ;;  %6468 = vmatprep.subr.bf16.mxu1 %v7160_v31 }
  0x5f   :  { %6453 = vmatpush3.bf16.msra.mxu0 %v7159_v30  ;;  %6469 = vmatpush3.bf16.msra.mxu1 %v7160_v31 }
  0x60   :  { %6454 = vmatprep.subr.bf16.mxu0 %v7161_v32  ;;  %6470 = vmatprep.subr.bf16.mxu1 %v7162_v33 }
  0x63   :  { %6455 = vmatpush3.bf16.msra.mxu0 %v7161_v32  ;;  %6471 = vmatpush3.bf16.msra.mxu1 %v7162_v33 }
  0x64   :  { %6456 = vmatprep.subr.bf16.mxu0 %v7163_v34  ;;  %6472 = vmatprep.subr.bf16.mxu1 %v7164_v35 }
  0x67   :  { %6457 = vmatpush3.bf16.msra.mxu0 %v7163_v34  ;;  %6473 = vmatpush3.bf16.msra.mxu1 %v7164_v35 }
  0x68   :  { %6458 = vmatprep.subr.bf16.mxu0 %v7165_v36  ;;  %6474 = vmatprep.subr.bf16.mxu1 %v7166_v37 }
  0x6b   :  { %6459 = vmatpush3.bf16.msra.mxu0 %v7165_v36  ;;  %6475 = vmatpush3.bf16.msra.mxu1 %v7166_v37 }
  0x6c   :  { %6480 = vmatprep.subr.bf16.mxu0 %v7169_v38 }
  0x6e   :  { %6461 = vmatmul.mubr.msk.bf16.vlgmr.msra.gmra.mxu0 %vm144_vm0, %v802_v20  ;;  %6477 = vmatmul.mubr.msk.bf16.vlgmr.msra.gmra.mxu1 %vm144_vm0, %v919_v24 }
  0x6f   :  { %6481 = vmatpush3.bf16.msra.mxu0 %v7169_v38  ;;  %6492 = vmatprep.mubr.msk.bf16.mxu0 %vm144_vm0, %v5501_v29  ;;  %v7366_v29 = vmov 0.0  }
  0x70   :  { %6482 = vmatprep.subr.bf16.mxu0 %v7172_v39  ;;  %6496 = vmatprep.subr.mxu1 %v7366_v29 }
  0x71   :  { %6497 = vmatpush3.msra.mxu1 %v7765_v43  ;;  %6520 = vmatprep.mubr.msk.f32.mxu1 %vm7367_vm4, %v7366_v29 }
  0x72   :  { %6498 = vmatprep.subr.mxu1 %v7366_v29 }
  0x73   :  { %6483 = vmatpush3.bf16.msra.mxu0 %v7172_v39  ;;  %6499 = vmatpush3.msra.mxu1 %v7774_v44 }
  0x74   :  { %6484 = vmatprep.subr.bf16.mxu0 %v7173_v40  ;;  %6500 = vmatprep.subr.mxu1 %v7366_v29 }
  0x75   :  { %6501 = vmatpush3.msra.mxu1 %v7783_v45 }
  0x76   :  { %6502 = vmatprep.subr.mxu1 %v7366_v29 }
  0x77   :  { %6485 = vmatpush3.bf16.msra.mxu0 %v7173_v40  ;;  %6503 = vmatpush3.msra.mxu1 %v7792_v46 }
  0x78   :  { %6486 = vmatprep.subr.bf16.mxu0 %v7174_v41  ;;  %6504 = vmatprep.subr.mxu1 %v7366_v29 }
  0x79   :  { %6505 = vmatpush3.msra.mxu1 %v7801_v47 }
  0x7a   :  { %6506 = vmatprep.subr.mxu1 %v7366_v29 }
  0x7b   :  { %6487 = vmatpush3.bf16.msra.mxu0 %v7174_v41  ;;  %6507 = vmatpush3.msra.mxu1 %v7810_v48 }
  0x7c   :  { %6488 = vmatprep.subr.bf16.mxu0 %v7175_v42  ;;  %6508 = vmatprep.subr.mxu1 %v7366_v29 }
  0x7d   :  { %6509 = vmatpush3.msra.mxu1 %v7819_v49 }
  0x7e   :  { %6510 = vmatprep.subr.mxu1 %v7366_v29 }
  0x7f   :  { %6489 = vmatpush3.bf16.msra.mxu0 %v7175_v42  ;;  %6511 = vmatpush3.msra.mxu1 %v7826_v50 }
  0x80   :  { %6490 = vmatprep.subr.bf16.mxu0 %v7176_v22  ;;  %6512 = vmatprep.subr.mxu1 %v7366_v29 }
  0x81   :  { %6513 = vmatpush3.msra.mxu1 %v7834_v51 }
  0x82   :  { %6514 = vmatprep.subr.mxu1 %v7366_v29 }
  0x83   :  { %6491 = vmatpush3.bf16.msra.mxu0 %v7176_v22  ;;  %6515 = vmatpush3.msra.mxu1 %v7843_v52 }
  0x84   :  { %6523 = vmatprep.subr.mxu0 %v7366_v29  ;;  %6516 = vmatprep.subr.mxu1 %v7366_v29 }
  0x85   :  { %6517 = vmatpush3.msra.mxu1 %v7852_v53 }
  0x86   :  { %6493 = vmatmul.mubr.msk.bf16.vlgmr.msra.gmra.mxu0 %vm144_vm0, %v7178_v23  ;;  %6518 = vmatprep.subr.mxu1 %v7366_v29 }
  0x87   :  { %6524 = vmatpush3.msra.mxu0 %v7765_v43  ;;  %6519 = vmatpush3.msra.mxu1 %v7861_v54 }
  0x88   :  { %6525 = vmatprep.subr.mxu0 %v7366_v29  ;;  %6547 = vmatprep.mubr.msk.f32.mxu0 %vm7367_vm4, %v7366_v29 }
  0x89   :  { %6526 = vmatpush3.msra.mxu0 %v7774_v44  ;;  %6555 = vmatprep.subr.mxu1 %v7366_v29 }
  0x8a   :  { %6527 = vmatprep.subr.mxu0 %v7366_v29 }
  0x8b   :  { %6528 = vmatpush3.msra.mxu0 %v7783_v45 }
  0x8c   :  { %6529 = vmatprep.subr.mxu0 %v7366_v29 }
  0x8d   :  { %6530 = vmatpush3.msra.mxu0 %v7792_v46 }
  0x8e   :  { %6531 = vmatprep.subr.mxu0 %v7366_v29 }
  0x8f   :  { %6532 = vmatpush3.msra.mxu0 %v7801_v47 }
  0x90   :  { %6533 = vmatprep.subr.mxu0 %v7366_v29 }
  0x91   :  { %6534 = vmatpush3.msra.mxu0 %v7810_v48 }
  0x92   :  { %6535 = vmatprep.subr.mxu0 %v7366_v29 }
  0x93   :  { %6536 = vmatpush3.msra.mxu0 %v7819_v49 }
  0x94   :  { %6537 = vmatprep.subr.mxu0 %v7366_v29 }
  0x95   :  { %6538 = vmatpush3.msra.mxu0 %v7826_v50 }
  0x96   :  { %6539 = vmatprep.subr.mxu0 %v7366_v29 }
  0x97   :  { %6540 = vmatpush3.msra.mxu0 %v7834_v51 }
  0x98   :  { %6541 = vmatprep.subr.mxu0 %v7366_v29 }
  0x99   :  { %6542 = vmatpush3.msra.mxu0 %v7843_v52 }
  0x9a   :  { %6543 = vmatprep.subr.mxu0 %v7366_v29 }
  0x9b   :  { %6544 = vmatpush3.msra.mxu0 %v7852_v53 }
  0x9c   :  { %6545 = vmatprep.subr.mxu0 %v7366_v29 }
  0x9d   :  { %6546 = vmatpush3.msra.mxu0 %v7861_v54 }
  0x9e   :  { %6550 = vmatprep.subr.mxu0 %v7366_v29 }
  0xe6   :  { %v6366_v55 = vpop.f32.mrf.mxu0  ;;  %v6382_v56 = vpop.f32.mrf.mxu1 }
  0xe7   :  { %v292_v57 = vadd.f32 %v6382_v56, %v6366_v55 }
  0xe8   :  { %v185_v58 = vpop.f32.mrf.mxu0  ;;  %v283_v59 = vpop.f32.mrf.mxu1 }
  0xe9   :  { %v284_v60 = vadd.f32 %v283_v59, %v185_v58 }
  0xea   :  { %v6367_v61 = vpop.f32.mrf.mxu0  ;;  %v6383_v62 = vpop.f32.mrf.mxu1 }
  0xec   :  { %v188_v63 = vpop.f32.mrf.mxu0  ;;  %v286_v0 = vpop.f32.mrf.mxu1 }
  0xed   :  { %v287_v1 = vadd.f32 %v286_v0, %v188_v63 }
  0xfe   :  { %v6398_v2 = vpop.f32.mrf.mxu0  ;;  %v6414_v4 = vpop.f32.mrf.mxu1 }
  0xff   :  { %v420_v3 = vadd.f32 %v6398_v2, %v292_v57 }
 0x100   :  { %v404_v5 = vpop.f32.mrf.mxu0  ;;  %v527_v8 = vpop.f32.mrf.mxu1 }
 0x101   :  { %v418_v6 = vadd.f32 %v404_v5, %v284_v60  ;;  %v543_v7 = vadd.f32 %v6414_v4, %v420_v3  ;;  %v5511_v60 = vld [vmem:[%s8921_s28] ss:$0 sm:$0xff] }
 0x102   :  { %v6399_v9 = vpop.f32.mrf.mxu0  ;;  %v6415_v11 = vpop.f32.mrf.mxu1 }
 0x103   :  { %v541_v10 = vadd.f32 %v527_v8, %v418_v6 }
 0x104   :  { %v407_v12 = vpop.f32.mrf.mxu0  ;;  %v530_v13 = vpop.f32.mrf.mxu1 }
 0x105   :  { %v419_v31 = vadd.f32 %v407_v12, %v287_v1 }
 0x107   :  { %v542_v34 = vadd.f32 %v530_v13, %v419_v31 }
 0x116   :  { %v6430_v14 = vpop.f32.mrf.mxu0  ;;  %v6446_v15 = vpop.f32.mrf.mxu1 }
 0x117   :  { %v661_v32 = vadd.f32 %v6430_v14, %v543_v7 }
 0x118   :  { %v645_v16 = vpop.f32.mrf.mxu0  ;;  %v762_v17 = vpop.f32.mrf.mxu1 }
 0x119   :  { %v659_v33 = vadd.f32 %v645_v16, %v541_v10  ;;  %v778_v35 = vadd.f32 %v6446_v15, %v661_v32  ;;  %v7908_v32 = vld [vmem:[%s8922_s18] sm:$0xff] }
 0x11a   :  { %v6431_v18 = vpop.f32.mrf.mxu0  ;;  %v6447_v19 = vpop.f32.mrf.mxu1 }
 0x11b   :  { %v776_v36 = vadd.f32 %v762_v17, %v659_v33 }
 0x11c   :  { %v648_v20 = vpop.f32.mrf.mxu0  ;;  %v765_v21 = vpop.f32.mrf.mxu1 }
 0x11d   :  { %v660_v37 = vadd.f32 %v648_v20, %v542_v34 }
 0x11f   :  { %v777_v41 = vadd.f32 %v765_v21, %v660_v37 }
 0x12e   :  { %v6462_v24 = vpop.f32.mrf.mxu0  ;;  %v6478_v25 = vpop.f32.mrf.mxu1 }
 0x12f   :  { %v896_v38 = vadd.f32 %v6462_v24, %v778_v35 }
 0x130   :  { %v880_v26 = vpop.f32.mrf.mxu0  ;;  %v997_v27 = vpop.f32.mrf.mxu1 }
 0x131   :  { %v894_v39 = vadd.f32 %v880_v26, %v776_v36  ;;  %v1013_v22 = vadd.f32 %v6478_v25, %v896_v38 }
 0x132   :  { %v6463_v28 = vpop.f32.mrf.mxu0  ;;  %v6479_v30 = vpop.f32.mrf.mxu1 }
 0x133   :  { %v1011_v23 = vadd.f32 %v997_v27, %v894_v39 }
 0x134   :  { %v883_v40 = vpop.f32.mrf.mxu0  ;;  %v1000_v56 = vpop.f32.mrf.mxu1 }
 0x135   :  { %v895_v55 = vadd.f32 %v883_v40, %v777_v41 }
 0x137   :  { %v1012_v62 = vadd.f32 %v1000_v56, %v895_v55  ;;  %v1326_v55 = vld [vmem:[%s8923_s22 + $0x1] sm:$0x1] }
 0x146   :  { %v6494_v42 = vpop.f32.mrf.mxu0 }
 0x147   :  { %v1124_v58 = vadd.f32 %v6494_v42, %v1013_v22  ;;  %v1322_v42 = vld [vmem:[%s8923_s22] sm:$0x1] }
 0x148   :  { %v1108_v57 = vpop.f32.mrf.mxu0 }
 0x149   :  { %v1122_v59 = vadd.f32 %v1108_v57, %v1011_v23  ;;  %v7880_v1 = vadd.f32 %v5511_v60, %v1124_v58  ;;  %v7179_v58 = vld [vmem:[%s8892_s3 + $0x28] sm:$0xff]  }
 0x14a   :  { %v6495_v61 = vpop.f32.mrf.mxu0 }
 0x14b   :  { %v7878_v63 = vadd.f32 %v5511_v60, %v1122_v59  ;;  %v1148_v5 = vmul.f32 %v7880_v1, %v7880_v1  ;;  %v1138_v10 = vsel %vm144_vm0, %v7880_v1, 0.0  ;;  %v7180_v59 = vld [vmem:[%s8892_s3 + $0x58] sm:$0xff]   ;;  %v7368_v61 = vmov 0  }
 0x14c   :  { %v1111_v0 = vpop.f32.mrf.mxu0  ;;  %1495 = vst.msk [vmem:[#allocation2] sm:$0x7] %vm1494_vm6, %v7368_v61 }
 0x14d   :  { %v1123_v2 = vadd.f32 %v1111_v0, %v1012_v62  ;;  %v1146_v3 = vmul.f32 %v7878_v63, %v7878_v63  ;;  %v1135_v6 = vsel %vm144_vm0, %v7878_v63, 0.0  ;;  %v1152_v15 = vsel %vm144_vm0, %v1148_v5, 0.0  ;;  %1497 = vst.msk [vmem:[#allocation2 + $0xc] sm:$0x8] %vm1496_vm7, %v7368_v61  ;;  %v7182_v62 = vld [vmem:[%s8892_s3 + $0x50] sm:$0xff]   ;;  %v7183_v0 = vld [vmem:[%s8892_s3 + $0x18] sm:$0xff]  }
 0x14e   :  { %1499 = vst.msk [vmem:[#allocation2 + $0x10] sm:$0x3] %vm1498_vm8, %v7368_v61  ;;  %v7186_v5 = vld [vmem:[%s8892_s3 + $0x40] sm:$0xff]  }
 0x14f   :  { %v7884_v4 = vadd.f32 %v5511_v60, %v1123_v2  ;;  %v1149_v11 = vsel %vm144_vm0, %v1146_v3, 0.0  ;;  %v7181_v60 = vld [vmem:[%s8892_s3 + $0x20] sm:$0xff]   ;;  %v7184_v2 = vld [vmem:[%s8892_s3 + $0x48] sm:$0xff]   ;;  %v7185_v3 = vld [vmem:[%s8892_s3 + $0x10] sm:$0xff]   ;;  %4452 = vst.msk [vmem:[#allocation3 + $0x4] sm:$0x2] %vm4451_vm9, %v7368_v61 }
 0x151   :  { %v1136_v7 = vsel %vm144_vm0, %v7884_v4, 0.0  ;;  %v1147_v8 = vmul.f32 %v7884_v4, %v7884_v4 }
 0x152   :  { %v1137_v9 = vadd.f32 %v1136_v7, %v1135_v6  ;;  %v7187_v6 = vld [vmem:[%s8892_s3 + $0x8] sm:$0xff]   ;;  %v7188_v7 = vld [vmem:[%s8892_s3 + $0x38] sm:$0xff]  }
 0x153   :  { %v1150_v12 = vsel %vm144_vm0, %v1147_v8, 0.0  ;;  %v7189_v8 = vld [vmem:[%s8892_s3] sm:$0xff]  }
 0x154   :  { %v1139_v13 = vadd.f32 %v1138_v10, %v1137_v9  ;;  %v1151_v14 = vadd.f32 %v1150_v12, %v1149_v11  ;;  %v7190_v9 = vld [vmem:[%s8892_s3 + $0x30] sm:$0xff]   ;;  %v7965_v10 = vld [vmem:[%s8892_s3 + $0xb8] sm:$0xff]   ;;  %v7971_v11 = vld [vmem:[%s8892_s3 + $0x88] sm:$0xff]   ;;  %v1477_v12 = vlaneseq }
 0x156   :  { %v1140_v16 = vrot.slane %v1139_v13, 4  ;;  %v1153_v17 = vadd.f32 %v1152_v15, %v1151_v14 }
 0x158   :  { %v1141_v18 = vadd.f32 %v1140_v16, %v1139_v13  ;;  %v1154_v19 = vrot.slane %v1153_v17, 4  ;;  %v1478_v13 = vshrl.u32 %v1477_v12, 7 }
 0x15a   :  { %v1142_v20 = vrot.slane %v1141_v18, 2  ;;  %v1155_v21 = vadd.f32 %v1154_v19, %v1153_v17  ;;  %v7974_v14 = vsub.s32 0, %v1478_v13  ;;  %v7199_v13 = vld [vmem:[%s8892_s3 + $0xb0] sm:$0xff]  }
 0x15c   :  { %v1143_v24 = vadd.f32 %v1142_v20, %v1141_v18  ;;  %v1156_v25 = vrot.slane %v1155_v21, 2 }
 0x15e   :  { %v1144_v26 = vrot.slane %v1143_v24, 1  ;;  %v1157_v27 = vadd.f32 %v1156_v25, %v1155_v21 }
 0x160   :  { %v1145_v28 = vadd.f32 %v1144_v26, %v1143_v24  ;;  %v1158_v30 = vrot.slane %v1157_v27, 1 }
 0x162   :  { %6521 = vmatmul.mubr.msk.f32.vlgmr.msra.gmra.mxu1 %vm144_vm0, %v1145_v28  ;;  %v1159_v31 = vadd.f32 %v1158_v30, %v1157_v27 }
 0x163   :  { %6557 = vmatprep.mubr.msk.f32.mxu1 %vm7367_vm4, %v7366_v29  ;;  %6556 = vmatpush3.msra.mxu1 %v7908_v32 }
 0x164   :  { %6548 = vmatmul.mubr.msk.f32.vlgmr.msra.gmra.mxu0 %vm144_vm0, %v1159_v31  ;;  %6560 = vmatprep.subr.bf16.mxu1 %v7180_v59 }
 0x165   :  { %6552 = vmatprep.mubr.msk.f32.mxu0 %vm7367_vm4, %v7366_v29  ;;  %6551 = vmatpush3.msra.mxu0 %v7908_v32 }
 0x166   :  { %6576 = vmatprep.subr.bf16.mxu0 %v7179_v58 }
 0x222   :  { %v1241_v33 = vpop.f32.mrf.mxu1 }
 0x223   :  { %v1318_v34 = vmul.f32 0.0034722222, %v1241_v33 }
 0x224   :  { %v6522_v35 = vpop.f32.mrf.mxu1  ;;  %v1314_v36 = vpop.f32.mrf.mxu0 }
 0x225   :  { %v1320_v37 = vmul.f32 %v1318_v34, %v1318_v34  ;;  %v1319_v38 = vmul.f32 0.0034722222, %v1314_v36 }
 0x226   :  { %v6549_v39 = vpop.f32.mrf.mxu0 }
 0x227   :  { %v1321_v40 = vsub.f32 %v1319_v38, %v1320_v37 }
 0x229   :  { %v1323_v41 = vadd.f32 1e-05, %v1321_v40 }
 0x22b   :  { %7353 = vrsqrt.f32 %v1323_v41 }
 0x238   :  { %v7354_v22 = vpop.eup %7353 }
 0x239   :  { %v1325_v23 = vmul.f32 %v7354_v22, %v1322_v42 }
 0x23b   :  { %6553 = vmatmul.mubr.msk.f32.vlgmr.msra.gmra.mxu0 %vm1330_vm5, %v1325_v23  ;;  %v1327_v56 = vmul.f32 %v1325_v23, %v1318_v34 }
 0x23c   :  { %6577 = vmatpush3.bf16.msra.mxu0 %v7179_v58 }
 0x23d   :  { %v1328_v57 = vsub.f32 %v1326_v55, %v1327_v56  ;;  %6578 = vmatprep.subr.bf16.mxu0 %v7181_v60 }
 0x23f   :  { %6558 = vmatmul.mubr.msk.f32.vlgmr.msra.gmra.mxu1 %vm1330_vm5, %v1328_v57 }
 0x240   :  { %6561 = vmatpush3.bf16.msra.mxu1 %v7180_v59  ;;  %6579 = vmatpush3.bf16.msra.mxu0 %v7181_v60 }
 0x241   :  { %6562 = vmatprep.subr.bf16.mxu1 %v7182_v62  ;;  %6580 = vmatprep.subr.bf16.mxu0 %v7183_v0 }
 0x244   :  { %6563 = vmatpush3.bf16.msra.mxu1 %v7182_v62  ;;  %6581 = vmatpush3.bf16.msra.mxu0 %v7183_v0 }
 0x245   :  { %6564 = vmatprep.subr.bf16.mxu1 %v7184_v2  ;;  %6582 = vmatprep.subr.bf16.mxu0 %v7185_v3 }
 0x248   :  { %6565 = vmatpush3.bf16.msra.mxu1 %v7184_v2  ;;  %6583 = vmatpush3.bf16.msra.mxu0 %v7185_v3 }
 0x249   :  { %6566 = vmatprep.subr.bf16.mxu1 %v7186_v5  ;;  %6584 = vmatprep.subr.bf16.mxu0 %v7187_v6 }
 0x24c   :  { %6567 = vmatpush3.bf16.msra.mxu1 %v7186_v5  ;;  %6585 = vmatpush3.bf16.msra.mxu0 %v7187_v6 }
 0x24d   :  { %6568 = vmatprep.subr.bf16.mxu1 %v7188_v7  ;;  %6586 = vmatprep.subr.bf16.mxu0 %v7189_v8 }
 0x250   :  { %6569 = vmatpush3.bf16.msra.mxu1 %v7188_v7  ;;  %6587 = vmatpush3.bf16.msra.mxu0 %v7189_v8 }
 0x251   :  { %6570 = vmatprep.subr.bf16.mxu1 %v7190_v9  ;;  %6608 = vmatprep.subr.bf16.mxu0 %v7965_v10 }
 0x254   :  { %6571 = vmatpush3.bf16.msra.mxu1 %v7190_v9 }
 0x255   :  { %6592 = vmatprep.subr.bf16.mxu1 %v7971_v11 }
 0x2fb   :  { %v1400_v15 = vpop.f32.mrf.mxu0 }
 0x2fc   :  { %v1480_v16 = vrot.slane %v1400_v15, %v7974_v14 }
 0x2fd   :  { %v6554_v17 = vpop.f32.mrf.mxu0 }
 0x2fe   :  { %v1481_v19 = vmul.f32 %v1480_v16, %v7878_v63  ;;  %v1482_v20 = vmul.f32 %v1480_v16, %v7884_v4  ;;  %v1483_v21 = vmul.f32 %v1480_v16, %v7880_v1 }
 0x2ff   :  { %v1473_v18 = vpop.f32.mrf.mxu1 }
 0x300   :  { %v1487_v24 = vrot.slane %v1473_v18, %v7974_v14 }
 0x301   :  { %v6559_v25 = vpop.f32.mrf.mxu1 }
 0x302   :  { %v1488_v26 = vadd.f32 %v1487_v24, %v1481_v19  ;;  %v1489_v27 = vadd.f32 %v1487_v24, %v1482_v20  ;;  %v1490_v28 = vadd.f32 %v1487_v24, %v1483_v21 }
 0x304   :  { %v1491_v30 = vmax.f32 %v1488_v26, 0.0  ;;  %v1492_v31 = vmax.f32 %v1489_v27, 0.0  ;;  %v1493_v33 = vmax.f32 %v1490_v28, 0.0  ;;  %v7202_v26 = vld [vmem:[%s8892_s3 + $0x80] sm:$0xff]   ;;  %v7203_v28 = vld [vmem:[%s8892_s3 + $0xa8] sm:$0xff]  }
 0x306   :  { %v5984_v34 = vpack.c.bf16 %v1491_v30, %v1491_v30  ;;  %v5985_v35 = vpack.c.bf16 %v1492_v31, %v1492_v31  ;;  %v5986_v36 = vpack.c.bf16 %v1493_v33, %v1493_v33  ;;  %v7204_v30 = vld [vmem:[%s8892_s3 + $0x78] sm:$0xff]   ;;  %v7205_v31 = vld [vmem:[%s8892_s3 + $0xa0] sm:$0xff]  }
 0x307   :  { %v7207_v33 = vld [vmem:[%s8892_s3 + $0x98] sm:$0xff]  }
 0x308   :  { %v1513_v37 = vrot.slane %v5984_v34, 5  ;;  %v1515_v38 = vrot.slane %v5985_v35, 5  ;;  %v1518_v39 = vrot.slane %v5986_v36, 5  ;;  %v7208_v34 = vld [vmem:[%s8892_s3 + $0x68] sm:$0xff]   ;;  %v2105_v35 = vld [vmem:[#allocation2 + $0x10] sm:$0x1] }
 0x30a   :  { %v1514_v41 = vrot.slane %v1513_v37, 4  ;;  %v1517_v42 = vrot.slane %v1515_v38, 4  ;;  %v1520_v22 = vrot.slane %v1518_v39, 4  ;;  %1525 = vst.msk [vmem:[#allocation2] sm:$0x8] %vm1496_vm7, %v1513_v37 }
 0x30c   :  { %v1516_v23 = vsel %vm7981_vm12, %v1514_v41, %v1515_v38  ;;  %v1519_v55 = vsel %vm7981_vm12, %v1517_v42, %v1518_v39  ;;  %1529 = vst.msk [vmem:[#allocation2 + $0xc] sm:$0x7] %vm1494_vm6, %v1520_v22  ;;  %v7209_v39 = vld [vmem:[%s8892_s3 + $0x90] sm:$0xff]   ;;  %v7210_v22 = vld [vmem:[%s8892_s3 + $0x60] sm:$0xff]  }
 0x30d   :  { %1527 = vst.msk [vmem:[#allocation2 + $0x4] sm:$0xf] %vm1526_vm13, %v1516_v23  ;;  %1528 = vst.msk [vmem:[#allocation2 + $0x8] sm:$0xf] %vm1526_vm13, %v1519_v55  ;;  %v7211_v23 = vld [vmem:[%s8892_s3 + $0x118] sm:$0xff]  }
 0x311   :  { %v1530_v56 = vld [vmem:[#allocation2] sm:$0xf] }
 0x312   :  { %v1545_v0 = vld [vmem:[#allocation2] sm:$0xe] }
 0x313   :  { %v1546_v57 = vld [vmem:[#allocation2 + $0xc] sm:$0x1]  ;;  %v1874_v7 = vld [vmem:[#allocation2] sm:$0x8] }
 0x314   :  { %v1875_v58 = vld [vmem:[#allocation2 + $0xc] sm:$0x7]  ;;  %v7993_v60 = vld [vmem:[#allocation2 + $0x4] sm:$0xf]  ;;  %v7995_v62 = vld [vmem:[#allocation2 + $0x8] sm:$0xf] }
 0x315   :  { %v1758_v59 = vld [vmem:[#allocation2 + $0xc] sm:$0x3]  ;;  %v5541_v2 = vcombine.low %v1530_v56, %v7993_v60  ;;  %v5542_v3 = vcombine.low %v7995_v62, %v7995_v62  ;;  %v5531_v5 = vcombine.low %v1545_v0, %v7993_v60  ;;  %v5532_v6 = vcombine.low %v7995_v62, %v1546_v57  ;;  %v1757_v8 = vld [vmem:[#allocation2] sm:$0xc]  ;;  %v2102_v36 = vld [vmem:[#allocation2 + $0x4] sm:$0xe] }
 0x316   :  { %v5585_v9 = vcombine.low %v1874_v7, %v7993_v60  ;;  %v5586_v12 = vcombine.low %v7995_v62, %v1875_v58  ;;  %v5563_v15 = vcombine.low %v1757_v8, %v7993_v60  ;;  %v5564_v16 = vcombine.low %v7995_v62, %v1758_v59  ;;  %v8041_v37 = vld [vmem:[#allocation2 + $0x8] sm:$0xf]  ;;  %v8043_v38 = vld [vmem:[#allocation2 + $0xc] sm:$0xf]  ;;  %v7216_v58 = vld [vmem:[%s8892_s3 + $0x110] sm:$0xff]  }
 0x317   :  { %6588 = vmatprep.mubr.msk.bf16.mxu0 %vm144_vm0, %v5541_v2  ;;  %v1570_v17 = vrot.slane %v5531_v5, 1  ;;  %v1571_v18 = vrot.slane %v5532_v6, 1  ;;  %v5629_v41 = vcombine.low %v2102_v36, %v8041_v37  ;;  %v5630_v42 = vcombine.low %v8043_v38, %v2105_v35  ;;  %v7214_v57 = vld [vmem:[%s8892_s3 + $0xe8] sm:$0xff]   ;;  %v7217_v0 = vld [vmem:[%s8892_s3 + $0xe0] sm:$0xff]   ;;  %v7219_v5 = vld [vmem:[%s8892_s3 + $0xd8] sm:$0xff]  }
 0x318   :  { %6589 = vmatmul.mubr.msk.bf16.vlgmr.msra.gmra.mxu0 %vm144_vm0, %v5542_v3  ;;  %v1895_v19 = vrot.slane %v5585_v9, 3  ;;  %v1896_v20 = vrot.slane %v5586_v12, 3  ;;  %v1778_v21 = vrot.slane %v5563_v15, 2  ;;  %v1779_v24 = vrot.slane %v5564_v16, 2  ;;  %v7218_v3 = vld [vmem:[%s8892_s3 + $0x108] sm:$0xff]   ;;  %v7222_v6 = vld [vmem:[%s8892_s3 + $0xf8] sm:$0xff]  }
 0x319   :  { %6609 = vmatpush3.bf16.msra.mxu0 %v7965_v10  ;;  %v1572_v25 = vsel %vm324_vm1, %v1570_v17, %v1571_v18  ;;  %v2129_v55 = vrot.slane %v5629_v41, 1  ;;  %v2130_v56 = vrot.slane %v5630_v42, 1  ;;  %v5607_v2 = vcombine.low %v7993_v60, %v7995_v62  ;;  %v7220_v60 = vld [vmem:[%s8892_s3 + $0x100] sm:$0xff]   ;;  %v7221_v62 = vld [vmem:[%s8892_s3 + $0xd0] sm:$0xff]   ;;  %v7223_v7 = vld [vmem:[%s8892_s3 + $0xc8] sm:$0xff]  }
 0x31a   :  { %6572 = vmatprep.mubr.msk.bf16.mxu1 %vm144_vm0, %v1572_v25  ;;  %v1897_v27 = vsel %vm800_vm3, %v1895_v19, %v1896_v20  ;;  %6610 = vmatprep.subr.bf16.mxu0 %v7199_v13  ;;  %v1780_v10 = vsel %vm565_vm2, %v1778_v21, %v1779_v24  ;;  %v7224_v8 = vld [vmem:[%s8892_s3 + $0xf0] sm:$0xff]   ;;  %v2225_v9 = vld [vmem:[#allocation2 + $0x4] sm:$0xc]  ;;  %v7227_v17 = vld [vmem:[%s8892_s3 + $0x148] sm:$0xff]  }
 0x31b   :  { %6620 = vmatprep.mubr.msk.bf16.mxu0 %vm144_vm0, %v1897_v27  ;;  %6573 = vmatmul.mubr.msk.bf16.vlgmr.msra.gmra.mxu1 %vm144_vm0, %v1571_v18  ;;  %v2131_v59 = vsel %vm324_vm1, %v2129_v55, %v2130_v56  ;;  %v2226_v12 = vld [vmem:[#allocation2 + $0x10] sm:$0x3]  ;;  %v5651_v15 = vcombine.low %v2225_v9, %v8041_v37  ;;  %v7230_v21 = vld [vmem:[%s8892_s3 + $0x140] sm:$0xff]   ;;  %v7231_v25 = vld [vmem:[%s8892_s3 + $0x138] sm:$0xff]  }
 0x31c   :  { %6593 = vmatpush3.bf16.msra.mxu1 %v7971_v11  ;;  %6604 = vmatprep.mubr.msk.bf16.mxu1 %vm144_vm0, %v1780_v10  ;;  %v7206_v11 = vld [vmem:[%s8892_s3 + $0x70] sm:$0xff]   ;;  %v5652_v16 = vcombine.low %v8043_v38, %v2226_v12  ;;  %v7364_v27 = vld [vmem:[%s8920_s13 + $0x40] sm:$0xff] }
 0x31d   :  { %6611 = vmatpush3.bf16.msra.mxu0 %v7199_v13  ;;  %6594 = vmatprep.subr.bf16.mxu1 %v7202_v26  ;;  %v7225_v13 = vld [vmem:[%s8892_s3 + $0xc0] sm:$0xff]   ;;  %v2246_v18 = vrot.slane %v5651_v15, 2 }
 0x31e   :  { %6612 = vmatprep.subr.bf16.mxu0 %v7203_v28  ;;  %v2247_v19 = vrot.slane %v5652_v16, 2 }
 0x320   :  { %6595 = vmatpush3.bf16.msra.mxu1 %v7202_v26  ;;  %v7363_v26 = vld [vmem:[%s8920_s13 + $0x48] sm:$0xff] }
 0x321   :  { %6613 = vmatpush3.bf16.msra.mxu0 %v7203_v28  ;;  %6596 = vmatprep.subr.bf16.mxu1 %v7204_v30  ;;  %v7365_v28 = vld [vmem:[%s8920_s13 + $0x38] sm:$0xff] }
 0x322   :  { %6614 = vmatprep.subr.bf16.mxu0 %v7205_v31 }
 0x324   :  { %6597 = vmatpush3.bf16.msra.mxu1 %v7204_v30 }
 0x325   :  { %6615 = vmatpush3.bf16.msra.mxu0 %v7205_v31  ;;  %6598 = vmatprep.subr.bf16.mxu1 %v7206_v11 }
 0x326   :  { %6616 = vmatprep.subr.bf16.mxu0 %v7207_v33 }
 0x328   :  { %6599 = vmatpush3.bf16.msra.mxu1 %v7206_v11 }
 0x329   :  { %6617 = vmatpush3.bf16.msra.mxu0 %v7207_v33  ;;  %6600 = vmatprep.subr.bf16.mxu1 %v7208_v34 }
 0x32a   :  { %6618 = vmatprep.subr.bf16.mxu0 %v7209_v39 }
 0x32c   :  { %6601 = vmatpush3.bf16.msra.mxu1 %v7208_v34 }
 0x32d   :  { %6619 = vmatpush3.bf16.msra.mxu0 %v7209_v39  ;;  %6602 = vmatprep.subr.bf16.mxu1 %v7210_v22 }
 0x32e   :  { %6640 = vmatprep.subr.bf16.mxu0 %v7211_v23 }
 0x330   :  { %6603 = vmatpush3.bf16.msra.mxu1 %v7210_v22  ;;  %6621 = vmatmul.mubr.msk.bf16.vlgmr.msra.gmra.mxu0 %vm144_vm0, %v1896_v20  ;;  %v7226_v20 = vld [vmem:[#allocation2 + $0xc] ss:$0 sps:$4 sm:$0xff]  }
 0x331   :  { %6641 = vmatpush3.bf16.msra.mxu0 %v7211_v23  ;;  %6652 = vmatprep.mubr.msk.bf16.mxu0 %vm144_vm0, %v2131_v59 }
 0x332   :  { %6624 = vmatprep.subr.bf16.mxu1 %v7214_v57  ;;  %6642 = vmatprep.subr.bf16.mxu0 %v7216_v58 }
 0x333   :  { %6605 = vmatmul.mubr.msk.bf16.vlgmr.msra.gmra.mxu1 %vm144_vm0, %v1779_v24  ;;  %v2248_v24 = vsel %vm565_vm2, %v2246_v18, %v2247_v19  ;;  %v5661_v18 = vld [vmem:[%s8893_s4] ss:$0 sm:$0xff] }
 0x334   :  { %6625 = vmatpush3.bf16.msra.mxu1 %v7214_v57  ;;  %6636 = vmatprep.mubr.msk.bf16.mxu1 %vm144_vm0, %v5607_v2 }
 0x335   :  { %6643 = vmatpush3.bf16.msra.mxu0 %v7216_v58  ;;  %6626 = vmatprep.subr.bf16.mxu1 %v7217_v0 }
 0x336   :  { %6644 = vmatprep.subr.bf16.mxu0 %v7218_v3 }
 0x338   :  { %6627 = vmatpush3.bf16.msra.mxu1 %v7217_v0 }
 0x339   :  { %6645 = vmatpush3.bf16.msra.mxu0 %v7218_v3  ;;  %6628 = vmatprep.subr.bf16.mxu1 %v7219_v5 }
 0x33a   :  { %6646 = vmatprep.subr.bf16.mxu0 %v7220_v60 }
 0x33c   :  { %6629 = vmatpush3.bf16.msra.mxu1 %v7219_v5 }
 0x33d   :  { %6647 = vmatpush3.bf16.msra.mxu0 %v7220_v60  ;;  %6630 = vmatprep.subr.bf16.mxu1 %v7221_v62 }
 0x33e   :  { %6648 = vmatprep.subr.bf16.mxu0 %v7222_v6 }
 0x340   :  { %6631 = vmatpush3.bf16.msra.mxu1 %v7221_v62 }
 0x341   :  { %6649 = vmatpush3.bf16.msra.mxu0 %v7222_v6  ;;  %6632 = vmatprep.subr.bf16.mxu1 %v7223_v7 }
 0x342   :  { %6650 = vmatprep.subr.bf16.mxu0 %v7224_v8 }
 0x344   :  { %6633 = vmatpush3.bf16.msra.mxu1 %v7223_v7 }
 0x345   :  { %6651 = vmatpush3.bf16.msra.mxu0 %v7224_v8  ;;  %6634 = vmatprep.subr.bf16.mxu1 %v7225_v13 }
 0x346   :  { %6672 = vmatprep.subr.mxu0 %v7366_v29 }
 0x348   :  { %6635 = vmatpush3.bf16.msra.mxu1 %v7225_v13  ;;  %6653 = vmatmul.mubr.msk.bf16.vlgmr.msra.gmra.mxu0 %vm144_vm0, %v2130_v56 }
 0x349   :  { %6656 = vmatprep.subr.bf16.mxu1 %v7227_v17  ;;  %6673 = vmatpush3.msra.mxu0 %v7765_v43  ;;  %v7232_v43 = vld [vmem:[%s8892_s3 + $0x130] sm:$0xff]  }
 0x34a   :  { %6674 = vmatprep.subr.mxu0 %v7366_v29  ;;  %6696 = vmatprep.mubr.msk.f32.mxu0 %vm7367_vm4, %v7366_v29 }
 0x34b   :  { %6637 = vmatmul.mubr.msk.bf16.vlgmr.msra.gmra.mxu1 %vm144_vm0, %v7226_v20  ;;  %6675 = vmatpush3.msra.mxu0 %v7774_v44  ;;  %v7233_v44 = vld [vmem:[%s8892_s3 + $0x128] sm:$0xff]  }
 0x34c   :  { %6657 = vmatpush3.bf16.msra.mxu1 %v7227_v17  ;;  %6668 = vmatprep.mubr.msk.bf16.mxu1 %vm144_vm0, %v2248_v24 }
 0x34d   :  { %6658 = vmatprep.subr.bf16.mxu1 %v7230_v21  ;;  %6676 = vmatprep.subr.mxu0 %v7366_v29 }
 0x34e   :  { %6677 = vmatpush3.msra.mxu0 %v7783_v45  ;;  %v7234_v45 = vld [vmem:[%s8892_s3 + $0x120] sm:$0xff]  }
 0x34f   :  { %6678 = vmatprep.subr.mxu0 %v7366_v29 }
 0x350   :  { %6659 = vmatpush3.bf16.msra.mxu1 %v7230_v21  ;;  %6679 = vmatpush3.msra.mxu0 %v7792_v46  ;;  %v7361_v46 = vld [vmem:[%s8920_s13 + $0x58] sm:$0xff] }
 0x351   :  { %6660 = vmatprep.subr.bf16.mxu1 %v7231_v25  ;;  %6680 = vmatprep.subr.mxu0 %v7366_v29 }
 0x352   :  { %6681 = vmatpush3.msra.mxu0 %v7801_v47  ;;  %v7362_v47 = vld [vmem:[%s8920_s13 + $0x50] sm:$0xff] }
 0x353   :  { %6682 = vmatprep.subr.mxu0 %v7366_v29 }
 0x354   :  { %6661 = vmatpush3.bf16.msra.mxu1 %v7231_v25  ;;  %6683 = vmatpush3.msra.mxu0 %v7810_v48 }
 0x355   :  { %6662 = vmatprep.subr.bf16.mxu1 %v7232_v43  ;;  %6684 = vmatprep.subr.mxu0 %v7366_v29 }
 0x356   :  { %6685 = vmatpush3.msra.mxu0 %v7819_v49 }
 0x357   :  { %6686 = vmatprep.subr.mxu0 %v7366_v29 }
 0x358   :  { %6663 = vmatpush3.bf16.msra.mxu1 %v7232_v43  ;;  %6687 = vmatpush3.msra.mxu0 %v7826_v50 }
 0x359   :  { %6664 = vmatprep.subr.bf16.mxu1 %v7233_v44  ;;  %6688 = vmatprep.subr.mxu0 %v7366_v29 }
 0x35a   :  { %6689 = vmatpush3.msra.mxu0 %v7834_v51 }
 0x35b   :  { %6690 = vmatprep.subr.mxu0 %v7366_v29 }
 0x35c   :  { %6665 = vmatpush3.bf16.msra.mxu1 %v7233_v44  ;;  %6691 = vmatpush3.msra.mxu0 %v7843_v52 }
 0x35d   :  { %6666 = vmatprep.subr.bf16.mxu1 %v7234_v45  ;;  %6692 = vmatprep.subr.mxu0 %v7366_v29 }
 0x35e   :  { %6693 = vmatpush3.msra.mxu0 %v7852_v53 }
 0x35f   :  { %6694 = vmatprep.subr.mxu0 %v7366_v29 }
 0x360   :  { %6667 = vmatpush3.bf16.msra.mxu1 %v7234_v45  ;;  %6695 = vmatpush3.msra.mxu0 %v7861_v54 }
 0x361   :  { %6699 = vmatprep.subr.mxu1 %v7366_v29  ;;  %6726 = vmatprep.subr.mxu0 %v7366_v29 }
 0x363   :  { %6669 = vmatmul.mubr.msk.bf16.vlgmr.msra.gmra.mxu1 %vm144_vm0, %v2247_v19 }
 0x364   :  { %6700 = vmatpush3.msra.mxu1 %v7361_v46  ;;  %6723 = vmatprep.mubr.msk.f32.mxu1 %vm7367_vm4, %v7366_v29 }
 0x365   :  { %6701 = vmatprep.subr.mxu1 %v7366_v29 }
 0x366   :  { %6702 = vmatpush3.msra.mxu1 %v7362_v47 }
 0x367   :  { %6703 = vmatprep.subr.mxu1 %v7366_v29 }
 0x368   :  { %6704 = vmatpush3.msra.mxu1 %v7363_v26 }
 0x369   :  { %6705 = vmatprep.subr.mxu1 %v7366_v29 }
 0x36a   :  { %6706 = vmatpush3.msra.mxu1 %v7364_v27 }
 0x36b   :  { %6707 = vmatprep.subr.mxu1 %v7366_v29 }
 0x36c   :  { %6708 = vmatpush3.msra.mxu1 %v7365_v28 }
 0x36d   :  { %6709 = vmatprep.subr.mxu1 %v7366_v29 }
 0x36e   :  { %6710 = vmatpush3.msra.mxu1 %v7810_v48 }
 0x36f   :  { %6711 = vmatprep.subr.mxu1 %v7366_v29 }
 0x370   :  { %6712 = vmatpush3.msra.mxu1 %v7819_v49 }
 0x371   :  { %6713 = vmatprep.subr.mxu1 %v7366_v29 }
 0x372   :  { %6714 = vmatpush3.msra.mxu1 %v7826_v50 }
 0x373   :  { %6715 = vmatprep.subr.mxu1 %v7366_v29 }
 0x374   :  { %6716 = vmatpush3.msra.mxu1 %v7834_v51 }
 0x375   :  { %6717 = vmatprep.subr.mxu1 %v7366_v29 }
 0x376   :  { %6718 = vmatpush3.msra.mxu1 %v7843_v52 }
 0x377   :  { %6719 = vmatprep.subr.mxu1 %v7366_v29 }
 0x378   :  { %6720 = vmatpush3.msra.mxu1 %v7852_v53 }
 0x379   :  { %6721 = vmatprep.subr.mxu1 %v7366_v29 }
 0x37a   :  { %6722 = vmatpush3.msra.mxu1 %v7861_v54 }
 0x3d8   :  { %v6590_v48 = vpop.f32.mrf.mxu0 }
 0x3da   :  { %v1743_v49 = vpop.f32.mrf.mxu0 }
 0x3db   :  { %v6574_v10 = vpop.f32.mrf.mxu1 }
 0x3dc   :  { %v1752_v50 = vadd.f32 %v6590_v48, %v6574_v10  ;;  %v6591_v30 = vpop.f32.mrf.mxu0 }
 0x3dd   :  { %v1649_v31 = vpop.f32.mrf.mxu1 }
 0x3de   :  { %v1744_v11 = vadd.f32 %v1743_v49, %v1649_v31  ;;  %v1746_v33 = vpop.f32.mrf.mxu0 }
 0x3df   :  { %v6575_v51 = vpop.f32.mrf.mxu1 }
 0x3e1   :  { %v1652_v35 = vpop.f32.mrf.mxu1 }
 0x3e2   :  { %v1747_v59 = vadd.f32 %v1746_v33, %v1652_v35 }
 0x3f0   :  { %v6622_v34 = vpop.f32.mrf.mxu0 }
 0x3f2   :  { %v1974_v52 = vpop.f32.mrf.mxu0 }
 0x3f3   :  { %v6606_v36 = vpop.f32.mrf.mxu1 }
 0x3f4   :  { %v6623_v37 = vpop.f32.mrf.mxu0  ;;  %v1873_v57 = vadd.f32 %v6606_v36, %v1752_v50 }
 0x3f5   :  { %v1857_v38 = vpop.f32.mrf.mxu1 }
 0x3f6   :  { %v1977_v39 = vpop.f32.mrf.mxu0  ;;  %v1871_v58 = vadd.f32 %v1857_v38, %v1744_v11  ;;  %v1990_v2 = vadd.f32 %v6622_v34, %v1873_v57 }
 0x3f7   :  { %v6607_v53 = vpop.f32.mrf.mxu1 }
 0x3f8   :  { %v1988_v3 = vadd.f32 %v1974_v52, %v1871_v58 }
 0x3f9   :  { %v1860_v42 = vpop.f32.mrf.mxu1 }
 0x3fa   :  { %v1872_v0 = vadd.f32 %v1860_v42, %v1747_v59 }
 0x3fc   :  { %v1989_v6 = vadd.f32 %v1977_v39, %v1872_v0 }
 0x408   :  { %v6654_v41 = vpop.f32.mrf.mxu0 }
 0x40a   :  { %v2208_v54 = vpop.f32.mrf.mxu0 }
 0x40b   :  { %v6638_v22 = vpop.f32.mrf.mxu1 }
 0x40c   :  { %v6655_v23 = vpop.f32.mrf.mxu0  ;;  %v2101_v5 = vadd.f32 %v6638_v22, %v1990_v2  ;;  %v2539_v2 = vld [vmem:[%s8894_s14] sm:$0x1] }
 0x40d   :  { %v2085_v55 = vpop.f32.mrf.mxu1 }
 0x40e   :  { %v2099_v60 = vadd.f32 %v2085_v55, %v1988_v3  ;;  %v2224_v9 = vadd.f32 %v6654_v41, %v2101_v5  ;;  %v2211_v17 = vpop.f32.mrf.mxu0 }
 0x40f   :  { %v6639_v56 = vpop.f32.mrf.mxu1 }
 0x410   :  { %v2222_v12 = vadd.f32 %v2208_v54, %v2099_v60  ;;  %v2543_v60 = vld [vmem:[%s8894_s14 + $0x1] sm:$0x1] }
 0x411   :  { %v2088_v62 = vpop.f32.mrf.mxu1 }
 0x412   :  { %v2100_v8 = vadd.f32 %v2088_v62, %v1989_v6 }
 0x414   :  { %v2223_v21 = vadd.f32 %v2211_v17, %v2100_v8  ;;  %v7236_v8 = vld [vmem:[%s8895_s5 + $0x58] sm:$0xff]   ;;  %v7243_v17 = vld [vmem:[%s8895_s5 + $0x8] sm:$0xff]  }
 0x423   :  { %v6670_v7 = vpop.f32.mrf.mxu1 }
 0x424   :  { %v2341_v15 = vadd.f32 %v6670_v7, %v2224_v9  ;;  %v7235_v7 = vld [vmem:[%s8895_s5 + $0x28] sm:$0xff]   ;;  %v7238_v9 = vld [vmem:[%s8895_s5 + $0x50] sm:$0xff]  }
 0x425   :  { %v2325_v13 = vpop.f32.mrf.mxu1  ;;  %6752 = vmatprep.subr.bf16.mxu1 %v7235_v7 }
 0x426   :  { %v2339_v16 = vadd.f32 %v2325_v13, %v2222_v12  ;;  %v8189_v25 = vadd.f32 %v5661_v18, %v2341_v15  ;;  %v7239_v12 = vld [vmem:[%s8895_s5 + $0x18] sm:$0xff]   ;;  %v7240_v13 = vld [vmem:[%s8895_s5 + $0x48] sm:$0xff]   ;;  %v7241_v15 = vld [vmem:[%s8895_s5 + $0x10] sm:$0xff]  }
 0x427   :  { %v6671_v19 = vpop.f32.mrf.mxu1 }
 0x428   :  { %v8187_v20 = vadd.f32 %v5661_v18, %v2339_v16  ;;  %v2365_v46 = vmul.f32 %v8189_v25, %v8189_v25  ;;  %v2355_v48 = vsel %vm144_vm0, %v8189_v25, 0.0  ;;  %v7242_v16 = vld [vmem:[%s8895_s5 + $0x40] sm:$0xff]  }
 0x429   :  { %v2328_v24 = vpop.f32.mrf.mxu1  ;;  %v7245_v19 = vld [vmem:[%s8895_s5] sm:$0xff]  }
 0x42a   :  { %v2340_v43 = vadd.f32 %v2328_v24, %v2223_v21  ;;  %v2363_v44 = vmul.f32 %v8187_v20, %v8187_v20  ;;  %v2352_v47 = vsel %vm144_vm0, %v8187_v20, 0.0  ;;  %v2369_v31 = vsel %vm144_vm0, %v2365_v46, 0.0  ;;  %v7246_v21 = vld [vmem:[%s8895_s5 + $0x30] sm:$0xff]   ;;  %v8264_v24 = vld [vmem:[%s8895_s5 + $0xb8] sm:$0xff]  }
 0x42c   :  { %v8193_v45 = vadd.f32 %v5661_v18, %v2340_v43  ;;  %v2366_v49 = vsel %vm144_vm0, %v2363_v44, 0.0  ;;  %v7244_v18 = vld [vmem:[%s8895_s5 + $0x38] sm:$0xff]   ;;  %v8269_v43 = vld [vmem:[%s8895_s5 + $0x88] sm:$0xff]  }
 0x42e   :  { %v2353_v26 = vsel %vm144_vm0, %v8193_v45, 0.0  ;;  %v2364_v27 = vmul.f32 %v8193_v45, %v8193_v45 }
 0x42f   :  { %v2354_v28 = vadd.f32 %v2353_v26, %v2352_v47 }
 0x430   :  { %v2367_v10 = vsel %vm144_vm0, %v2364_v27, 0.0 }
 0x431   :  { %v2356_v50 = vadd.f32 %v2355_v48, %v2354_v28  ;;  %v2368_v30 = vadd.f32 %v2367_v10, %v2366_v49 }
 0x433   :  { %v2357_v11 = vrot.slane %v2356_v50, 4  ;;  %v2370_v51 = vadd.f32 %v2369_v31, %v2368_v30 }
 0x435   :  { %v2358_v33 = vadd.f32 %v2357_v11, %v2356_v50  ;;  %v2371_v34 = vrot.slane %v2370_v51, 4 }
 0x437   :  { %v2359_v35 = vrot.slane %v2358_v33, 2  ;;  %v2372_v52 = vadd.f32 %v2371_v34, %v2370_v51 }
 0x439   :  { %v2360_v36 = vadd.f32 %v2359_v35, %v2358_v33  ;;  %v2373_v37 = vrot.slane %v2372_v52, 2 }
 0x43b   :  { %v2361_v38 = vrot.slane %v2360_v36, 1  ;;  %v2374_v53 = vadd.f32 %v2373_v37, %v2372_v52 }
 0x43d   :  { %v2362_v39 = vadd.f32 %v2361_v38, %v2360_v36  ;;  %v2375_v41 = vrot.slane %v2374_v53, 1 }
 0x43f   :  { %6697 = vmatmul.mubr.msk.f32.vlgmr.msra.gmra.mxu0 %vm144_vm0, %v2362_v39  ;;  %v2376_v42 = vadd.f32 %v2375_v41, %v2374_v53 }
 0x440   :  { %6727 = vmatpush3.msra.mxu0 %v7908_v32  ;;  %6728 = vmatprep.mubr.msk.f32.mxu0 %vm7367_vm4, %v7366_v29 }
 0x441   :  { %6724 = vmatmul.mubr.msk.f32.vlgmr.msra.gmra.mxu1 %vm144_vm0, %v2376_v42  ;;  %6731 = vmatprep.subr.mxu0 %v7366_v29 }
 0x442   :  { %6753 = vmatpush3.bf16.msra.mxu1 %v7235_v7 }
 0x4ff   :  { %v2458_v54 = vpop.f32.mrf.mxu0 }
 0x500   :  { %v2535_v22 = vmul.f32 0.0034722222, %v2458_v54 }
 0x501   :  { %v6698_v23 = vpop.f32.mrf.mxu0  ;;  %v2531_v55 = vpop.f32.mrf.mxu1 }
 0x502   :  { %v2537_v56 = vmul.f32 %v2535_v22, %v2535_v22  ;;  %v2536_v57 = vmul.f32 0.0034722222, %v2531_v55 }
 0x503   :  { %v6725_v58 = vpop.f32.mrf.mxu1 }
 0x504   :  { %v2538_v59 = vsub.f32 %v2536_v57, %v2537_v56 }
 0x506   :  { %v2540_v0 = vadd.f32 1e-05, %v2538_v59 }
 0x508   :  { %7355 = vrsqrt.f32 %v2540_v0 }
 0x515   :  { %v7356_v3 = vpop.eup %7355 }
 0x516   :  { %v2542_v5 = vmul.f32 %v7356_v3, %v2539_v2 }
 0x518   :  { %6729 = vmatmul.mubr.msk.f32.vlgmr.msra.gmra.mxu0 %vm1330_vm5, %v2542_v5  ;;  %v2544_v62 = vmul.f32 %v2542_v5, %v2535_v22 }
 0x519   :  { %6732 = vmatpush3.msra.mxu0 %v7908_v32  ;;  %6733 = vmatprep.mubr.msk.f32.mxu0 %vm7367_vm4, %v7366_v29  ;;  %v7237_v32 = vld [vmem:[%s8895_s5 + $0x20] sm:$0xff]  }
 0x51a   :  { %v2545_v6 = vsub.f32 %v2543_v60, %v2544_v62  ;;  %6736 = vmatprep.subr.bf16.mxu0 %v7236_v8  ;;  %6754 = vmatprep.subr.bf16.mxu1 %v7237_v32  ;;  %v7255_v60 = vld [vmem:[%s8895_s5 + $0xb0] sm:$0xff]  }
 0x51b   :  { %6755 = vmatpush3.bf16.msra.mxu1 %v7237_v32 }
 0x51c   :  { %6734 = vmatmul.mubr.msk.f32.vlgmr.msra.gmra.mxu0 %vm1330_vm5, %v2545_v6  ;;  %6756 = vmatprep.subr.bf16.mxu1 %v7239_v12  ;;  %vm4461_vm5 = vcmask 519169  }
 0x51d   :  { %6737 = vmatpush3.bf16.msra.mxu0 %v7236_v8 }
 0x51e   :  { %6738 = vmatprep.subr.bf16.mxu0 %v7238_v9 }
 0x51f   :  { %6757 = vmatpush3.bf16.msra.mxu1 %v7239_v12 }
 0x520   :  { %6758 = vmatprep.subr.bf16.mxu1 %v7241_v15 }
 0x521   :  { %6739 = vmatpush3.bf16.msra.mxu0 %v7238_v9 }
 0x522   :  { %6740 = vmatprep.subr.bf16.mxu0 %v7240_v13 }
 0x523   :  { %6759 = vmatpush3.bf16.msra.mxu1 %v7241_v15 }
 0x524   :  { %6760 = vmatprep.subr.bf16.mxu1 %v7243_v17 }
 0x525   :  { %6741 = vmatpush3.bf16.msra.mxu0 %v7240_v13 }
 0x526   :  { %6742 = vmatprep.subr.bf16.mxu0 %v7242_v16 }
 0x527   :  { %6761 = vmatpush3.bf16.msra.mxu1 %v7243_v17 }
 0x528   :  { %6762 = vmatprep.subr.bf16.mxu1 %v7245_v19 }
 0x529   :  { %6743 = vmatpush3.bf16.msra.mxu0 %v7242_v16  ;;  %v7258_v16 = vld [vmem:[%s8895_s5 + $0x80] sm:$0xff]  }
 0x52a   :  { %6744 = vmatprep.subr.bf16.mxu0 %v7244_v18 }
 0x52b   :  { %6763 = vmatpush3.bf16.msra.mxu1 %v7245_v19 }
 0x52c   :  { %6784 = vmatprep.subr.bf16.mxu1 %v8264_v24 }
 0x52d   :  { %6745 = vmatpush3.bf16.msra.mxu0 %v7244_v18  ;;  %v7259_v18 = vld [vmem:[%s8895_s5 + $0xa8] sm:$0xff]  }
 0x52e   :  { %6746 = vmatprep.subr.bf16.mxu0 %v7246_v21 }
 0x531   :  { %6747 = vmatpush3.bf16.msra.mxu0 %v7246_v21  ;;  %v7260_v21 = vld [vmem:[%s8895_s5 + $0x78] sm:$0xff]  }
 0x532   :  { %6768 = vmatprep.subr.bf16.mxu0 %v8269_v43 }
 0x5d8   :  { %v2616_v44 = vpop.f32.mrf.mxu0 }
 0x5d9   :  { %v2696_v46 = vrot.slane %v2616_v44, %v7974_v14  ;;  %v7263_v44 = vld [vmem:[%s8895_s5 + $0x98] sm:$0xff]  }
 0x5da   :  { %v6730_v47 = vpop.f32.mrf.mxu0 }
 0x5db   :  { %v2697_v27 = vmul.f32 %v2696_v46, %v8187_v20  ;;  %v2698_v28 = vmul.f32 %v2696_v46, %v8193_v45  ;;  %v2699_v48 = vmul.f32 %v2696_v46, %v8189_v25  ;;  %v7264_v46 = vld [vmem:[%s8895_s5 + $0x68] sm:$0xff]   ;;  %v3314_v47 = vld [vmem:[#allocation2 + $0x10] sm:$0x1] }
 0x5dc   :  { %v2689_v26 = vpop.f32.mrf.mxu0 }
 0x5dd   :  { %v2703_v49 = vrot.slane %v2689_v26, %v7974_v14 }
 0x5de   :  { %v6735_v10 = vpop.f32.mrf.mxu0 }
 0x5df   :  { %v2704_v50 = vadd.f32 %v2703_v49, %v2697_v27  ;;  %v2705_v30 = vadd.f32 %v2703_v49, %v2698_v28  ;;  %v2706_v31 = vadd.f32 %v2703_v49, %v2699_v48  ;;  %v7265_v48 = vld [vmem:[%s8895_s5 + $0x90] sm:$0xff]  }
 0x5e1   :  { %v2707_v11 = vmax.f32 %v2704_v50, 0.0  ;;  %v2708_v51 = vmax.f32 %v2705_v30, 0.0  ;;  %v2709_v33 = vmax.f32 %v2706_v31, 0.0  ;;  %v7266_v50 = vld [vmem:[%s8895_s5 + $0x60] sm:$0xff]   ;;  %v7267_v30 = vld [vmem:[%s8895_s5 + $0x118] sm:$0xff]  }
 0x5e3   :  { %v2710_v34 = vadd.f32 %v2707_v11, %v7878_v63  ;;  %v2711_v35 = vadd.f32 %v2708_v51, %v7884_v4  ;;  %v2712_v52 = vadd.f32 %v2709_v33, %v7880_v1  ;;  %v7270_v51 = vld [vmem:[%s8895_s5 + $0xe8] sm:$0xff]   ;;  %v7272_v33 = vld [vmem:[%s8895_s5 + $0x110] sm:$0xff]  }
 0x5e5   :  { %v5987_v20 = vpack.c.bf16 %v2710_v34, %v2710_v34  ;;  %v5988_v36 = vpack.c.bf16 %v2711_v35, %v2711_v35  ;;  %v5989_v45 = vpack.c.bf16 %v2712_v52, %v2712_v52  ;;  %v7273_v35 = vld [vmem:[%s8895_s5 + $0xe0] sm:$0xff]  }
 0x5e7   :  { %v2723_v37 = vrot.slane %v5987_v20, 5  ;;  %v2725_v25 = vrot.slane %v5988_v36, 5  ;;  %v2728_v38 = vrot.slane %v5989_v45, 5  ;;  %v7274_v20 = vld [vmem:[%s8895_s5 + $0x108] sm:$0xff]   ;;  %v7275_v36 = vld [vmem:[%s8895_s5 + $0xd8] sm:$0xff]   ;;  %v7276_v45 = vld [vmem:[%s8895_s5 + $0x100] sm:$0xff]  }
 0x5e9   :  { %v2724_v53 = vrot.slane %v2723_v37, 4  ;;  %v2727_v39 = vrot.slane %v2725_v25, 4  ;;  %v2730_v41 = vrot.slane %v2728_v38, 4  ;;  %2735 = vst.msk [vmem:[#allocation2] sm:$0x8] %vm1496_vm7, %v2723_v37  ;;  %v7277_v37 = vld [vmem:[%s8895_s5 + $0xd0] sm:$0xff]  }
 0x5eb   :  { %v2726_v42 = vsel %vm7981_vm12, %v2724_v53, %v2725_v25  ;;  %v2729_v63 = vsel %vm7981_vm12, %v2727_v39, %v2728_v38  ;;  %2738 = vst.msk [vmem:[#allocation2 + $0xc] sm:$0x7] %vm1494_vm6, %v2730_v41  ;;  %v7278_v25 = vld [vmem:[%s8895_s5 + $0xf8] sm:$0xff]   ;;  %v7279_v38 = vld [vmem:[%s8895_s5 + $0xc8] sm:$0xff]   ;;  %v7280_v53 = vld [vmem:[%s8895_s5 + $0xf0] sm:$0xff]  }
 0x5ec   :  { %2736 = vst.msk [vmem:[#allocation2 + $0x4] sm:$0xf] %vm1526_vm13, %v2726_v42  ;;  %2737 = vst.msk [vmem:[#allocation2 + $0x8] sm:$0xf] %vm1526_vm13, %v2729_v63  ;;  %v3435_v41 = vld [vmem:[#allocation2 + $0x10] sm:$0x3] }
 0x5ed   :  { %v7281_v42 = vld [vmem:[%s8895_s5 + $0xc0] sm:$0xff]  }
 0x5f0   :  { %v2739_v1 = vld [vmem:[#allocation2] sm:$0xf] }
 0x5f1   :  { %v2754_v56 = vld [vmem:[#allocation2] sm:$0xe] }
 0x5f2   :  { %v2755_v4 = vld [vmem:[#allocation2 + $0xc] sm:$0x1]  ;;  %v3083_v0 = vld [vmem:[#allocation2] sm:$0x8] }
 0x5f3   :  { %v3084_v54 = vld [vmem:[#allocation2 + $0xc] sm:$0x7]  ;;  %v8289_v23 = vld [vmem:[#allocation2 + $0x4] sm:$0xf]  ;;  %v8291_v55 = vld [vmem:[#allocation2 + $0x8] sm:$0xf] }
 0x5f4   :  { %v2967_v22 = vld [vmem:[#allocation2 + $0xc] sm:$0x3]  ;;  %v5691_v57 = vcombine.low %v2739_v1, %v8289_v23  ;;  %v5692_v40 = vcombine.low %v8291_v55, %v8291_v55  ;;  %v5681_v58 = vcombine.low %v2754_v56, %v8289_v23  ;;  %v5682_v59 = vcombine.low %v8291_v55, %v2755_v4  ;;  %v2966_v2 = vld [vmem:[#allocation2] sm:$0xc]  ;;  %v3311_v26 = vld [vmem:[#allocation2 + $0x4] sm:$0xe] }
 0x5f5   :  { %v5735_v3 = vcombine.low %v3083_v0, %v8289_v23  ;;  %v5736_v5 = vcombine.low %v8291_v55, %v3084_v54  ;;  %v5713_v62 = vcombine.low %v2966_v2, %v8289_v23  ;;  %v5714_v6 = vcombine.low %v8291_v55, %v2967_v22  ;;  %v8337_v27 = vld [vmem:[#allocation2 + $0x8] sm:$0xf]  ;;  %v8339_v28 = vld [vmem:[#allocation2 + $0xc] sm:$0xf]  ;;  %v3434_v39 = vld [vmem:[#allocation2 + $0x4] sm:$0xc] }
 0x5f6   :  { %6764 = vmatprep.mubr.msk.bf16.mxu1 %vm144_vm0, %v5691_v57  ;;  %v2779_v7 = vrot.slane %v5681_v58, 1  ;;  %v2780_v8 = vrot.slane %v5682_v59, 1  ;;  %v5779_v49 = vcombine.low %v3311_v26, %v8337_v27  ;;  %v5780_v10 = vcombine.low %v8339_v28, %v3314_v47  ;;  %v7283_v4 = vld [vmem:[%s8895_s5 + $0x148] sm:$0xff]   ;;  %v7287_v57 = vld [vmem:[%s8895_s5 + $0x138] sm:$0xff]   ;;  %v7290_v59 = vld [vmem:[%s8895_s5 + $0x120] sm:$0xff]  }
 0x5f7   :  { %6765 = vmatmul.mubr.msk.bf16.vlgmr.msra.gmra.mxu1 %vm144_vm0, %v5692_v40  ;;  %v3104_v32 = vrot.slane %v5735_v3, 3  ;;  %v3105_v9 = vrot.slane %v5736_v5, 3  ;;  %v2987_v12 = vrot.slane %v5713_v62, 2  ;;  %v2988_v13 = vrot.slane %v5714_v6, 2  ;;  %v7288_v40 = vld [vmem:[%s8895_s5 + $0x130] sm:$0xff]   ;;  %v7289_v58 = vld [vmem:[%s8895_s5 + $0x128] sm:$0xff]  }
 0x5f8   :  { %6785 = vmatpush3.bf16.msra.mxu1 %v8264_v24  ;;  %v2781_v15 = vsel %vm324_vm1, %v2779_v7, %v2780_v8  ;;  %v7261_v24 = vld [vmem:[%s8895_s5 + $0xa0] sm:$0xff]   ;;  %v3338_v31 = vrot.slane %v5779_v49, 1  ;;  %v3339_v11 = vrot.slane %v5780_v10, 1  ;;  %v5757_v52 = vcombine.low %v8289_v23, %v8291_v55  ;;  %v7282_v23 = vld [vmem:[#allocation2 + $0xc] ss:$0 sps:$4 sm:$0xff]   ;;  %v7293_v3 = vld [vmem:[%s8896_s7 + $0x58] sm:$0xff]  }
 0x5f9   :  { %6748 = vmatprep.mubr.msk.bf16.mxu0 %vm144_vm0, %v2781_v15  ;;  %v3106_v17 = vsel %vm800_vm3, %v3104_v32, %v3105_v9  ;;  %6786 = vmatprep.subr.bf16.mxu1 %v7255_v60  ;;  %v2989_v19 = vsel %vm565_vm2, %v2987_v12, %v2988_v13  ;;  %v5801_v63 = vcombine.low %v3434_v39, %v8337_v27  ;;  %v7286_v55 = vld [vmem:[%s8895_s5 + $0x140] sm:$0xff]   ;;  %v7291_v0 = vld [vmem:[%s8896_s7 + $0x28] sm:$0xff]   ;;  %v7294_v5 = vld [vmem:[%s8896_s7 + $0x18] sm:$0xff]   ;;  %vm4449_vm3 = vcmask 516096  }
 0x5fa   :  { %6796 = vmatprep.mubr.msk.bf16.mxu1 %vm144_vm0, %v3106_v17  ;;  %6749 = vmatmul.mubr.msk.bf16.vlgmr.msra.gmra.mxu0 %vm144_vm0, %v2780_v8  ;;  %v3340_v34 = vsel %vm324_vm1, %v3338_v31, %v3339_v11  ;;  %v5802_v1 = vcombine.low %v8339_v28, %v3435_v41  ;;  %v7292_v2 = vld [vmem:[%s8896_s7 + $0x20] sm:$0xff]   ;;  %v7296_v62 = vld [vmem:[%s8896_s7 + $0x10] sm:$0xff]   ;;  %v7297_v6 = vld [vmem:[%s8896_s7 + $0x48] sm:$0xff]   ;;  %vm3575_vm1 = vcmask 779265   ;;  %4450 = vst.msk [vmem:[#allocation3] sm:$0x1] %vm4449_vm3, %v7368_v61 }
 0x5fb   :  { %6769 = vmatpush3.bf16.msra.mxu0 %v8269_v43  ;;  %6780 = vmatprep.mubr.msk.bf16.mxu0 %vm144_vm0, %v2989_v19  ;;  %v7262_v43 = vld [vmem:[%s8895_s5 + $0x70] sm:$0xff]   ;;  %v3455_v54 = vrot.slane %v5801_v63, 2  ;;  %v7298_v7 = vld [vmem:[%s8896_s7 + $0x8] sm:$0xff]   ;;  %v7299_v8 = vld [vmem:[%s8896_s7 + $0x40] sm:$0xff]  }
 0x5fc   :  { %6787 = vmatpush3.bf16.msra.mxu1 %v7255_v60  ;;  %6770 = vmatprep.subr.bf16.mxu0 %v7258_v16  ;;  %v3456_v22 = vrot.slane %v5802_v1, 2  ;;  %v7295_v60 = vld [vmem:[%s8896_s7 + $0x50] sm:$0xff]   ;;  %v7300_v32 = vld [vmem:[%s8896_s7] sm:$0xff]   ;;  %v7328_v61 = vld [vmem:[%s8902_s9 + $0x8] sm:$0xff]  }
 0x5fd   :  { %6788 = vmatprep.subr.bf16.mxu1 %v7259_v18  ;;  %v7303_v12 = vld [vmem:[%s8896_s7 + $0x30] sm:$0xff]  }
 0x5fe   :  { %v3457_v56 = vsel %vm565_vm2, %v3455_v54, %v3456_v22  ;;  %vm4291_vm2 = vcmask 130048  }
 0x5ff   :  { %6771 = vmatpush3.bf16.msra.mxu0 %v7258_v16 }
 0x600   :  { %6789 = vmatpush3.bf16.msra.mxu1 %v7259_v18  ;;  %6772 = vmatprep.subr.bf16.mxu0 %v7260_v21 }
 0x601   :  { %6790 = vmatprep.subr.bf16.mxu1 %v7261_v24 }
 0x603   :  { %6773 = vmatpush3.bf16.msra.mxu0 %v7260_v21 }
 0x604   :  { %6791 = vmatpush3.bf16.msra.mxu1 %v7261_v24  ;;  %6774 = vmatprep.subr.bf16.mxu0 %v7262_v43 }
 0x605   :  { %6792 = vmatprep.subr.bf16.mxu1 %v7263_v44 }
 0x607   :  { %6775 = vmatpush3.bf16.msra.mxu0 %v7262_v43 }
 0x608   :  { %6793 = vmatpush3.bf16.msra.mxu1 %v7263_v44  ;;  %6776 = vmatprep.subr.bf16.mxu0 %v7264_v46 }
 0x609   :  { %6794 = vmatprep.subr.bf16.mxu1 %v7265_v48 }
 0x60b   :  { %6777 = vmatpush3.bf16.msra.mxu0 %v7264_v46 }
 0x60c   :  { %6795 = vmatpush3.bf16.msra.mxu1 %v7265_v48  ;;  %6778 = vmatprep.subr.bf16.mxu0 %v7266_v50 }
 0x60d   :  { %6816 = vmatprep.subr.bf16.mxu1 %v7267_v30 }
 0x60f   :  { %6779 = vmatpush3.bf16.msra.mxu0 %v7266_v50  ;;  %6797 = vmatmul.mubr.msk.bf16.vlgmr.msra.gmra.mxu1 %vm144_vm0, %v3105_v9  ;;  %v7301_v9 = vld [vmem:[%s8896_s7 + $0x38] sm:$0xff]  }
 0x610   :  { %6817 = vmatpush3.bf16.msra.mxu1 %v7267_v30  ;;  %6828 = vmatprep.mubr.msk.bf16.mxu1 %vm144_vm0, %v3340_v34 }
 0x611   :  { %6800 = vmatprep.subr.bf16.mxu0 %v7270_v51  ;;  %6818 = vmatprep.subr.bf16.mxu1 %v7272_v33 }
 0x612   :  { %6781 = vmatmul.mubr.msk.bf16.vlgmr.msra.gmra.mxu0 %vm144_vm0, %v2988_v13 }
 0x613   :  { %6801 = vmatpush3.bf16.msra.mxu0 %v7270_v51  ;;  %6812 = vmatprep.mubr.msk.bf16.mxu0 %vm144_vm0, %v5757_v52 }
 0x614   :  { %6819 = vmatpush3.bf16.msra.mxu1 %v7272_v33  ;;  %6802 = vmatprep.subr.bf16.mxu0 %v7273_v35 }
 0x615   :  { %6820 = vmatprep.subr.bf16.mxu1 %v7274_v20 }
 0x617   :  { %6803 = vmatpush3.bf16.msra.mxu0 %v7273_v35 }
 0x618   :  { %6821 = vmatpush3.bf16.msra.mxu1 %v7274_v20  ;;  %6804 = vmatprep.subr.bf16.mxu0 %v7275_v36 }
 0x619   :  { %6822 = vmatprep.subr.bf16.mxu1 %v7276_v45 }
 0x61b   :  { %6805 = vmatpush3.bf16.msra.mxu0 %v7275_v36 }
 0x61c   :  { %6823 = vmatpush3.bf16.msra.mxu1 %v7276_v45  ;;  %6806 = vmatprep.subr.bf16.mxu0 %v7277_v37 }
 0x61d   :  { %6824 = vmatprep.subr.bf16.mxu1 %v7278_v25 }
 0x61f   :  { %6807 = vmatpush3.bf16.msra.mxu0 %v7277_v37 }
 0x620   :  { %6825 = vmatpush3.bf16.msra.mxu1 %v7278_v25  ;;  %6808 = vmatprep.subr.bf16.mxu0 %v7279_v38 }
 0x621   :  { %6826 = vmatprep.subr.bf16.mxu1 %v7280_v53 }
 0x623   :  { %6809 = vmatpush3.bf16.msra.mxu0 %v7279_v38 }
 0x624   :  { %6827 = vmatpush3.bf16.msra.mxu1 %v7280_v53  ;;  %6810 = vmatprep.subr.bf16.mxu0 %v7281_v42 }
 0x625   :  { %6848 = vmatprep.subr.bf16.mxu1 %v7366_v29 }
 0x627   :  { %6811 = vmatpush3.bf16.msra.mxu0 %v7281_v42  ;;  %6829 = vmatmul.mubr.msk.bf16.vlgmr.msra.gmra.mxu1 %vm144_vm0, %v3339_v11  ;;  %v5811_v42 = vld [vmem:[%s8897_s6] ss:$0 sm:$0xff] }
 0x628   :  { %6832 = vmatprep.subr.bf16.mxu0 %v7283_v4  ;;  %6860 = vmatprep.mubr.msk.bf16.mxu1 %vm7367_vm4, %v7366_v29 }
 0x629   :  { %6849 = vmatpush3.bf16.msra.mxu1 %v7293_v3 }
 0x62a   :  { %6813 = vmatmul.mubr.msk.bf16.vlgmr.msra.gmra.mxu0 %vm144_vm0, %v7282_v23  ;;  %6850 = vmatprep.subr.bf16.mxu1 %v7366_v29 }
 0x62b   :  { %6833 = vmatpush3.bf16.msra.mxu0 %v7283_v4  ;;  %6844 = vmatprep.mubr.msk.bf16.mxu0 %vm144_vm0, %v3457_v56 }
 0x62c   :  { %6834 = vmatprep.subr.bf16.mxu0 %v7286_v55 }
 0x62d   :  { %6851 = vmatpush3.bf16.msra.mxu1 %v7295_v60 }
 0x62e   :  { %6852 = vmatprep.subr.bf16.mxu1 %v7366_v29 }
 0x62f   :  { %6835 = vmatpush3.bf16.msra.mxu0 %v7286_v55 }
 0x630   :  { %6836 = vmatprep.subr.bf16.mxu0 %v7287_v57 }
 0x631   :  { %6853 = vmatpush3.bf16.msra.mxu1 %v7297_v6 }
 0x632   :  { %6854 = vmatprep.subr.bf16.mxu1 %v7366_v29 }
 0x633   :  { %6837 = vmatpush3.bf16.msra.mxu0 %v7287_v57 }
 0x634   :  { %6838 = vmatprep.subr.bf16.mxu0 %v7288_v40 }
 0x635   :  { %6855 = vmatpush3.bf16.msra.mxu1 %v7299_v8 }
 0x636   :  { %6856 = vmatprep.subr.bf16.mxu1 %v7366_v29 }
 0x637   :  { %6839 = vmatpush3.bf16.msra.mxu0 %v7288_v40 }
 0x638   :  { %6840 = vmatprep.subr.bf16.mxu0 %v7289_v58 }
 0x639   :  { %6857 = vmatpush3.bf16.msra.mxu1 %v7301_v9 }
 0x63a   :  { %6858 = vmatprep.subr.bf16.mxu1 %v7366_v29 }
 0x63b   :  { %6841 = vmatpush3.bf16.msra.mxu0 %v7289_v58 }
 0x63c   :  { %6842 = vmatprep.subr.bf16.mxu0 %v7290_v59 }
 0x63d   :  { %6859 = vmatpush3.bf16.msra.mxu1 %v7303_v12 }
 0x63e   :  { %6880 = vmatprep.subr.bf16.mxu1 %v7366_v29 }
 0x63f   :  { %6843 = vmatpush3.bf16.msra.mxu0 %v7290_v59 }
 0x640   :  { %6864 = vmatprep.subr.bf16.mxu0 %v7366_v29 }
 0x642   :  { %6845 = vmatmul.mubr.msk.bf16.vlgmr.msra.gmra.mxu0 %vm144_vm0, %v3456_v22 }
 0x643   :  { %6876 = vmatprep.mubr.msk.bf16.mxu0 %vm7367_vm4, %v7366_v29  ;;  %6865 = vmatpush3.bf16.msra.mxu0 %v7291_v0 }
 0x644   :  { %6866 = vmatprep.subr.bf16.mxu0 %v7366_v29 }
 0x647   :  { %6867 = vmatpush3.bf16.msra.mxu0 %v7292_v2 }
 0x648   :  { %6868 = vmatprep.subr.bf16.mxu0 %v7366_v29 }
 0x64b   :  { %6869 = vmatpush3.bf16.msra.mxu0 %v7294_v5 }
 0x64c   :  { %6870 = vmatprep.subr.bf16.mxu0 %v7366_v29 }
 0x64f   :  { %6871 = vmatpush3.bf16.msra.mxu0 %v7296_v62 }
 0x650   :  { %6872 = vmatprep.subr.bf16.mxu0 %v7366_v29 }
 0x653   :  { %6873 = vmatpush3.bf16.msra.mxu0 %v7298_v7 }
 0x654   :  { %6874 = vmatprep.subr.bf16.mxu0 %v7366_v29 }
 0x657   :  { %6875 = vmatpush3.bf16.msra.mxu0 %v7300_v32 }
 0x658   :  { %6896 = vmatprep.subr.bf16.mxu0 %v7366_v29 }
 0x6b7   :  { %v6766_v13 = vpop.f32.mrf.mxu1 }
 0x6b9   :  { %v2952_v15 = vpop.f32.mrf.mxu1 }
 0x6ba   :  { %v6750_v16 = vpop.f32.mrf.mxu0 }
 0x6bb   :  { %v6767_v17 = vpop.f32.mrf.mxu1  ;;  %v2961_v51 = vadd.f32 %v6766_v13, %v6750_v16 }
 0x6bc   :  { %v2858_v18 = vpop.f32.mrf.mxu0  ;;  %v7304_v17 = vld [vmem:[%s8896_s7 + $0xb0] sm:$0xff]  }
 0x6bd   :  { %v2955_v21 = vpop.f32.mrf.mxu1  ;;  %v2953_v33 = vadd.f32 %v2952_v15, %v2858_v18  ;;  %v7302_v15 = vld [vmem:[%s8896_s7 + $0xb8] sm:$0xff]  }
 0x6be   :  { %v6751_v19 = vpop.f32.mrf.mxu0 }
 0x6bf   :  { %v7306_v19 = vld [vmem:[%s8896_s7 + $0x88] sm:$0xff]  }
 0x6c0   :  { %v2861_v43 = vpop.f32.mrf.mxu0 }
 0x6c1   :  { %v2956_v52 = vadd.f32 %v2955_v21, %v2861_v43  ;;  %v7308_v43 = vld [vmem:[%s8896_s7 + $0x80] sm:$0xff]  }
 0x6cf   :  { %v6798_v24 = vpop.f32.mrf.mxu1 }
 0x6d1   :  { %v3183_v44 = vpop.f32.mrf.mxu1 }
 0x6d2   :  { %v6782_v46 = vpop.f32.mrf.mxu0 }
 0x6d3   :  { %v6799_v47 = vpop.f32.mrf.mxu1  ;;  %v3082_v34 = vadd.f32 %v6782_v46, %v2961_v51  ;;  %v7310_v46 = vld [vmem:[%s8896_s7 + $0x78] sm:$0xff]  }
 0x6d4   :  { %v3066_v26 = vpop.f32.mrf.mxu0  ;;  %v7311_v47 = vld [vmem:[%s8896_s7 + $0x98] sm:$0xff]  }
 0x6d5   :  { %v3186_v28 = vpop.f32.mrf.mxu1  ;;  %v3080_v35 = vadd.f32 %v3066_v26, %v2953_v33  ;;  %v3199_v20 = vadd.f32 %v6798_v24, %v3082_v34  ;;  %v7307_v24 = vld [vmem:[%s8896_s7 + $0xa8] sm:$0xff]   ;;  %v7312_v26 = vld [vmem:[%s8896_s7 + $0x70] sm:$0xff]   ;;  %v7320_v51 = vld [vmem:[%s8896_s7 + $0xd8] sm:$0xff]  }
 0x6d6   :  { %v6783_v27 = vpop.f32.mrf.mxu0  ;;  %v7321_v33 = vld [vmem:[%s8896_s7 + $0xd0] sm:$0xff]   ;;  %v7322_v34 = vld [vmem:[%s8896_s7 + $0xc8] sm:$0xff]  }
 0x6d7   :  { %v3197_v37 = vadd.f32 %v3183_v44, %v3080_v35  ;;  %v7309_v44 = vld [vmem:[%s8896_s7 + $0xa0] sm:$0xff]   ;;  %v7313_v27 = vld [vmem:[%s8896_s7 + $0x90] sm:$0xff]  }
 0x6d8   :  { %v3069_v49 = vpop.f32.mrf.mxu0  ;;  %v7323_v35 = vld [vmem:[%s8896_s7 + $0xc0] sm:$0xff]  }
 0x6d9   :  { %v3081_v36 = vadd.f32 %v3069_v49, %v2956_v52 }
 0x6db   :  { %v3198_v53 = vadd.f32 %v3186_v28, %v3081_v36  ;;  %v7314_v28 = vld [vmem:[%s8896_s7 + $0x68] sm:$0xff]   ;;  %v8575_v36 = vld [vmem:[%s8898_s19 + $0x38] sm:$0xff] }
 0x6e7   :  { %v6830_v48 = vpop.f32.mrf.mxu1 }
 0x6e9   :  { %v3417_v10 = vpop.f32.mrf.mxu1 }
 0x6ea   :  { %v6814_v50 = vpop.f32.mrf.mxu0 }
 0x6eb   :  { %v6831_v30 = vpop.f32.mrf.mxu1  ;;  %v3310_v45 = vadd.f32 %v6814_v50, %v3199_v20 }
 0x6ec   :  { %v3294_v31 = vpop.f32.mrf.mxu0  ;;  %v7318_v30 = vld [vmem:[%s8896_s7 + $0xe8] sm:$0xff]  }
 0x6ed   :  { %v3308_v25 = vadd.f32 %v3294_v31, %v3197_v37  ;;  %v3433_v39 = vadd.f32 %v6830_v48, %v3310_v45  ;;  %v3420_v55 = vpop.f32.mrf.mxu1  ;;  %v8583_v45 = vld [vmem:[%s8898_s19 + $0x30] sm:$0xff]  ;;  %v8592_v37 = vld [vmem:[%s8898_s19 + $0x28] sm:$0xff] }
 0x6ee   :  { %v6815_v11 = vpop.f32.mrf.mxu0 }
 0x6ef   :  { %v3431_v4 = vadd.f32 %v3417_v10, %v3308_v25  ;;  %v7316_v10 = vld [vmem:[%s8896_s7 + $0x60] sm:$0xff]  }
 0x6f0   :  { %v3297_v38 = vpop.f32.mrf.mxu0  ;;  %v7319_v11 = vld [vmem:[%s8896_s7 + $0xe0] sm:$0xff]  }
 0x6f1   :  { %v3309_v63 = vadd.f32 %v3297_v38, %v3198_v53  ;;  %v8599_v25 = vld [vmem:[%s8898_s19 + $0x20] sm:$0xff]  ;;  %v8607_v38 = vld [vmem:[%s8898_s19 + $0x18] sm:$0xff]  ;;  %v8616_v53 = vld [vmem:[%s8898_s19 + $0x10] sm:$0xff] }
 0x6f3   :  { %v3432_v58 = vadd.f32 %v3420_v55, %v3309_v63 }
 0x702   :  { %v6846_v41 = vpop.f32.mrf.mxu0 }
 0x703   :  { %v3550_v1 = vadd.f32 %v6846_v41, %v3433_v39  ;;  %v8625_v39 = vld [vmem:[%s8898_s19 + $0x8] sm:$0xff]  ;;  %v8634_v41 = vld [vmem:[%s8898_s19] sm:$0xff] }
 0x704   :  { %v3534_v54 = vpop.f32.mrf.mxu0 }
 0x705   :  { %v3560_v22 = vadd.f32 %v5811_v42, %v3550_v1  ;;  %v3548_v23 = vadd.f32 %v3534_v54, %v3431_v4 }
 0x706   :  { %v6847_v56 = vpop.f32.mrf.mxu0 }
 0x707   :  { %v3562_v57 = vpack.c.bf16 %v3560_v22, %v3560_v22  ;;  %v3558_v40 = vadd.f32 %v5811_v42, %v3548_v23 }
 0x708   :  { %v3537_v59 = vpop.f32.mrf.mxu0 }
 0x709   :  { %v3597_v0 = vrot.slane %v3562_v57, 7  ;;  %v5817_v2 = vrot.slane %v3562_v57, 9  ;;  %v5990_v3 = vpack.c.bf16 %v3558_v40, %v3558_v40  ;;  %v3549_v5 = vadd.f32 %v3537_v59, %v3432_v58  ;;  %3593 = vst.msk [vmem:[#allocation4 + $0x4] sm:$0x1] %vm3563_vm14, %v3562_v57 }
 0x70b   :  { %v3568_v60 = vrot.slane %v5990_v3, 7  ;;  %v5813_v62 = vrot.slane %v5990_v3, 9  ;;  %3599 = vst.msk [vmem:[#allocation4 + $0x8] sm:$0x4] %vm3570_vm15, %v3597_v0  ;;  %v3559_v6 = vadd.f32 %v5811_v42, %v3549_v5 }
 0x70c   :  { %3603 = vst.msk [vmem:[#allocation4 + $0x4] sm:$0x2] %vm3575_vm1, %v5817_v2 }
 0x70d   :  { %3571 = vst.msk [vmem:[#allocation4 + $0x4] sm:$0x4] %vm3570_vm15, %v3568_v60  ;;  %v3561_v7 = vpack.c.bf16 %v3559_v6, %v3558_v40  ;;  %v5991_v8 = vpack.c.bf16 %v3559_v6, %v3559_v6 }
 0x70e   :  { %3576 = vst.msk [vmem:[#allocation4] sm:$0x2] %vm3575_vm1, %v5813_v62 }
 0x70f   :  { %3564 = vst.msk [vmem:[#allocation4] sm:$0x1] %vm3563_vm14, %v3561_v7  ;;  %v3580_v32 = vrot.slane %v5991_v8, 6  ;;  %v5815_v9 = vrot.slane %v5991_v8, 9  ;;  %v3587_v12 = vrot.slane %v5991_v8, 7 }
 0x710   :  { %3577 = vst.msk [vmem:[#allocation4 + $0x4] sm:$0x8] %vm1496_vm7, %v3561_v7  ;;  %v5905_v7 = vld [vmem:[%s8899_s8] ss:$0 sm:$0xff] }
 0x711   :  { %3582 = vst.msk [vmem:[#allocation4] sm:$0x4] %vm3570_vm15, %v3580_v32  ;;  %v3590_v13 = vrot.slane %v3580_v32, 4 }
 0x712   :  { %3586 = vst.msk [vmem:[#allocation4 + $0x8] sm:$0x1] %vm3563_vm14, %v5815_v9 }
 0x713   :  { %3589 = vst.msk [vmem:[#allocation4] sm:$0x8] %vm1496_vm7, %v3587_v12 }
 0x714   :  { %3592 = vst.msk [vmem:[#allocation4 + $0x8] sm:$0x2] %vm3575_vm1, %v3590_v13 }
 0x71a   :  { %v3605_v16 = vld [vmem:[#allocation4] sm:$0xf] }
 0x71b   :  { %6877 = vmatmul.mubr.msk.bf16.vlgmr.msra.gmra.mxu0 %vm144_vm0, %v3605_v16  ;;  %v7305_v18 = vld [vmem:[#allocation4 + $0x4] sm:$0x3c]   ;;  %v7317_v50 = vld [vmem:[#allocation4] sm:$0x1e]  }
 0x71c   :  { %6897 = vmatpush3.bf16.msra.mxu0 %v7302_v15  ;;  %6908 = vmatprep.mubr.msk.bf16.mxu0 %vm7367_vm4, %v7366_v29  ;;  %v3638_v21 = vrot.slane %v7305_v18, 2  ;;  %v7315_v48 = vld [vmem:[#allocation4 + $0x4] sm:$0x78]   ;;  %v3817_v31 = vrot.slane %v7317_v50, 1  ;;  %v7324_v52 = vld [vmem:[#allocation4] sm:$0x3c]  }
 0x71d   :  { %6898 = vmatprep.subr.bf16.mxu0 %v7366_v29  ;;  %v3918_v49 = vrot.slane %v7315_v48, 3  ;;  %v4019_v20 = vrot.slane %v7324_v52, 2 }
 0x71e   :  { %6861 = vmatmul.mubr.msk.bf16.vlgmr.msra.gmra.mxu1 %vm144_vm0, %v3638_v21 }
 0x71f   :  { %6881 = vmatpush3.bf16.msra.mxu1 %v7306_v19  ;;  %6892 = vmatprep.mubr.msk.bf16.mxu1 %vm7367_vm4, %v7366_v29 }
 0x720   :  { %6899 = vmatpush3.bf16.msra.mxu0 %v7304_v17  ;;  %6882 = vmatprep.subr.bf16.mxu1 %v7366_v29 }
 0x721   :  { %6900 = vmatprep.subr.bf16.mxu0 %v7366_v29 }
 0x723   :  { %6883 = vmatpush3.bf16.msra.mxu1 %v7308_v43 }
 0x724   :  { %6901 = vmatpush3.bf16.msra.mxu0 %v7307_v24  ;;  %6884 = vmatprep.subr.bf16.mxu1 %v7366_v29 }
 0x725   :  { %6902 = vmatprep.subr.bf16.mxu0 %v7366_v29 }
 0x727   :  { %6885 = vmatpush3.bf16.msra.mxu1 %v7310_v46 }
 0x728   :  { %6903 = vmatpush3.bf16.msra.mxu0 %v7309_v44  ;;  %6886 = vmatprep.subr.bf16.mxu1 %v7366_v29 }
 0x729   :  { %6904 = vmatprep.subr.bf16.mxu0 %v7366_v29 }
 0x72b   :  { %6887 = vmatpush3.bf16.msra.mxu1 %v7312_v26 }
 0x72c   :  { %6905 = vmatpush3.bf16.msra.mxu0 %v7311_v47  ;;  %6888 = vmatprep.subr.bf16.mxu1 %v7366_v29 }
 0x72d   :  { %6906 = vmatprep.subr.bf16.mxu0 %v7366_v29 }
 0x72f   :  { %6889 = vmatpush3.bf16.msra.mxu1 %v7314_v28 }
 0x730   :  { %6907 = vmatpush3.bf16.msra.mxu0 %v7313_v27  ;;  %6890 = vmatprep.subr.bf16.mxu1 %v7366_v29 }
 0x731   :  { %6928 = vmatprep.subr.mxu0 %v7366_v29 }
 0x733   :  { %6909 = vmatmul.mubr.msk.bf16.vlgmr.msra.gmra.mxu0 %vm144_vm0, %v3918_v49  ;;  %6891 = vmatpush3.bf16.msra.mxu1 %v7316_v10  ;;  %v8663_v49 = vld [vmem:[%s8900_s20 + $0x8] sm:$0xff]  ;;  %v8668_v10 = vld [vmem:[%s8900_s20] sm:$0xff] }
 0x734   :  { %6944 = vmatprep.mubr.msk.f32.mxu0 %vm7367_vm4, %v7366_v29  ;;  %6912 = vmatprep.subr.bf16.mxu1 %v7366_v29 }
 0x735   :  { %6929 = vmatpush3.msra.mxu0 %v8575_v36 }
 0x736   :  { %6893 = vmatmul.mubr.msk.bf16.vlgmr.msra.gmra.mxu1 %vm144_vm0, %v3817_v31  ;;  %6930 = vmatprep.subr.mxu0 %v7366_v29 }
 0x737   :  { %6913 = vmatpush3.bf16.msra.mxu1 %v7318_v30  ;;  %6924 = vmatprep.mubr.msk.bf16.mxu1 %vm7367_vm4, %v7366_v29 }
 0x738   :  { %6914 = vmatprep.subr.bf16.mxu1 %v7366_v29  ;;  %6931 = vmatpush3.msra.mxu0 %v8583_v45 }
 0x739   :  { %6932 = vmatprep.subr.mxu0 %v7366_v29 }
 0x73a   :  { %6933 = vmatpush3.msra.mxu0 %v8592_v37 }
 0x73b   :  { %6915 = vmatpush3.bf16.msra.mxu1 %v7319_v11  ;;  %6934 = vmatprep.subr.mxu0 %v7366_v29 }
 0x73c   :  { %6916 = vmatprep.subr.bf16.mxu1 %v7366_v29  ;;  %6935 = vmatpush3.msra.mxu0 %v8599_v25 }
 0x73d   :  { %6936 = vmatprep.subr.mxu0 %v7366_v29 }
 0x73e   :  { %6937 = vmatpush3.msra.mxu0 %v8607_v38 }
 0x73f   :  { %6917 = vmatpush3.bf16.msra.mxu1 %v7320_v51  ;;  %6938 = vmatprep.subr.mxu0 %v7366_v29 }
 0x740   :  { %6918 = vmatprep.subr.bf16.mxu1 %v7366_v29  ;;  %6939 = vmatpush3.msra.mxu0 %v8616_v53 }
 0x741   :  { %6940 = vmatprep.subr.mxu0 %v7366_v29 }
 0x742   :  { %6941 = vmatpush3.msra.mxu0 %v8625_v39 }
 0x743   :  { %6919 = vmatpush3.bf16.msra.mxu1 %v7321_v33  ;;  %6942 = vmatprep.subr.mxu0 %v7366_v29 }
 0x744   :  { %6920 = vmatprep.subr.bf16.mxu1 %v7366_v29  ;;  %6943 = vmatpush3.msra.mxu0 %v8634_v41 }
 0x745   :  { %6966 = vmatprep.subr.mxu0 %v7366_v29 }
 0x747   :  { %6921 = vmatpush3.bf16.msra.mxu1 %v7322_v34 }
 0x748   :  { %6922 = vmatprep.subr.bf16.mxu1 %v7366_v29 }
 0x74b   :  { %6923 = vmatpush3.bf16.msra.mxu1 %v7323_v35 }
 0x74c   :  { %6947 = vmatprep.subr.mxu1 %v7366_v29 }
 0x74e   :  { %6925 = vmatmul.mubr.msk.bf16.vlgmr.msra.gmra.mxu1 %vm144_vm0, %v4019_v20  ;;  %vm4108_vm0 = vcmask 523264   ;;  %v4282_v20 = vld [vmem:[%s8901_s15] sm:$0x1] }
 0x74f   :  { %6963 = vmatprep.mubr.msk.f32.mxu1 %vm7367_vm4, %v7366_v29  ;;  %6948 = vmatpush3.msra.mxu1 %v8575_v36 }
 0x750   :  { %6949 = vmatprep.subr.mxu1 %v7366_v29 }
 0x751   :  { %6950 = vmatpush3.msra.mxu1 %v8583_v45 }
 0x752   :  { %6951 = vmatprep.subr.mxu1 %v7366_v29 }
 0x753   :  { %6952 = vmatpush3.msra.mxu1 %v8592_v37 }
 0x754   :  { %6953 = vmatprep.subr.mxu1 %v7366_v29 }
 0x755   :  { %6954 = vmatpush3.msra.mxu1 %v8599_v25 }
 0x756   :  { %6955 = vmatprep.subr.mxu1 %v7366_v29 }
 0x757   :  { %6956 = vmatpush3.msra.mxu1 %v8607_v38 }
 0x758   :  { %6957 = vmatprep.subr.mxu1 %v7366_v29 }
 0x759   :  { %6958 = vmatpush3.msra.mxu1 %v8616_v53 }
 0x75a   :  { %6959 = vmatprep.subr.mxu1 %v7366_v29 }
 0x75b   :  { %6960 = vmatpush3.msra.mxu1 %v8625_v39 }
 0x75c   :  { %6961 = vmatprep.subr.mxu1 %v7366_v29 }
 0x75d   :  { %6962 = vmatpush3.msra.mxu1 %v8634_v41 }
 0x75e   :  { %6973 = vmatprep.subr.mxu1 %v7366_v29 }
 0x7db   :  { %v3791_v42 = vpop.f32.mrf.mxu0 }
 0x7dd   :  { %v6878_v63 = vpop.f32.mrf.mxu0 }
 0x7de   :  { %v3712_v4 = vpop.f32.mrf.mxu1 }
 0x7df   :  { %v3794_v1 = vpop.f32.mrf.mxu0  ;;  %v3792_v5 = vadd.f32 %v3791_v42, %v3712_v4 }
 0x7e0   :  { %v6862_v22 = vpop.f32.mrf.mxu1  ;;  %v4286_v1 = vld [vmem:[%s8901_s15 + $0x1] sm:$0x1] }
 0x7e1   :  { %v6879_v54 = vpop.f32.mrf.mxu0  ;;  %v7325_v22 = vld [vmem:[%s8902_s9 + $0x18] sm:$0xff]  }
 0x7e2   :  { %v3715_v23 = vpop.f32.mrf.mxu1 }
 0x7e3   :  { %v7326_v23 = vld [vmem:[%s8902_s9 + $0x10] sm:$0xff]  }
 0x7e4   :  { %v6863_v55 = vpop.f32.mrf.mxu1 }
 0x7e5   :  { %v7327_v55 = vld [vmem:[%s8902_s9 + $0x38] sm:$0xff]  }
 0x7f3   :  { %v3992_v56 = vpop.f32.mrf.mxu0 }
 0x7f5   :  { %v6910_v57 = vpop.f32.mrf.mxu0 }
 0x7f6   :  { %v3891_v58 = vpop.f32.mrf.mxu1  ;;  %v7330_v57 = vld [vmem:[%s8902_s9] sm:$0xff]  }
 0x7f7   :  { %v3995_v40 = vpop.f32.mrf.mxu0  ;;  %v3897_v60 = vadd.f32 %v3891_v58, %v3792_v5  ;;  %v7332_v58 = vld [vmem:[%s8902_s9 + $0x20] sm:$0xff]  }
 0x7f8   :  { %v6894_v0 = vpop.f32.mrf.mxu1  ;;  %v7331_v40 = vld [vmem:[%s8902_s9 + $0x28] sm:$0xff]  }
 0x7f9   :  { %v6911_v59 = vpop.f32.mrf.mxu0  ;;  %v3998_v62 = vadd.f32 %v3992_v56, %v3897_v60  ;;  %v7329_v56 = vld [vmem:[%s8902_s9 + $0x30] sm:$0xff]  }
 0x7fa   :  { %v3894_v2 = vpop.f32.mrf.mxu1 }
 0x7fc   :  { %v6895_v3 = vpop.f32.mrf.mxu1 }
 0x80e   :  { %v4093_v6 = vpop.f32.mrf.mxu1 }
 0x80f   :  { %v4099_v8 = vadd.f32 %v4093_v6, %v3998_v62 }
 0x810   :  { %v6926_v32 = vpop.f32.mrf.mxu1 }
 0x811   :  { %v8647_v9 = vadd.f32 %v5905_v7, %v4099_v8 }
 0x812   :  { %v4096_v12 = vpop.f32.mrf.mxu1 }
 0x813   :  { %v4109_v13 = vsel %vm4108_vm0, %v8647_v9, 0.0  ;;  %v4116_v15 = vmul.f32 %v8647_v9, %v8647_v9 }
 0x814   :  { %v4110_v16 = vrot.slane %v4109_v13, 4  ;;  %v6927_v17 = vpop.f32.mrf.mxu1 }
 0x815   :  { %v4117_v18 = vsel %vm4108_vm0, %v4116_v15, 0.0 }
 0x816   :  { %v4111_v19 = vadd.f32 %v4110_v16, %v4109_v13  ;;  %v4118_v21 = vrot.slane %v4117_v18, 4  ;;  %v7334_v16 = vld [vmem:[%s8902_s9 + $0x58] sm:$0xff]  }
 0x818   :  { %v4112_v24 = vrot.slane %v4111_v19, 2  ;;  %v4119_v43 = vadd.f32 %v4118_v21, %v4117_v18  ;;  %v7335_v18 = vld [vmem:[%s8902_s9 + $0x50] sm:$0xff]   ;;  %v7337_v21 = vld [vmem:[%s8902_s9 + $0x40] sm:$0xff]  }
 0x81a   :  { %v4113_v44 = vadd.f32 %v4112_v24, %v4111_v19  ;;  %v4120_v46 = vrot.slane %v4119_v43, 2  ;;  %v7336_v19 = vld [vmem:[%s8902_s9 + $0x48] sm:$0xff]  }
 0x81c   :  { %v4114_v47 = vrot.slane %v4113_v44, 1  ;;  %v4121_v26 = vadd.f32 %v4120_v46, %v4119_v43 }
 0x81e   :  { %v4115_v27 = vadd.f32 %v4114_v47, %v4113_v44  ;;  %v4122_v28 = vrot.slane %v4121_v26, 1 }
 0x820   :  { %6945 = vmatmul.mubr.msk.f32.vlgmr.msra.gmra.mxu0 %vm4108_vm0, %v4115_v27  ;;  %v4123_v48 = vadd.f32 %v4122_v28, %v4121_v26 }
 0x821   :  { %6970 = vmatprep.mubr.msk.f32.mxu0 %vm7367_vm4, %v7366_v29  ;;  %6967 = vmatpush3.msra.mxu0 %v8663_v49 }
 0x822   :  { %6964 = vmatmul.mubr.msk.f32.vlgmr.msra.gmra.mxu1 %vm4108_vm0, %v4123_v48  ;;  %6968 = vmatprep.subr.mxu0 %v7366_v29 }
 0x823   :  { %6977 = vmatprep.mubr.msk.f32.mxu1 %vm7367_vm4, %v7366_v29  ;;  %6974 = vmatpush3.msra.mxu1 %v8663_v49 }
 0x824   :  { %6975 = vmatprep.subr.mxu1 %v7366_v29  ;;  %6969 = vmatpush3.msra.mxu0 %v8668_v10 }
 0x825   :  { %6976 = vmatpush3.msra.mxu1 %v8668_v10  ;;  %6980 = vmatprep.subr.bf16.mxu0 %v7366_v29 }
 0x826   :  { %6992 = vmatprep.subr.bf16.mxu1 %v7366_v29 }
 0x8e0   :  { %v4201_v50 = vpop.f32.mrf.mxu0 }
 0x8e1   :  { %v4278_v30 = vmul.f32 0.03125, %v4201_v50 }
 0x8e2   :  { %v6946_v31 = vpop.f32.mrf.mxu0  ;;  %v4274_v11 = vpop.f32.mrf.mxu1 }
 0x8e3   :  { %v4280_v51 = vmul.f32 %v4278_v30, %v4278_v30  ;;  %v4279_v33 = vmul.f32 0.03125, %v4274_v11 }
 0x8e4   :  { %v6965_v34 = vpop.f32.mrf.mxu1 }
 0x8e5   :  { %v4281_v35 = vsub.f32 %v4279_v33, %v4280_v51 }
 0x8e7   :  { %v4283_v52 = vadd.f32 1e-05, %v4281_v35 }
 0x8e9   :  { %7357 = vrsqrt.f32 %v4283_v52 }
 0x8f6   :  { %v7358_v42 = vpop.eup %7357 }
 0x8f7   :  { %v4285_v63 = vmul.f32 %v7358_v42, %v4282_v20 }
 0x8f9   :  { %6971 = vmatmul.mubr.msk.f32.vlgmr.msra.gmra.mxu0 %vm4291_vm2, %v4285_v63  ;;  %v4287_v4 = vmul.f32 %v4285_v63, %v4278_v30 }
 0x8fa   :  { %6988 = vmatprep.mubr.msk.bf16.mxu0 %vm7367_vm4, %v7366_v29  ;;  %6981 = vmatpush3.bf16.msra.mxu0 %v7327_v55 }
 0x8fb   :  { %v4288_v54 = vsub.f32 %v4286_v1, %v4287_v4  ;;  %6982 = vmatprep.subr.bf16.mxu0 %v7366_v29 }
 0x8fd   :  { %6978 = vmatmul.mubr.msk.f32.vlgmr.msra.gmra.mxu1 %vm4291_vm2, %v4288_v54 }
 0x8fe   :  { %7000 = vmatprep.mubr.msk.bf16.mxu1 %vm7367_vm4, %v7366_v29  ;;  %6993 = vmatpush3.bf16.msra.mxu1 %v7325_v22 }
 0x8ff   :  { %6994 = vmatprep.subr.bf16.mxu1 %v7366_v29  ;;  %6983 = vmatpush3.bf16.msra.mxu0 %v7329_v56 }
 0x900   :  { %6984 = vmatprep.subr.bf16.mxu0 %v7366_v29 }
 0x902   :  { %6995 = vmatpush3.bf16.msra.mxu1 %v7326_v23 }
 0x903   :  { %6996 = vmatprep.subr.bf16.mxu1 %v7366_v29  ;;  %6985 = vmatpush3.bf16.msra.mxu0 %v7331_v40 }
 0x904   :  { %6986 = vmatprep.subr.bf16.mxu0 %v7366_v29 }
 0x906   :  { %6997 = vmatpush3.bf16.msra.mxu1 %v7328_v61 }
 0x907   :  { %6998 = vmatprep.subr.bf16.mxu1 %v7366_v29  ;;  %6987 = vmatpush3.bf16.msra.mxu0 %v7332_v58 }
 0x908   :  { %7004 = vmatprep.subr.bf16.mxu0 %v7366_v29 }
 0x90a   :  { %6999 = vmatpush3.bf16.msra.mxu1 %v7330_v57 }
 0x90b   :  { %7016 = vmatprep.subr.mxu1 %v7366_v29 }
 0x9b9   :  { %v4361_v59 = vpop.f32.mrf.mxu0 }
 0x9ba   :  { %v4441_v0 = vrot.slane %v4361_v59, %v7974_v14 }
 0x9bb   :  { %v6972_v2 = vpop.f32.mrf.mxu0 }
 0x9bc   :  { %v4442_v5 = vmul.f32 %v4441_v0, %v8647_v9  ;;  %v4890_v2 = vld [vmem:[%s8904_s16] sm:$0x1] }
 0x9bd   :  { %v4434_v3 = vpop.f32.mrf.mxu1 }
 0x9be   :  { %v4446_v60 = vrot.slane %v4434_v3, %v7974_v14 }
 0x9bf   :  { %v6979_v62 = vpop.f32.mrf.mxu1 }
 0x9c0   :  { %v4447_v6 = vadd.f32 %v4446_v60, %v4442_v5  ;;  %v4894_v60 = vld [vmem:[%s8904_s16 + $0x1] sm:$0x1] }
 0x9c2   :  { %v4448_v7 = vmax.f32 %v4447_v6, 0.0 }
 0x9c4   :  { %v5993_v8 = vpack.c.bf16 %v4448_v7, %v4448_v7  ;;  %v7339_v7 = vld [vmem:[%s8905_s11 + $0x18] sm:$0xff]  }
 0x9c6   :  { %v4457_v32 = vrot.slane %v5993_v8, 7  ;;  %v7342_v8 = vld [vmem:[%s8905_s11 + $0x8] sm:$0xff]  }
 0x9c8   :  { %v4458_v12 = vrot.slane %v4457_v32, 4  ;;  %4462 = vst.msk [vmem:[#allocation3] sm:$0xe] %vm4461_vm5, %v4457_v32  ;;  %v7343_v32 = vld [vmem:[%s8905_s11 + $0x30] sm:$0xff]  }
 0x9ca   :  { %4463 = vst.msk [vmem:[#allocation3 + $0x4] sm:$0x1] %vm4449_vm3, %v4458_v12  ;;  %v7344_v12 = vld [vmem:[%s8905_s11] sm:$0xff]  }
 0x9cf   :  { %v4464_v13 = vld [vmem:[#allocation3] sm:$0xf] }
 0x9d0   :  { %7001 = vmatmul.mubr.msk.bf16.vlgmr.msra.gmra.mxu1 %vm4108_vm0, %v4464_v13  ;;  %v7345_v13 = vld [vmem:[%s8905_s11 + $0x28] sm:$0xff]  }
 0x9d1   :  { %v7333_v15 = vld [vmem:[#allocation3] sm:$0x1e]   ;;  %7017 = vmatpush3.msra.mxu1 %v8575_v36  ;;  %7032 = vmatprep.mubr.msk.f32.mxu1 %vm7367_vm4, %v7366_v29 }
 0x9d2   :  { %7018 = vmatprep.subr.mxu1 %v7366_v29  ;;  %v4489_v17 = vrot.slane %v7333_v15, 1  ;;  %v7338_v24 = vld [vmem:[#allocation3] sm:$0x3c]   ;;  %v7346_v15 = vld [vmem:[%s8905_s11 + $0x20] sm:$0xff]  }
 0x9d3   :  { %7019 = vmatpush3.msra.mxu1 %v8583_v45  ;;  %v4640_v43 = vrot.slane %v7338_v24, 2 }
 0x9d4   :  { %7020 = vmatprep.subr.mxu1 %v7366_v29  ;;  %6989 = vmatmul.mubr.msk.bf16.vlgmr.msra.gmra.mxu0 %vm4108_vm0, %v4489_v17 }
 0x9d5   :  { %7021 = vmatpush3.msra.mxu1 %v8592_v37  ;;  %7005 = vmatpush3.bf16.msra.mxu0 %v7334_v16 }
 0x9d6   :  { %7012 = vmatprep.mubr.msk.bf16.mxu0 %vm7367_vm4, %v7366_v29  ;;  %7006 = vmatprep.subr.bf16.mxu0 %v7366_v29 }
 0x9d7   :  { %7022 = vmatprep.subr.mxu1 %v7366_v29 }
 0x9d8   :  { %7023 = vmatpush3.msra.mxu1 %v8599_v25 }
 0x9d9   :  { %7024 = vmatprep.subr.mxu1 %v7366_v29  ;;  %7007 = vmatpush3.bf16.msra.mxu0 %v7335_v18 }
 0x9da   :  { %7025 = vmatpush3.msra.mxu1 %v8607_v38  ;;  %7008 = vmatprep.subr.bf16.mxu0 %v7366_v29 }
 0x9db   :  { %7026 = vmatprep.subr.mxu1 %v7366_v29 }
 0x9dc   :  { %7027 = vmatpush3.msra.mxu1 %v8616_v53 }
 0x9dd   :  { %7028 = vmatprep.subr.mxu1 %v7366_v29  ;;  %7009 = vmatpush3.bf16.msra.mxu0 %v7336_v19 }
 0x9de   :  { %7029 = vmatpush3.msra.mxu1 %v8625_v39  ;;  %7010 = vmatprep.subr.bf16.mxu0 %v7366_v29 }
 0x9df   :  { %7030 = vmatprep.subr.mxu1 %v7366_v29 }
 0x9e0   :  { %7031 = vmatpush3.msra.mxu1 %v8634_v41 }
 0x9e1   :  { %7054 = vmatprep.subr.mxu1 %v7366_v29  ;;  %7011 = vmatpush3.bf16.msra.mxu0 %v7337_v21 }
 0x9e2   :  { %7035 = vmatprep.subr.mxu0 %v7366_v29 }
 0x9e4   :  { %7013 = vmatmul.mubr.msk.bf16.vlgmr.msra.gmra.mxu0 %vm4108_vm0, %v4640_v43 }
 0x9e5   :  { %7036 = vmatpush3.msra.mxu0 %v8575_v36  ;;  %7051 = vmatprep.mubr.msk.f32.mxu0 %vm7367_vm4, %v7366_v29 }
 0x9e6   :  { %7037 = vmatprep.subr.mxu0 %v7366_v29 }
 0x9e7   :  { %7038 = vmatpush3.msra.mxu0 %v8583_v45 }
 0x9e8   :  { %7039 = vmatprep.subr.mxu0 %v7366_v29 }
 0x9e9   :  { %7040 = vmatpush3.msra.mxu0 %v8592_v37 }
 0x9ea   :  { %7041 = vmatprep.subr.mxu0 %v7366_v29 }
 0x9eb   :  { %7042 = vmatpush3.msra.mxu0 %v8599_v25 }
 0x9ec   :  { %7043 = vmatprep.subr.mxu0 %v7366_v29 }
 0x9ed   :  { %7044 = vmatpush3.msra.mxu0 %v8607_v38 }
 0x9ee   :  { %7045 = vmatprep.subr.mxu0 %v7366_v29 }
 0x9ef   :  { %7046 = vmatpush3.msra.mxu0 %v8616_v53 }
 0x9f0   :  { %7047 = vmatprep.subr.mxu0 %v7366_v29 }
 0x9f1   :  { %7048 = vmatpush3.msra.mxu0 %v8625_v39  ;;  %v5944_v39 = vld [vmem:[%s8903_s10] ss:$0 sm:$0xff] }
 0x9f2   :  { %7049 = vmatprep.subr.mxu0 %v7366_v29 }
 0x9f3   :  { %7050 = vmatpush3.msra.mxu0 %v8634_v41 }
 0x9f4   :  { %7080 = vmatprep.subr.bf16.mxu0 %v7366_v29 }
 0xa90   :  { %v4618_v36 = vpop.f32.mrf.mxu1 }
 0xa92   :  { %v7002_v45 = vpop.f32.mrf.mxu1 }
 0xa94   :  { %v4621_v37 = vpop.f32.mrf.mxu1  ;;  %v4551_v25 = vpop.f32.mrf.mxu0 }
 0xa95   :  { %v4619_v26 = vadd.f32 %v4618_v36, %v4551_v25 }
 0xa96   :  { %v7003_v44 = vpop.f32.mrf.mxu1  ;;  %v6990_v38 = vpop.f32.mrf.mxu0 }
 0xa98   :  { %v4554_v46 = vpop.f32.mrf.mxu0 }
 0xa9a   :  { %v6991_v47 = vpop.f32.mrf.mxu0 }
 0xa9b   :  { %v7348_v47 = vld [vmem:[%s8905_s11 + $0x58] sm:$0xff]  }
 0xaa4   :  { %v4702_v53 = vpop.f32.mrf.mxu0 }
 0xaa5   :  { %v4708_v27 = vadd.f32 %v4702_v53, %v4619_v26  ;;  %v7350_v53 = vld [vmem:[%s8905_s11 + $0x48] sm:$0xff]  }
 0xaa6   :  { %v7014_v28 = vpop.f32.mrf.mxu0 }
 0xaa7   :  { %v8789_v48 = vadd.f32 %v5944_v39, %v4708_v27  ;;  %v7351_v39 = vld [vmem:[%s8905_s11 + $0x40] sm:$0xff]  }
 0xaa8   :  { %v4705_v41 = vpop.f32.mrf.mxu0 }
 0xaa9   :  { %v4717_v50 = vsel %vm4108_vm0, %v8789_v48, 0.0  ;;  %v4724_v30 = vmul.f32 %v8789_v48, %v8789_v48 }
 0xaaa   :  { %v4718_v31 = vrot.slane %v4717_v50, 4  ;;  %v7015_v11 = vpop.f32.mrf.mxu0 }
 0xaab   :  { %v4725_v51 = vsel %vm4108_vm0, %v4724_v30, 0.0 }
 0xaac   :  { %v4719_v33 = vadd.f32 %v4718_v31, %v4717_v50  ;;  %v4726_v34 = vrot.slane %v4725_v51, 4 }
 0xaae   :  { %v4720_v35 = vrot.slane %v4719_v33, 2  ;;  %v4727_v52 = vadd.f32 %v4726_v34, %v4725_v51 }
 0xab0   :  { %v4721_v20 = vadd.f32 %v4720_v35, %v4719_v33  ;;  %v4728_v42 = vrot.slane %v4727_v52, 2 }
 0xab2   :  { %v4722_v63 = vrot.slane %v4721_v20, 1  ;;  %v4729_v1 = vadd.f32 %v4728_v42, %v4727_v52  ;;  %v5983_v52 = vld [vmem:[%s8906_s12] ss:$0 sm:$0xff] }
 0xab4   :  { %v4723_v4 = vadd.f32 %v4722_v63, %v4721_v20  ;;  %v4730_v54 = vrot.slane %v4729_v1, 1 }
 0xab6   :  { %7033 = vmatmul.mubr.msk.f32.vlgmr.msra.gmra.mxu1 %vm4108_vm0, %v4723_v4  ;;  %v4731_v22 = vadd.f32 %v4730_v54, %v4729_v1 }
 0xab7   :  { %7055 = vmatpush3.msra.mxu1 %v8663_v49  ;;  %7058 = vmatprep.mubr.msk.f32.mxu1 %vm7367_vm4, %v7366_v29 }
 0xab8   :  { %7052 = vmatmul.mubr.msk.f32.vlgmr.msra.gmra.mxu0 %vm4108_vm0, %v4731_v22  ;;  %7056 = vmatprep.subr.mxu1 %v7366_v29 }
 0xab9   :  { %7057 = vmatpush3.msra.mxu1 %v8668_v10  ;;  %7088 = vmatprep.mubr.msk.bf16.mxu0 %vm7367_vm4, %v7366_v29 }
 0xaba   :  { %7061 = vmatprep.subr.mxu1 %v7366_v29  ;;  %7081 = vmatpush3.bf16.msra.mxu0 %v7339_v7 }
 0xabb   :  { %7082 = vmatprep.subr.bf16.mxu0 %v7366_v29 }
 0xb76   :  { %v4809_v23 = vpop.f32.mrf.mxu1 }
 0xb77   :  { %v4886_v55 = vmul.f32 0.03125, %v4809_v23 }
 0xb78   :  { %v7034_v61 = vpop.f32.mrf.mxu1  ;;  %v4882_v56 = vpop.f32.mrf.mxu0 }
 0xb79   :  { %v4888_v57 = vmul.f32 %v4886_v55, %v4886_v55  ;;  %v4887_v40 = vmul.f32 0.03125, %v4882_v56 }
 0xb7a   :  { %v7053_v58 = vpop.f32.mrf.mxu0 }
 0xb7b   :  { %v4889_v59 = vsub.f32 %v4887_v40, %v4888_v57 }
 0xb7d   :  { %v4891_v0 = vadd.f32 1e-05, %v4889_v59 }
 0xb7f   :  { %7359 = vrsqrt.f32 %v4891_v0 }
 0xb8c   :  { %v7360_v3 = vpop.eup %7359 }
 0xb8d   :  { %v4893_v5 = vmul.f32 %v7360_v3, %v4890_v2 }
 0xb8f   :  { %7059 = vmatmul.mubr.msk.f32.vlgmr.msra.gmra.mxu1 %vm4291_vm2, %v4893_v5  ;;  %v4895_v62 = vmul.f32 %v4893_v5, %v4886_v55 }
 0xb90   :  { %7062 = vmatpush3.msra.mxu1 %v8663_v49  ;;  %7065 = vmatprep.mubr.msk.f32.mxu1 %vm7367_vm4, %v7366_v29  ;;  %v7340_v49 = vld [vmem:[%s8905_s11 + $0x10] sm:$0xff]  }
 0xb91   :  { %7063 = vmatprep.subr.mxu1 %v7366_v29  ;;  %v4896_v6 = vsub.f32 %v4894_v60, %v4895_v62  ;;  %7083 = vmatpush3.bf16.msra.mxu0 %v7340_v49 }
 0xb92   :  { %7064 = vmatpush3.msra.mxu1 %v8668_v10  ;;  %v7341_v10 = vld [vmem:[%s8905_s11 + $0x38] sm:$0xff]   ;;  %7084 = vmatprep.subr.bf16.mxu0 %v7366_v29 }
 0xb93   :  { %7066 = vmatmul.mubr.msk.f32.vlgmr.msra.gmra.mxu1 %vm4291_vm2, %v4896_v6  ;;  %7068 = vmatprep.subr.bf16.mxu1 %v7366_v29 }
 0xb94   :  { %7076 = vmatprep.mubr.msk.bf16.mxu1 %vm7367_vm4, %v7366_v29  ;;  %7069 = vmatpush3.bf16.msra.mxu1 %v7341_v10 }
 0xb95   :  { %7070 = vmatprep.subr.bf16.mxu1 %v7366_v29  ;;  %7085 = vmatpush3.bf16.msra.mxu0 %v7342_v8 }
 0xb96   :  { %7086 = vmatprep.subr.bf16.mxu0 %v7366_v29 }
 0xb98   :  { %7071 = vmatpush3.bf16.msra.mxu1 %v7343_v32 }
 0xb99   :  { %7072 = vmatprep.subr.bf16.mxu1 %v7366_v29  ;;  %7087 = vmatpush3.bf16.msra.mxu0 %v7344_v12 }
 0xb9c   :  { %7073 = vmatpush3.bf16.msra.mxu1 %v7345_v13 }
 0xb9d   :  { %7074 = vmatprep.subr.bf16.mxu1 %v7366_v29 }
 0xba0   :  { %7075 = vmatpush3.bf16.msra.mxu1 %v7346_v15 }
 0xba1   :  { %7092 = vmatprep.subr.bf16.mxu1 %v7366_v29 }
 0xc4f   :  { %v4968_v16 = vpop.f32.mrf.mxu1 }
 0xc50   :  { %v5048_v17 = vrot.slane %v4968_v16, %v7974_v14 }
 0xc51   :  { %v7060_v18 = vpop.f32.mrf.mxu1 }
 0xc52   :  { %v5049_v21 = vmul.f32 %v5048_v17, %v8789_v48 }
 0xc53   :  { %v5041_v19 = vpop.f32.mrf.mxu1 }
 0xc54   :  { %v5053_v24 = vrot.slane %v5041_v19, %v7974_v14  ;;  %v7349_v14 = vld [vmem:[%s8905_s11 + $0x50] sm:$0xff]  }
 0xc55   :  { %v7067_v43 = vpop.f32.mrf.mxu1 }
 0xc56   :  { %v5054_v36 = vadd.f32 %v5053_v24, %v5049_v21 }
 0xc58   :  { %v5055_v45 = vmax.f32 %v5054_v36, 0.0 }
 0xc5a   :  { %v5994_v37 = vpack.c.bf16 %v5055_v45, %v5055_v45 }
 0xc5c   :  { %v5060_v25 = vrot.slane %v5994_v37, 7 }
 0xc5e   :  { %v5061_v44 = vrot.slane %v5060_v25, 4  ;;  %5064 = vst.msk [vmem:[#allocation3] sm:$0xe] %vm4461_vm5, %v5060_v25 }
 0xc60   :  { %5065 = vst.msk [vmem:[#allocation3 + $0x4] sm:$0x1] %vm4449_vm3, %v5061_v44 }
 0xc65   :  { %v5066_v38 = vld [vmem:[#allocation3] sm:$0xf] }
 0xc66   :  { %7089 = vmatmul.mubr.msk.bf16.vlgmr.msra.gmra.mxu0 %vm4108_vm0, %v5066_v38 }
 0xc67   :  { %v7347_v46 = vld [vmem:[#allocation3] sm:$0x1e]  }
 0xc68   :  { %v5091_v26 = vrot.slane %v7347_v46, 1  ;;  %v7352_v27 = vld [vmem:[#allocation3] sm:$0x3c]  }
 0xc69   :  { %v5242_v28 = vrot.slane %v7352_v27, 2 }
 0xc6a   :  { %7077 = vmatmul.mubr.msk.bf16.vlgmr.msra.gmra.mxu1 %vm4108_vm0, %v5091_v26 }
 0xc6b   :  { %7093 = vmatpush3.bf16.msra.mxu1 %v7348_v47  ;;  %7100 = vmatprep.mubr.msk.bf16.mxu1 %vm7367_vm4, %v7366_v29 }
 0xc6c   :  { %7094 = vmatprep.subr.bf16.mxu1 %v7366_v29 }
 0xc6f   :  { %7095 = vmatpush3.bf16.msra.mxu1 %v7349_v14 }
 0xc70   :  { %7096 = vmatprep.subr.bf16.mxu1 %v7366_v29 }
 0xc73   :  { %7097 = vmatpush3.bf16.msra.mxu1 %v7350_v53 }
 0xc74   :  { %7098 = vmatprep.subr.bf16.mxu1 %v7366_v29 }
 0xc77   :  { %7099 = vmatpush3.bf16.msra.mxu1 %v7351_v39 }
 0xc7a   :  { %7101 = vmatmul.mubr.msk.bf16.vlgmr.msra.gmra.mxu1 %vm4108_vm0, %v5242_v28 }
 0xd26   :  { %v5220_v48 = vpop.f32.mrf.mxu0 }
 0xd28   :  { %v7090_v41 = vpop.f32.mrf.mxu0 }
 0xd2a   :  { %v5223_v50 = vpop.f32.mrf.mxu0  ;;  %v5153_v30 = vpop.f32.mrf.mxu1 }
 0xd2b   :  { %v5221_v34 = vadd.f32 %v5220_v48, %v5153_v30 }
 0xd2c   :  { %v7091_v31 = vpop.f32.mrf.mxu0  ;;  %v7078_v11 = vpop.f32.mrf.mxu1 }
 0xd2e   :  { %v5156_v51 = vpop.f32.mrf.mxu1 }
 0xd30   :  { %v7079_v33 = vpop.f32.mrf.mxu1 }
 0xd3a   :  { %v5304_v35 = vpop.f32.mrf.mxu1 }
 0xd3b   :  { %v5310_v29 = vadd.f32 %v5304_v35, %v5221_v34 }
 0xd3c   :  { %v7102_v20 = vpop.f32.mrf.mxu1 }
 0xd3d   :  { %v5318_v42 = vadd.f32 %v5983_v52, %v5310_v29 }
 0xd3e   :  { %v5307_v63 = vpop.f32.mrf.mxu1 }
 0xd3f   :  { %v5319_v1 = vadd.f32 %v5318_v42, %v8647_v9 }
 0xd40   :  { %v7103_v4 = vpop.f32.mrf.mxu1 }
 0xd41   :  { %5320 = vst.msk [vmem:[%s8907_s21] sm:$0xff] %vm4108_vm0, %v5319_v1 }

</bundles_post_ra>
